<compile_context>
chip_gen: v5e
topology: v5e:2x2
jax: 0.10.0
libtpu: 0.0.40
codegen_flags: <defaults>
</compile_context>

<pallas_src>
import numpy as np
import jax
import jax.numpy as jnp
from jax.experimental import pallas as pl
from jax.experimental.pallas import tpu as pltpu

LANE = 128
SUBLANE = 8


def _round_up(n: int, m: int) -> int:
    return ((n + m - 1) // m) * m


def _make_kernel(modulus: float, tau: float, D: int, Pj: int, H1P: int):
    inv_mod = 1.0 / modulus
    inv_tau = 1.0 / tau
    f32 = jnp.float32

    def kernel(x_ref, wxc_ref, ewt_ref, w1_ref, w2_ref, w3_ref, o_ref):
        x = x_ref[...]                                               # (TB, D)

        # Shared-LHS fused matmul: one K=D pass gives both the (linear) cyclic-
        # difference contribution to hidden layer 1 and the cyclic projection.
        # The split at lane 128 is vreg-aligned (free).
        r = jnp.dot(x, wxc_ref[:D, :], preferred_element_type=f32)   # (TB, H1P+Pj)
        hx = r[:, :H1P]                                              # d @ W1d (folded)
        c = r[:, H1P:] + wxc_ref[D:D + 1, H1P:]                      # x @ Wc + bc
        c = c - modulus * jnp.floor(c * inv_mod)                     # torch float `%`

        # Tropical branch: tau * logsumexp_i((x_i + Wt[i,j]) / tau).  exp-weights are
        # column-max-stabilised wrapper-side; the shift is folded into the bias row.
        m = jnp.max(x, axis=-1, keepdims=True)
        ex = jnp.exp((x - m) * inv_tau)
        t = m + tau * jnp.log(
            jnp.dot(ex, ewt_ref[...], preferred_element_type=f32))   # (TB, Pj)

        # Hidden layer 1: rows [0:Pj)=W1c, [Pj:2Pj)=W1t of the slab, row 2Pj = bias
        # (the bias row also sets the constant-1 lane that carries b2/b3 downstream).
        h = (hx
             + jnp.dot(c, w1_ref[:Pj, :], preferred_element_type=f32)
             + jnp.dot(t, w1_ref[Pj:2 * Pj, :], preferred_element_type=f32)
             + w1_ref[2 * Pj:2 * Pj + 1, :])
        h = jnp.maximum(h, 0.0)                                      # (TB, H1P)

        # Hidden layer 2: BN1 affine + b2 folded into the w2 slab (constant-1 lane).
        h = jnp.maximum(jnp.dot(h, w2_ref[...], preferred_element_type=f32), 0.0)

        # Output head: BN2 affine + b3 folded into the w3 slab.  Stored at the real
        # (unpadded) output width -> minimal HBM writeback.
        o_ref[...] = jnp.dot(h, w3_ref[...], preferred_element_type=f32)

    return kernel


def cyclic_tropical_difference_net(x, ops, *, modulus, tau, block_b=512):
    """x: (B, D) float32; ops: folded weight slabs.  Returns (B, out_dim) float32."""
    B, D = x.shape
    Pj = ops["ewt"].shape[1]
    H1P = ops["w2s"].shape[0]
    H2P = ops["w2s"].shape[1]
    out_dim = ops["w3s"].shape[1]
    assert ops["wxc"].shape[1] == H1P + Pj

    if B <= block_b:
        tb, Bp = B, B
    else:
        assert block_b % SUBLANE == 0, "block_b must be a multiple of 8"
        tb = block_b
        Bp = _round_up(B, tb)
    xp = x if Bp == B else jnp.pad(x, ((0, Bp - B), (0, 0)))   # zero rows are safe

    weights = (ops["wxc"], ops["ewt"], ops["w1ctb"], ops["w2s"], ops["w3s"])

    def resident(a):   # full-array block, constant index_map -> stays VMEM-resident
        return pl.BlockSpec(a.shape, lambda i: (0, 0))

    flops = 2 * Bp * (D * (H1P + Pj) + D * Pj + 2 * Pj * H1P
                      + H1P * H2P + H2P * out_dim)
    transcendentals = Bp * (D + Pj)
    bytes_accessed = 4 * (Bp * D + Bp * out_dim + sum(int(w.size) for w in weights))

    kernel = _make_kernel(modulus, tau, D, Pj, H1P)
    out = pl.pallas_call(
        kernel,
        out_shape=jax.ShapeDtypeStruct((Bp, out_dim), jnp.float32),
        grid=(Bp // tb,),
        in_specs=[pl.BlockSpec((tb, D), lambda i: (i, 0))]
                 + [resident(w) for w in weights],
        out_specs=pl.BlockSpec((tb, out_dim), lambda i: (i, 0)),
        compiler_params=pltpu.CompilerParams(dimension_semantics=("parallel",)),
        cost_estimate=pl.CostEstimate(flops=flops,
                                      transcendentals=transcendentals,
                                      bytes_accessed=bytes_accessed),
    )(xp, *weights)
    return out if Bp == B else out[:B]


# ----------------------------- parameter builders -----------------------------

def make_model_params(key, input_dim, projection_dim, hidden_dims, output_dim):
    """Raw (unfolded) module parameters; eval-mode BatchNorm running stats included."""
    keys = jax.random.split(key, 16)
    it = iter(keys)
    p = {}

    def linear(k, din, dout):
        bound = 1.0 / np.sqrt(din)
        kw, kb = jax.random.split(k)
        w = jax.random.uniform(kw, (din, dout), jnp.float32, -bound, bound)
        b = jax.random.uniform(kb, (1, dout), jnp.float32, -bound, bound)
        return w, b

    # CyclicTropicalDifferenceLayer parameters.
    p["wc"], p["bc"] = linear(next(it), input_dim, projection_dim)
    bnd = 1.0 / np.sqrt(input_dim)
    p["wt"] = jax.random.uniform(next(it), (input_dim, projection_dim),
                                 jnp.float32, -bnd, bnd)

    feat_dim = 2 * projection_dim + input_dim        # concat([cyclic, tropical, diff])
    dims = [feat_dim] + list(hidden_dims)
    for li, (din, dout) in enumerate(zip(dims[:-1], dims[1:]), start=1):
        p[f"w{li}"], p[f"b{li}"] = linear(next(it), din, dout)
        kg, kb2, km, kv = jax.random.split(next(it), 4)
        gamma = 1.0 + 0.1 * jax.random.normal(kg, (1, dout), jnp.float32)
        beta = 0.1 * jax.random.normal(kb2, (1, dout), jnp.float32)
        rmean = 0.05 * jax.random.normal(km, (1, dout), jnp.float32)
        rvar = jax.random.uniform(kv, (1, dout), jnp.float32, 0.5, 1.5)
        s = gamma / jnp.sqrt(rvar + 1e-5)
        p[f"s{li}"] = s
        p[f"t{li}"] = beta - rmean * s

    nl = len(hidden_dims) + 1
    p[f"w{nl}"], p[f"b{nl}"] = linear(next(it), dims[-1], output_dim)
    return p


def fold_kernel_operands(p, *, input_dim, projection_dim, hidden_dims, output_dim, tau):
    """Wrapper-side constant folding + packing into 5 weight slabs (exact in exact
    arithmetic; done in float64, cast to f32 at the end)."""
    D, Pj = input_dim, projection_dim
    h1, h2 = hidden_dims
    H1P = _round_up(h1 + 1, LANE)     # +1 = constant-1 lane that carries b2/b3
    H2P = _round_up(h2 + 1, LANE)
    C1, C2 = h1, h2                   # constant-lane positions

    f64 = np.float64
    wc = np.asarray(p["wc"], f64); bc = np.asarray(p["bc"], f64)
    wt = np.asarray(p["wt"], f64)
    w1 = np.asarray(p["w1"], f64); b1 = np.asarray(p["b1"], f64)
    w2 = np.asarray(p["w2"], f64); b2 = np.asarray(p["b2"], f64)
    w3 = np.asarray(p["w3"], f64); b3 = np.asarray(p["b3"], f64)
    s1 = np.asarray(p["s1"], f64).reshape(-1); t1 = np.asarray(p["t1"], f64).reshape(-1)
    s2 = np.asarray(p["s2"], f64).reshape(-1); t2 = np.asarray(p["t2"], f64).reshape(-1)

    w1c, w1t, w1d = w1[:Pj], w1[Pj:2 * Pj], w1[2 * Pj:]

    # diff branch is linear: d = x - roll(x, 1) = x @ (I - S), S[i, (i+1)%D] = 1.
    S = np.zeros((D, D), f64); S[np.arange(D), (np.arange(D) + 1) % D] = 1.0
    w1x = (np.eye(D) - S) @ w1d                                     # (D, h1)

    # tropical: column-max-stabilised exp weights; shift folded into layer-1 bias.
    mcol = wt.max(axis=0, keepdims=True)                            # (1, Pj)
    ewt = np.exp((wt - mcol) / tau)                                 # (D, Pj)
    b1_eff = b1.reshape(-1) + (mcol @ w1t).reshape(-1)              # (h1,)

    # slab 1: [ (I-S)@W1d -> layer-1 cols | Wc ], extra row = bc.
    wxc = np.zeros((_round_up(D + 1, SUBLANE), H1P + Pj), f64)
    wxc[:D, :h1] = w1x
    wxc[:D, H1P:] = wc
    wxc[D, H1P:] = bc.reshape(-1)

    # slab 2: [W1c ; W1t ; b1_eff], constant-1 lane created at column C1.
    w1ctb = np.zeros((_round_up(2 * Pj + 1, SUBLANE), H1P), f64)
    w1ctb[:Pj, :h1] = w1c
    w1ctb[Pj:2 * Pj, :h1] = w1t
    w1ctb[2 * Pj, :h1] = b1_eff
    w1ctb[2 * Pj, C1] = 1.0

    # slab 3: eval-mode BN1 affine + b2 folded into W2 (exact: ReLU precedes BN);
    # the constant-1 lane is propagated to column C2.
    w2s = np.zeros((H1P, H2P), f64)
    w2s[:h1, :h2] = s1[:, None] * w2
    w2s[C1, :h2] = t1 @ w2 + b2.reshape(-1)
    w2s[C1, C2] = 1.0

    # slab 4: BN2 affine + b3 folded into W3 (true output width -> no padded store).
    w3s = np.zeros((H2P, output_dim), f64)
    w3s[:h2, :] = s2[:, None] * w3
    w3s[C2, :] = t2 @ w3 + b3.reshape(-1)

    dev = lambda a: jnp.asarray(np.asarray(a, np.float32))
    return {"wxc": dev(wxc), "ewt": dev(ewt), "w1ctb": dev(w1ctb),
            "w2s": dev(w2s), "w3s": dev(w3s)}


def reference_forward(x, p, *, modulus, tau):
    """Independent float64 numpy reference of the natural (unfolded) formulation."""
    f64 = np.float64
    x = np.asarray(x, f64)
    wc = np.asarray(p["wc"], f64); bc = np.asarray(p["bc"], f64)
    wt = np.asarray(p["wt"], f64)
    c = x @ wc + bc
    c = c - modulus * np.floor(c / modulus)
    z = (x[:, :, None] + wt[None, :, :]) / tau                      # (B, D, Pj)
    zm = z.max(axis=1, keepdims=True)
    t = tau * (np.log(np.exp(z - zm).sum(axis=1)) + zm[:, 0, :])
    d = x - np.roll(x, 1, axis=-1)
    f = np.concatenate([c, t, d], axis=-1)
    h = np.maximum(f @ np.asarray(p["w1"], f64) + np.asarray(p["b1"], f64), 0.0)
    h = h * np.asarray(p["s1"], f64) + np.asarray(p["t1"], f64)
    h = np.maximum(h @ np.asarray(p["w2"], f64) + np.asarray(p["b2"], f64), 0.0)
    h = h * np.asarray(p["s2"], f64) + np.asarray(p["t2"], f64)
    return h @ np.asarray(p["w3"], f64) + np.asarray(p["b3"], f64)


if __name__ == "__main__":
    input_dim, projection_dim = 16, 32
    hidden_dims, output_dim = [64, 32], 4
    modulus, tau = 7.0, 0.2
    batch, block_b = 2048, 512      # grid = 4 -> >=2 pipelined steps per v7x core

    key = jax.random.PRNGKey(0)
    kx, kp = jax.random.split(key)
    x = jax.random.normal(kx, (batch, input_dim), jnp.float32)

    raw = make_model_params(kp, input_dim, projection_dim, hidden_dims, output_dim)
    ops = fold_kernel_operands(raw, input_dim=input_dim, projection_dim=projection_dim,
                               hidden_dims=hidden_dims, output_dim=output_dim, tau=tau)

    out = cyclic_tropical_difference_net(x, ops, modulus=modulus, tau=tau,
                                         block_b=block_b)
    out = jax.block_until_ready(out)

    ref = reference_forward(np.asarray(x), raw, modulus=modulus, tau=tau)
    assert out.shape == (batch, output_dim)
    np.testing.assert_allclose(np.asarray(out), ref, rtol=2e-4, atol=2e-4)
    print("KERNEL_OK")
</pallas_src>

<mosaic_0001>
module attributes {stable_mosaic.version = 11 : i64} {
  func.func @kernel(%arg0: i32, %arg1: memref<512x16xf32, #tpu.memory_space<vmem>>, %arg2: memref<24x160xf32, #tpu.memory_space<vmem>>, %arg3: memref<16x32xf32, #tpu.memory_space<vmem>>, %arg4: memref<72x128xf32, #tpu.memory_space<vmem>>, %arg5: memref<128x128xf32, #tpu.memory_space<vmem>>, %arg6: memref<128x4xf32, #tpu.memory_space<vmem>>, %arg7: memref<512x4xf32, #tpu.memory_space<vmem>>) attributes {dimension_semantics = [#tpu.dimension_semantics<parallel>], iteration_bounds = array<i64: 4>, scalar_prefetch = 0 : i64, scratch_operands = 0 : i64, tpu.core_type = #tpu.core_type<tc>, window_params = [{transform_indices = @transform_0, window_bounds = array<i64: 512, 16>}, {pipeline_mode = #tpu.pipeline_mode<synchronous>, transform_indices = @transform_1, window_bounds = array<i64: 24, 160>}, {pipeline_mode = #tpu.pipeline_mode<synchronous>, transform_indices = @transform_2, window_bounds = array<i64: 16, 32>}, {pipeline_mode = #tpu.pipeline_mode<synchronous>, transform_indices = @transform_3, window_bounds = array<i64: 72, 128>}, {pipeline_mode = #tpu.pipeline_mode<synchronous>, transform_indices = @transform_4, window_bounds = array<i64: 128, 128>}, {pipeline_mode = #tpu.pipeline_mode<synchronous>, transform_indices = @transform_5, window_bounds = array<i64: 128, 4>}, {transform_indices = @transform_6, window_bounds = array<i64: 512, 4>}]} {
    %c0 = arith.constant 0 : index
    %c0_0 = arith.constant 0 : index
    %0 = vector.load %arg1[%c0, %c0_0] : memref<512x16xf32, #tpu.memory_space<vmem>>, vector<512x16xf32>
    %c0_1 = arith.constant 0 : index
    %c0_2 = arith.constant 0 : index
    %1 = vector.load %arg2[%c0_1, %c0_2] : memref<24x160xf32, #tpu.memory_space<vmem>>, vector<16x160xf32>
    %cst = arith.constant dense<0.000000e+00> : vector<512x160xf32>
    %2 = tpu.matmul %0, %1, %cst {dimension_numbers = #tpu.dot_dimension_numbers<[1], [0], [0], [1], [0, 0, 1, 1], [], []>} : vector<512x16xf32>, vector<16x160xf32>, vector<512x160xf32> -> vector<512x160xf32>
    %3 = vector.extract_strided_slice %2 {offsets = [0, 0], sizes = [512, 128], strides = [1, 1]} : vector<512x160xf32> to vector<512x128xf32>
    %4 = vector.extract_strided_slice %2 {offsets = [0, 128], sizes = [512, 32], strides = [1, 1]} : vector<512x160xf32> to vector<512x32xf32>
    %c16 = arith.constant 16 : index
    %c128 = arith.constant 128 : index
    %5 = vector.load %arg2[%c16, %c128] : memref<24x160xf32, #tpu.memory_space<vmem>>, vector<1x32xf32>
    %6 = vector.broadcast %5 : vector<1x32xf32> to vector<512x32xf32>
    %7 = arith.addf %4, %6 : vector<512x32xf32>
    %cst_3 = arith.constant 0.142857149 : f32
    %8 = vector.broadcast %cst_3 : f32 to vector<512x32xf32>
    %9 = arith.mulf %7, %8 : vector<512x32xf32>
    %10 = math.floor %9 : vector<512x32xf32>
    %cst_4 = arith.constant 7.000000e+00 : f32
    %11 = vector.broadcast %cst_4 : f32 to vector<512x32xf32>
    %12 = arith.mulf %11, %10 : vector<512x32xf32>
    %13 = arith.subf %7, %12 : vector<512x32xf32>
    %cst_5 = arith.constant dense<0xFF800000> : vector<512xf32>
    %14 = vector.multi_reduction <maximumf>, %0, %cst_5 [1] : vector<512x16xf32> to vector<512xf32>
    %15 = vector.shape_cast %14 : vector<512xf32> to vector<512x1xf32>
    %16 = vector.broadcast %15 : vector<512x1xf32> to vector<512x16xf32>
    %17 = arith.subf %0, %16 : vector<512x16xf32>
    %cst_6 = arith.constant 5.000000e+00 : f32
    %18 = vector.broadcast %cst_6 : f32 to vector<512x16xf32>
    %19 = arith.mulf %17, %18 : vector<512x16xf32>
    %20 = math.exp %19 : vector<512x16xf32>
    %c0_7 = arith.constant 0 : index
    %c0_8 = arith.constant 0 : index
    %21 = vector.load %arg3[%c0_7, %c0_8] : memref<16x32xf32, #tpu.memory_space<vmem>>, vector<16x32xf32>
    %cst_9 = arith.constant dense<0.000000e+00> : vector<512x32xf32>
    %22 = tpu.matmul %20, %21, %cst_9 {dimension_numbers = #tpu.dot_dimension_numbers<[1], [0], [0], [1], [0, 0, 1, 1], [], []>} : vector<512x16xf32>, vector<16x32xf32>, vector<512x32xf32> -> vector<512x32xf32>
    %23 = math.log %22 : vector<512x32xf32>
    %cst_10 = arith.constant 2.000000e-01 : f32
    %24 = vector.broadcast %cst_10 : f32 to vector<512x32xf32>
    %25 = arith.mulf %24, %23 : vector<512x32xf32>
    %26 = vector.broadcast %15 : vector<512x1xf32> to vector<512x32xf32>
    %27 = arith.addf %26, %25 : vector<512x32xf32>
    %c0_11 = arith.constant 0 : index
    %c0_12 = arith.constant 0 : index
    %28 = vector.load %arg4[%c0_11, %c0_12] : memref<72x128xf32, #tpu.memory_space<vmem>>, vector<32x128xf32>
    %cst_13 = arith.constant dense<0.000000e+00> : vector<512x128xf32>
    %29 = tpu.matmul %13, %28, %cst_13 {dimension_numbers = #tpu.dot_dimension_numbers<[1], [0], [0], [1], [0, 0, 1, 1], [], []>} : vector<512x32xf32>, vector<32x128xf32>, vector<512x128xf32> -> vector<512x128xf32>
    %30 = arith.addf %3, %29 : vector<512x128xf32>
    %c32 = arith.constant 32 : index
    %c0_14 = arith.constant 0 : index
    %31 = vector.load %arg4[%c32, %c0_14] : memref<72x128xf32, #tpu.memory_space<vmem>>, vector<32x128xf32>
    %cst_15 = arith.constant dense<0.000000e+00> : vector<512x128xf32>
    %32 = tpu.matmul %27, %31, %cst_15 {dimension_numbers = #tpu.dot_dimension_numbers<[1], [0], [0], [1], [0, 0, 1, 1], [], []>} : vector<512x32xf32>, vector<32x128xf32>, vector<512x128xf32> -> vector<512x128xf32>
    %33 = arith.addf %30, %32 : vector<512x128xf32>
    %c64 = arith.constant 64 : index
    %c0_16 = arith.constant 0 : index
    %34 = vector.load %arg4[%c64, %c0_16] : memref<72x128xf32, #tpu.memory_space<vmem>>, vector<1x128xf32>
    %35 = vector.broadcast %34 : vector<1x128xf32> to vector<512x128xf32>
    %36 = arith.addf %33, %35 : vector<512x128xf32>
    %cst_17 = arith.constant 0.000000e+00 : f32
    %37 = vector.broadcast %cst_17 : f32 to vector<512x128xf32>
    %38 = arith.maximumf %36, %37 : vector<512x128xf32>
    %c0_18 = arith.constant 0 : index
    %c0_19 = arith.constant 0 : index
    %39 = vector.load %arg5[%c0_18, %c0_19] : memref<128x128xf32, #tpu.memory_space<vmem>>, vector<128x128xf32>
    %cst_20 = arith.constant dense<0.000000e+00> : vector<512x128xf32>
    %40 = tpu.matmul %38, %39, %cst_20 {dimension_numbers = #tpu.dot_dimension_numbers<[1], [0], [0], [1], [0, 0, 1, 1], [], []>} : vector<512x128xf32>, vector<128x128xf32>, vector<512x128xf32> -> vector<512x128xf32>
    %cst_21 = arith.constant 0.000000e+00 : f32
    %41 = vector.broadcast %cst_21 : f32 to vector<512x128xf32>
    %42 = arith.maximumf %40, %41 : vector<512x128xf32>
    %c0_22 = arith.constant 0 : index
    %c0_23 = arith.constant 0 : index
    %43 = vector.load %arg6[%c0_22, %c0_23] : memref<128x4xf32, #tpu.memory_space<vmem>>, vector<128x4xf32>
    %cst_24 = arith.constant dense<0.000000e+00> : vector<512x4xf32>
    %44 = tpu.matmul %42, %43, %cst_24 {dimension_numbers = #tpu.dot_dimension_numbers<[1], [0], [0], [1], [0, 0, 1, 1], [], []>} : vector<512x128xf32>, vector<128x4xf32>, vector<512x4xf32> -> vector<512x4xf32>
    %c0_25 = arith.constant 0 : index
    %c0_26 = arith.constant 0 : index
    %45 = vector.load %arg7[%c0_25, %c0_26] : memref<512x4xf32, #tpu.memory_space<vmem>>, vector<512x4xf32>
    tpu.vector_store %arg7[%c0_25, %c0_26], %44 {strides = array<i32>} : memref<512x4xf32, #tpu.memory_space<vmem>>, vector<512x4xf32>,
    return
  }
  func.func @transform_0(%arg0: i32) -> (i32, i32) {
    %c0_i32 = arith.constant 0 : i32
    %c0_i32_0 = arith.constant 0 : i32
    return %arg0, %c0_i32 : i32, i32
  }
  func.func @transform_1(%arg0: i32) -> (i32, i32) {
    %c0_i32 = arith.constant 0 : i32
    %c0_i32_0 = arith.constant 0 : i32
    %c0_i32_1 = arith.constant 0 : i32
    return %c0_i32, %c0_i32_0 : i32, i32
  }
  func.func @transform_2(%arg0: i32) -> (i32, i32) {
    %c0_i32 = arith.constant 0 : i32
    %c0_i32_0 = arith.constant 0 : i32
    %c0_i32_1 = arith.constant 0 : i32
    return %c0_i32, %c0_i32_0 : i32, i32
  }
  func.func @transform_3(%arg0: i32) -> (i32, i32) {
    %c0_i32 = arith.constant 0 : i32
    %c0_i32_0 = arith.constant 0 : i32
    %c0_i32_1 = arith.constant 0 : i32
    return %c0_i32, %c0_i32_0 : i32, i32
  }
  func.func @transform_4(%arg0: i32) -> (i32, i32) {
    %c0_i32 = arith.constant 0 : i32
    %c0_i32_0 = arith.constant 0 : i32
    %c0_i32_1 = arith.constant 0 : i32
    return %c0_i32, %c0_i32_0 : i32, i32
  }
  func.func @transform_5(%arg0: i32) -> (i32, i32) {
    %c0_i32 = arith.constant 0 : i32
    %c0_i32_0 = arith.constant 0 : i32
    %c0_i32_1 = arith.constant 0 : i32
    return %c0_i32, %c0_i32_0 : i32, i32
  }
  func.func @transform_6(%arg0: i32) -> (i32, i32) {
    %c0_i32 = arith.constant 0 : i32
    %c0_i32_0 = arith.constant 0 : i32
    return %arg0, %c0_i32 : i32, i32
  }
}

</mosaic_0001>

<bundles_post_ra>
// kernel: tpu_custom_call.1
= control target key start
LH: loop header
LB: loop body
LE: loop exit
PB: predicated region body
PF: predicated region fallthrough
CT: control target
= control target key end

     0   :  { %s4723_s21 = smov 0   ;;  %s6810_s0 = inlined_call_operand.vmem [shape: f32[2048,16], index: 0, kind: input, shape index: {}]   ;;  %s6811_s1 = inlined_call_operand.vmem [shape: f32[24,160], index: 1, kind: input, shape index: {}]   ;;  %s6812_s2 = inlined_call_operand.vmem [shape: f32[16,32], index: 2, kind: input, shape index: {}]   ;;  %s6813_s3 = inlined_call_operand.vmem [shape: f32[72,128], index: 3, kind: input, shape index: {}]   ;;  %s6814_s4 = inlined_call_operand.vmem [shape: f32[128,128], index: 4, kind: input, shape index: {}]   ;;  %s6815_s5 = inlined_call_operand.vmem [shape: f32[128,4], index: 5, kind: input, shape index: {}]   ;;  %s6816_s6 = inlined_call_operand.vmem [shape: f32[2048,4], index: 6, kind: output, shape index: {}]  }
   0x1 LB: > { %s4066_s22 = sadd.s32 4294967295, %s4686_s21   ;;  %p4070_p0 = scmp.ge.s32.totalorder %s4686_s21, 1  ;;  %s4686_s21 = sphi %s4723_s21, %s16_s21  }
   0x2   : > { %p213_p1 = scmp.lt.s32.totalorder %s4686_s21, 5 }
   0x4   : > { %p214_p2 = pnand %p4070_p0, %p213_p1 }
   0x6   : > { %217 = sbr.rel (%p214_p2) target bundleno = 1308 (0x51c), region = 44 }
   0xb   : > { %v321_v0 = vld [vmem:[%s6811_s1 + $0x10] sm:$0xff]  ;;  %v319_v1 = vld [vmem:[%s6811_s1] sm:$0xff]  ;;  %s4071_s27 = sshll.u32 %s4066_s22, 6  ;;  %v322_v2 = vld [vmem:[%s6811_s1 + $0x18] sm:$0xff]  ;;  %vm323_vm0 = vcmask 130048   ;;  %vm2366_vm1 = vcmask 261120  }
   0xc   : > { %530 = vmatpush.msra.mxu0 %v321_v0  ;;  %4397 = vmatpush.msra.mxu3 %v321_v0  ;;  %p244_p3 = scmp.lt.s32.totalorder %s4071_s27, 255  ;;  %v2835_v3 = vld [vmem:[%s6813_s3 + $0x38] sm:$0xff]  ;;  %v320_v33 = vld [vmem:[%s6811_s1 + $0x8] sm:$0xff]  ;;  %v2834_v55 = vld [vmem:[%s6813_s3 + $0x30] sm:$0xff]  ;;  %vm3945_vm2 = vcmask 31744  }
   0xd   : > { %739 = vmatpush.msra.mxu1 %v322_v2 }
   0xe   : > { %531 = vmatpush.msra.mxu0 %v319_v1  ;;  %4398 = vmatpush.msra.mxu3 %v319_v1  ;;  %s7135_s27 = smov (!%p244_p3, %s4071_s27), 255 }
   0xf   : > { %s4072_s8 = sshll.u32 %s7135_s27, 3  ;;  %740 = vmatpush.msra.mxu1 %v320_v33 }
  0x10   : > { %4399 = vmatpush.msrb.mxu3 %v322_v2  ;;  %3040 = vmatpush.msrb.mxu0 %v2835_v3  ;;  %s4751_s11 = scalar_lea.vmem %s6810_s0, %s4072_s8  ;;  %v1704_v2 = vld [vmem:[%s6812_s2 + $0x8] sm:$0xff]  ;;  %s6536_s26 = scalar_lea.vmem %s6816_s6, %s4072_s8 }
  0x11   : > { %v4754_v4 = vld [vmem:[%s4751_s11] sm:$0xff]  ;;  %v4766_v7 = vld [vmem:[%s4751_s11 + $0x188] sm:$0xff]  ;;  %v4776_v11 = vld [vmem:[%s4751_s11 + $0x10] sm:$0xff]  ;;  %1911 = vmatpush.msra.mxu2 %v1704_v2 }
  0x12   : > { %v4757_v5 = vld [vmem:[%s4751_s11 + $0x180] sm:$0xff]  ;;  %4075 = vmatmul.msk.f32.vlgmr.msra.gmra.mxu0 %vm323_vm0, %v4754_v4  ;;  %v1255_v6 = vsel %vm323_vm0, %v4754_v4, -inf  ;;  %v1402_v9 = vsel %vm323_vm0, %v4766_v7, -inf  ;;  %v4773_v10 = vld [vmem:[%s4751_s11 + $0x8] sm:$0xff]  ;;  %v4779_v12 = vld [vmem:[%s4751_s11 + $0x18] sm:$0xff]  ;;  %v1261_v14 = vsel %vm323_vm0, %v4776_v11, -inf  ;;  %4400 = vmatpush.msrb.mxu3 %v320_v33 }
  0x13   : > { %4123 = vmatmul.msk.f32.vlgmr.msra.gmra.mxu3 %vm323_vm0, %v4757_v5  ;;  %v1399_v8 = vsel %vm323_vm0, %v4757_v5, -inf  ;;  %1256 = vmax.xlane.f32.xlu0 %v1255_v6  ;;  %v1258_v13 = vsel %vm323_vm0, %v4773_v10, -inf  ;;  %v1264_v15 = vsel %vm323_vm0, %v4779_v12, -inf  ;;  %v4792_v16 = vld [vmem:[%s4751_s11 + $0x20] sm:$0xff]  ;;  %v4795_v17 = vld [vmem:[%s4751_s11 + $0x190] sm:$0xff]  ;;  %v4798_v18 = vld [vmem:[%s4751_s11 + $0x198] sm:$0xff] }
  0x14   : > { %1400 = vmax.xlane.f32.xlu1 %v1399_v8  ;;  %1403 = vmax.xlane.f32.xlu2 %v1402_v9  ;;  %v1267_v19 = vsel %vm323_vm0, %v4792_v16, -inf  ;;  %v1405_v20 = vsel %vm323_vm0, %v4795_v17, -inf  ;;  %v1408_v21 = vsel %vm323_vm0, %v4798_v18, -inf  ;;  %v4811_v22 = vld [vmem:[%s4751_s11 + $0x28] sm:$0xff]  ;;  %v4814_v23 = vld [vmem:[%s4751_s11 + $0x30] sm:$0xff]  ;;  %v4817_v24 = vld [vmem:[%s4751_s11 + $0x1a0] sm:$0xff] }
  0x15   : > { %v1270_v25 = vsel %vm323_vm0, %v4811_v22, -inf  ;;  %v1411_v26 = vsel %vm323_vm0, %v4817_v24, -inf  ;;  %v1273_v27 = vsel %vm323_vm0, %v4814_v23, -inf  ;;  %v4830_v28 = vld [vmem:[%s4751_s11 + $0x38] sm:$0xff]  ;;  %v4833_v29 = vld [vmem:[%s4751_s11 + $0x1a8] sm:$0xff]  ;;  %v4840_v32 = vld [vmem:[%s4751_s11 + $0x1b0] sm:$0xff]  ;;  %4139 = vmatmul.msk.f32.vlgmr.msra.gmra.mxu1 %vm323_vm0, %v4754_v4  ;;  %3041 = vmatpush.msrb.mxu0 %v2834_v55 }
  0x16   : > { %v1276_v30 = vsel %vm323_vm0, %v4830_v28, -inf  ;;  %v1414_v31 = vsel %vm323_vm0, %v4833_v29, -inf  ;;  %v1417_v34 = vsel %vm323_vm0, %v4840_v32, -inf  ;;  %v4852_v35 = vld [vmem:[%s4751_s11 + $0x40] sm:$0xff]  ;;  %v4857_v36 = vld [vmem:[%s4751_s11 + $0x48] sm:$0xff]  ;;  %v4862_v38 = vld [vmem:[%s4751_s11 + $0x1b8] sm:$0xff]  ;;  %4401 = vmatpush.msra.mxu3 %v1704_v2 }
  0x17   : > { %v1279_v37 = vsel %vm323_vm0, %v4852_v35, -inf  ;;  %v1282_v39 = vsel %vm323_vm0, %v4857_v36, -inf  ;;  %v1420_v40 = vsel %vm323_vm0, %v4862_v38, -inf  ;;  %v4875_v41 = vld [vmem:[%s4751_s11 + $0x50] sm:$0xff]  ;;  %v4878_v42 = vld [vmem:[%s4751_s11 + $0x1c0] sm:$0xff]  ;;  %v4891_v45 = vld [vmem:[%s4751_s11 + $0x58] sm:$0xff] }
  0x18   : > { %v1285_v43 = vsel %vm323_vm0, %v4875_v41, -inf  ;;  %v1423_v44 = vsel %vm323_vm0, %v4878_v42, -inf  ;;  %v4894_v46 = vld [vmem:[%s4751_s11 + $0x1c8] sm:$0xff]  ;;  %v1288_v48 = vsel %vm323_vm0, %v4891_v45, -inf  ;;  %v4907_v49 = vld [vmem:[%s4751_s11 + $0x60] sm:$0xff]  ;;  %v4910_v50 = vld [vmem:[%s4751_s11 + $0x1d0] sm:$0xff] }
  0x19   : > { %v1426_v47 = vsel %vm323_vm0, %v4894_v46, -inf  ;;  %v1291_v51 = vsel %vm323_vm0, %v4907_v49, -inf  ;;  %v1429_v52 = vsel %vm323_vm0, %v4910_v50, -inf  ;;  %v4923_v53 = vld [vmem:[%s4751_s11 + $0x68] sm:$0xff]  ;;  %v4926_v54 = vld [vmem:[%s4751_s11 + $0x1d8] sm:$0xff]  ;;  %v4942_v58 = vld [vmem:[%s4751_s11 + $0x70] sm:$0xff] }
  0x1a   : > { %4076 = vmatmul.msk.f32.gmra.mxu0 %vm323_vm0, %v4773_v10  ;;  %v1294_v56 = vsel %vm323_vm0, %v4923_v53, -inf  ;;  %v1432_v57 = vsel %vm323_vm0, %v4926_v54, -inf  ;;  %v4945_v59 = vld [vmem:[%s4751_s11 + $0x1e0] sm:$0xff]  ;;  %v1297_v61 = vsel %vm323_vm0, %v4942_v58, -inf  ;;  %v4958_v62 = vld [vmem:[%s4751_s11 + $0x1e8] sm:$0xff]  ;;  %v4961_v63 = vld [vmem:[%s4751_s11 + $0x78] sm:$0xff] }
  0x1b   : > { %4124 = vmatmul.msk.f32.gmra.mxu3 %vm323_vm0, %v4766_v7  ;;  %1259 = vmax.xlane.f32.xlu0 %v1258_v13  ;;  %v1435_v60 = vsel %vm323_vm0, %v4945_v59, -inf  ;;  %v1300_v0 = vsel %vm323_vm0, %v4961_v63, -inf  ;;  %v1438_v1 = vsel %vm323_vm0, %v4958_v62, -inf  ;;  %v4977_v3 = vld [vmem:[%s4751_s11 + $0x1f0] sm:$0xff]  ;;  %v4980_v6 = vld [vmem:[%s4751_s11 + $0x80] sm:$0xff]  ;;  %v5030_v33 = vld [vmem:[%s4751_s11 + $0x98] sm:$0xff] }
  0x1c   : > { %1262 = vmax.xlane.f32.xlu1 %v1261_v14  ;;  %1265 = vmax.xlane.f32.xlu2 %v1264_v15  ;;  %v1703_v8 = vld [vmem:[%s6812_s2] sm:$0xff]  ;;  %v1303_v9 = vsel %vm323_vm0, %v4980_v6, -inf  ;;  %v1441_v13 = vsel %vm323_vm0, %v4977_v3, -inf  ;;  %v4996_v14 = vld [vmem:[%s4751_s11 + $0x88] sm:$0xff] }
  0x1d   : > { %4140 = vmatmul.msk.f32.gmra.mxu1 %vm323_vm0, %v4773_v10  ;;  %1912 = vmatpush.msra.mxu2 %v1703_v8  ;;  %v1306_v15 = vsel %vm323_vm0, %v4996_v14, -inf }
  0x1e   : > { %4402 = vmatpush.msra.mxu3 %v1703_v8  ;;  %v5076_v8 = vld [vmem:[%s4751_s11 + $0xa8] sm:$0xff] }
  0x22   : > { %4077 = vmatmul.msk.f32.gmra.mxu0 %vm323_vm0, %v4776_v11 }
  0x23   : > { %4125 = vmatmul.msk.f32.gmra.mxu3 %vm323_vm0, %v4795_v17  ;;  %1406 = vmax.xlane.f32.xlu0 %v1405_v20  ;;  %v5008_v20 = vld [vmem:[%s4751_s11 + $0x90] sm:$0xff] }
  0x24   : > { %1268 = vmax.xlane.f32.xlu1 %v1267_v19  ;;  %1409 = vmax.xlane.f32.xlu2 %v1408_v21  ;;  %v3446_v19 = vld [vmem:[%s6814_s4 + $0x78] sm:$0xff] }
  0x25   : > { %4141 = vmatmul.msk.f32.gmra.mxu1 %vm323_vm0, %v4776_v11  ;;  %v5013_v21 = vld [vmem:[%s4751_s11 + $0x1f8] sm:$0xff] }
  0x26   : > { %3447 = vmatpush.msrb.mxu1 %v3446_v19 }
  0x2a   : > { %4078 = vmatmul.msk.f32.gmra.mxu0 %vm323_vm0, %v4779_v12 }
  0x2b   : > { %4126 = vmatmul.msk.f32.gmra.mxu3 %vm323_vm0, %v4798_v18  ;;  %1271 = vmax.xlane.f32.xlu0 %v1270_v25  ;;  %v1444_v25 = vsel %vm323_vm0, %v5013_v21, -inf }
  0x2c   : > { %1412 = vmax.xlane.f32.xlu1 %v1411_v26  ;;  %1274 = vmax.xlane.f32.xlu2 %v1273_v27  ;;  %v1309_v26 = vsel %vm323_vm0, %v5008_v20, -inf }
  0x2d   : > { %4142 = vmatmul.msk.f32.gmra.mxu1 %vm323_vm0, %v4779_v12 }
  0x32   : > { %4079 = vmatmul.msk.f32.gmra.mxu0 %vm323_vm0, %v4792_v16 }
  0x33   : > { %4127 = vmatmul.msk.f32.gmra.mxu3 %vm323_vm0, %v4817_v24  ;;  %1415 = vmax.xlane.f32.xlu0 %v1414_v31 }
  0x34   : > { %1277 = vmax.xlane.f32.xlu1 %v1276_v30  ;;  %1418 = vmax.xlane.f32.xlu2 %v1417_v34 }
  0x35   : > { %4143 = vmatmul.msk.f32.gmra.mxu1 %vm323_vm0, %v4792_v16 }
  0x3a   : > { %4080 = vmatmul.msk.f32.gmra.mxu0 %vm323_vm0, %v4811_v22 }
  0x3b   : > { %4128 = vmatmul.msk.f32.gmra.mxu3 %vm323_vm0, %v4833_v29  ;;  %1280 = vmax.xlane.f32.xlu0 %v1279_v37 }
  0x3c   : > { %1421 = vmax.xlane.f32.xlu1 %v1420_v40  ;;  %1283 = vmax.xlane.f32.xlu2 %v1282_v39  ;;  %v1312_v39 = vsel %vm323_vm0, %v5030_v33, -inf }
  0x3d   : > { %4144 = vmatmul.msk.f32.gmra.mxu1 %vm323_vm0, %v4811_v22 }
  0x42   : > { %4081 = vmatmul.msk.f32.gmra.mxu0 %vm323_vm0, %v4814_v23 }
  0x43   : > { %4129 = vmatmul.msk.f32.gmra.mxu3 %vm323_vm0, %v4840_v32  ;;  %1424 = vmax.xlane.f32.xlu0 %v1423_v44 }
  0x44   : > { %1286 = vmax.xlane.f32.xlu1 %v1285_v43  ;;  %1427 = vmax.xlane.f32.xlu2 %v1426_v47 }
  0x45   : > { %4145 = vmatmul.msk.f32.gmra.mxu1 %vm323_vm0, %v4814_v23 }
  0x4a   : > { %4082 = vmatmul.msk.f32.gmra.mxu0 %vm323_vm0, %v4830_v28 }
  0x4b   : > { %4130 = vmatmul.msk.f32.gmra.mxu3 %vm323_vm0, %v4862_v38  ;;  %1289 = vmax.xlane.f32.xlu0 %v1288_v48 }
  0x4c   : > { %1292 = vmax.xlane.f32.xlu2 %v1291_v51  ;;  %1430 = vmax.xlane.f32.xlu1 %v1429_v52  ;;  %v5053_v51 = vld [vmem:[%s4751_s11 + $0xa0] sm:$0xff] }
  0x4d   : > { %4146 = vmatmul.msk.f32.gmra.mxu1 %vm323_vm0, %v4830_v28 }
  0x52   : > { %4083 = vmatmul.msk.f32.gmra.mxu0 %vm323_vm0, %v4852_v35 }
  0x53   : > { %4131 = vmatmul.msk.f32.gmra.mxu3 %vm323_vm0, %v4878_v42  ;;  %1433 = vmax.xlane.f32.xlu0 %v1432_v57 }
  0x54   : > { %1295 = vmax.xlane.f32.xlu1 %v1294_v56  ;;  %1436 = vmax.xlane.f32.xlu2 %v1435_v60 }
  0x55   : > { %4147 = vmatmul.msk.f32.gmra.mxu1 %vm323_vm0, %v4852_v35 }
  0x5a   : > { %4084 = vmatmul.msk.f32.gmra.mxu0 %vm323_vm0, %v4857_v36 }
  0x5b   : > { %4132 = vmatmul.msk.f32.gmra.mxu3 %vm323_vm0, %v4894_v46  ;;  %1298 = vmax.xlane.f32.xlu0 %v1297_v61  ;;  %v3445_v61 = vld [vmem:[%s6814_s4 + $0x70] sm:$0xff] }
  0x5c   : > { %1301 = vmax.xlane.f32.xlu2 %v1300_v0  ;;  %1439 = vmax.xlane.f32.xlu1 %v1438_v1 }
  0x5d   : > { %4148 = vmatmul.msk.f32.gmra.mxu1 %vm323_vm0, %v4857_v36 }
  0x5e   : > { %3448 = vmatpush.msrb.mxu1 %v3445_v61  ;;  %v5120_v61 = vld [vmem:[%s4751_s11 + $0xb8] sm:$0xff] }
  0x62   : > { %4085 = vmatmul.msk.f32.gmra.mxu0 %vm323_vm0, %v4875_v41 }
  0x63   : > { %4133 = vmatmul.msk.f32.gmra.mxu3 %vm323_vm0, %v4910_v50  ;;  %1442 = vmax.xlane.f32.xlu0 %v1441_v13  ;;  %v1318_v13 = vsel %vm323_vm0, %v5076_v8, -inf }
  0x64   : > { %1304 = vmax.xlane.f32.xlu1 %v1303_v9  ;;  %1445 = vmax.xlane.f32.xlu2 %v1444_v25 }
  0x65   : > { %4149 = vmatmul.msk.f32.gmra.mxu1 %vm323_vm0, %v4875_v41 }
  0x6a   : > { %4086 = vmatmul.msk.f32.gmra.mxu0 %vm323_vm0, %v4891_v45 }
  0x6b   : > { %4134 = vmatmul.msk.f32.gmra.mxu3 %vm323_vm0, %v4926_v54  ;;  %1307 = vmax.xlane.f32.xlu0 %v1306_v15 }
  0x6c   : > { %1310 = vmax.xlane.f32.xlu1 %v1309_v26  ;;  %1313 = vmax.xlane.f32.xlu2 %v1312_v39  ;;  %v5098_v39 = vld [vmem:[%s4751_s11 + $0xb0] sm:$0xff] }
  0x6d   : > { %4150 = vmatmul.msk.f32.gmra.mxu1 %vm323_vm0, %v4891_v45 }
  0x72   : > { %4087 = vmatmul.msk.f32.gmra.mxu0 %vm323_vm0, %v4907_v49 }
  0x73   : > { %4135 = vmatmul.msk.f32.gmra.mxu3 %vm323_vm0, %v4945_v59 }
  0x74   : > { %1319 = vmax.xlane.f32.xlu1 %v1318_v13  ;;  %v1324_v13 = vsel %vm323_vm0, %v5120_v61, -inf }
  0x75   : > { %4151 = vmatmul.msk.f32.gmra.mxu1 %vm323_vm0, %v4907_v49 }
  0x7a   : > { %4088 = vmatmul.msk.f32.gmra.mxu0 %vm323_vm0, %v4923_v53 }
  0x7b   : > { %4136 = vmatmul.msk.f32.gmra.mxu3 %vm323_vm0, %v4958_v62 }
  0x7d   : > { %4152 = vmatmul.msk.f32.gmra.mxu1 %vm323_vm0, %v4923_v53 }
  0x82   : > { %4089 = vmatmul.msk.f32.gmra.mxu0 %vm323_vm0, %v4942_v58 }
  0x83   : > { %4137 = vmatmul.msk.f32.gmra.mxu3 %vm323_vm0, %v4977_v3 }
  0x85   : > { %4153 = vmatmul.msk.f32.gmra.mxu1 %vm323_vm0, %v4942_v58 }
  0x86   : > { %v5023_v27 = vpop.xlane.xlu0 %1256 }
  0x87   : > { %v5025_v30 = vpop.xlane.xlu1 %1400  ;;  %v1447_v31 = vsub.f32 %v4754_v4, %v5023_v27  ;;  %v5038_v37 = vpop.xlane.xlu2 %1403 }
  0x88   : > { %6858 = vst [vmem:[#allocation2_spill] sm:$0xff] %v5025_v30 }
  0x89   : > { %v1511_v34 = vmul.f32 5.0, %v1447_v31  ;;  %6859 = vst [vmem:[#allocation3_spill] sm:$0xff] %v5038_v37 }
  0x8a   : > { %4090 = vmatmul.msk.f32.gmra.mxu0 %vm323_vm0, %v4961_v63 }
  0x8b   : > { %4138 = vmatmul.msk.f32.gmra.mxu3 %vm323_vm0, %v5013_v21  ;;  %v1575_v40 = vmul.f32 1.442695, %v1511_v34 }
  0x8d   : > { %4412 = vpow2.f32 %v1575_v40  ;;  %4154 = vmatmul.msk.f32.gmra.mxu1 %vm323_vm0, %v4961_v63 }
  0x8e   : > { %v5042_v4 = vpop.xlane.xlu0 %1259 }
  0x8f   : > { %v5044_v43 = vpop.xlane.xlu1 %1262  ;;  %v1448_v44 = vsub.f32 %v4773_v10, %v5042_v4  ;;  %v5048_v47 = vpop.f32.mrf.mxu0  ;;  %v1315_v10 = vsel %vm323_vm0, %v5053_v51, -inf }
  0x90   : > { %6860 = vst [vmem:[#allocation4_spill] sm:$0xff] %v5048_v47  ;;  %v1449_v48 = vsub.f32 %v4776_v11, %v5044_v43  ;;  %1316 = vmax.xlane.f32.xlu0 %v1315_v10  ;;  %v5064_v11 = vpop.xlane.xlu2 %1265  ;;  %v5239_v47 = vld [vmem:[%s4751_s11 + $0xe0] sm:$0xff] }
  0x91   : > { %v1512_v52 = vmul.f32 5.0, %v1448_v44  ;;  %v1450_v2 = vsub.f32 %v4779_v12, %v5064_v11 }
  0x92   : > { %4091 = vmatmul.msk.f32.gmra.mxu0 %vm323_vm0, %v4980_v6  ;;  %v1513_v57 = vmul.f32 5.0, %v1449_v48  ;;  %v1321_v48 = vsel %vm323_vm0, %v5098_v39, -inf }
  0x93   : > { %4187 = vmatmul.msk.f32.vlgmr.msrb.gmra.mxu3 %vm323_vm0, %v4757_v5  ;;  %v4413_v55 = vpop.eup %4412  ;;  %v1577_v56 = vmul.f32 1.442695, %v1512_v52  ;;  %v1514_v12 = vmul.f32 5.0, %v1450_v2  ;;  %1322 = vmax.xlane.f32.xlu2 %v1321_v48 }
  0x94   : > { %4203 = vmatmul.msk.f32.vlgmr.msra.gmra.mxu2 %vm323_vm0, %v4413_v55  ;;  %v1579_v0 = vmul.f32 1.442695, %v1513_v57 }
  0x95   : > { %4414 = vpow2.f32 %v1577_v56  ;;  %v1581_v26 = vmul.f32 1.442695, %v1514_v12  ;;  %4155 = vmatmul.msk.f32.gmra.mxu1 %vm323_vm0, %v4980_v6 }
  0x96   : > { %v5066_v60 = vpop.f32.mrf.mxu3  ;;  %v5084_v9 = vpop.xlane.xlu0 %1406  ;;  %4416 = vpow2.f32 %v1579_v0 }
  0x97   : > { %6861 = vst [vmem:[#allocation5_spill] sm:$0xff] %v5066_v60  ;;  %v5071_v1 = vpop.f32.mrf.mxu0  ;;  %v5089_v19 = vpop.xlane.xlu1 %1268  ;;  %4418 = vpow2.f32 %v1581_v26  ;;  %v3444_v26 = vld [vmem:[%s6814_s4 + $0x68] sm:$0xff] }
  0x98   : > { %6862 = vst [vmem:[#allocation6_spill] sm:$0xff] %v5071_v1  ;;  %v1451_v34 = vsub.f32 %v4792_v16, %v5089_v19  ;;  %v5106_v44 = vpop.xlane.xlu2 %1409  ;;  %1325 = vmax.xlane.f32.xlu0 %v1324_v13  ;;  %3449 = vmatpush.msrb.mxu1 %v3444_v26 }
  0x99   : > { %6863 = vst [vmem:[#allocation7_spill] sm:$0xff] %v5084_v9 }
  0x9a   : > { %4092 = vmatmul.msk.f32.gmra.mxu0 %vm323_vm0, %v4996_v14  ;;  %6866 = vst [vmem:[#allocation10_spill] sm:$0xff] %v5106_v44  ;;  %v1515_v16 = vmul.f32 5.0, %v1451_v34 }
  0x9b   : > { %4188 = vmatmul.msk.f32.gmra.mxu3 %vm323_vm0, %v4766_v7  ;;  %v4415_v15 = vpop.eup %4414 }
  0x9c   : > { %4204 = vmatmul.msk.f32.gmra.mxu2 %vm323_vm0, %v4415_v15  ;;  %v4417_v40 = vpop.eup %4416  ;;  %v1583_v55 = vmul.f32 1.442695, %v1515_v16  ;;  %v5145_v16 = vld [vmem:[%s4751_s11 + $0xc0] sm:$0xff] }
  0x9d   : > { %v4419_v0 = vpop.eup %4418  ;;  %4156 = vmatmul.msk.f32.gmra.mxu1 %vm323_vm0, %v4996_v14 }
  0x9e   : > { %v5091_v25 = vpop.f32.mrf.mxu3  ;;  %v5111_v52 = vpop.xlane.xlu0 %1271  ;;  %4420 = vpow2.f32 %v1583_v55 }
  0x9f   : > { %6864 = vst [vmem:[#allocation8_spill] sm:$0xff] %v5091_v25  ;;  %v5093_v31 = vpop.f32.mrf.mxu0  ;;  %v1452_v57 = vsub.f32 %v4811_v22, %v5111_v52  ;;  %v5128_v2 = vpop.xlane.xlu1 %1412  ;;  %v5167_v25 = vld [vmem:[%s4751_s11 + $0xc8] sm:$0xff] }
  0xa0   : > { %6865 = vst [vmem:[#allocation9_spill] sm:$0xff] %v5093_v31  ;;  %v5133_v15 = vpop.xlane.xlu2 %1274 }
  0xa1   : > { %6869 = vst [vmem:[#allocation13_spill] sm:$0xff] %v5128_v2  ;;  %v1516_v22 = vmul.f32 5.0, %v1452_v57  ;;  %v1453_v48 = vsub.f32 %v4814_v23, %v5133_v15 }
  0xa2   : > { %4093 = vmatmul.msk.f32.gmra.mxu0 %vm323_vm0, %v5008_v20 }
  0xa3   : > { %4189 = vmatmul.msk.f32.gmra.mxu3 %vm323_vm0, %v4795_v17  ;;  %v1585_v34 = vmul.f32 1.442695, %v1516_v22  ;;  %v1517_v23 = vmul.f32 5.0, %v1453_v48 }
  0xa4   : > { %4205 = vmatmul.msk.f32.gmra.mxu2 %vm323_vm0, %v4417_v40  ;;  %v4421_v55 = vpop.eup %4420 }
  0xa5   : > { %4422 = vpow2.f32 %v1585_v34  ;;  %v1587_v26 = vmul.f32 1.442695, %v1517_v23  ;;  %4157 = vmatmul.msk.f32.gmra.mxu1 %vm323_vm0, %v5008_v20 }
  0xa6   : > { %v5113_v10 = vpop.f32.mrf.mxu3  ;;  %v5153_v57 = vpop.xlane.xlu0 %1415 }
  0xa7   : > { %6867 = vst [vmem:[#allocation11_spill] sm:$0xff] %v5113_v10  ;;  %v5115_v56 = vpop.f32.mrf.mxu0  ;;  %v5158_v13 = vpop.xlane.xlu1 %1277  ;;  %4424 = vpow2.f32 %v1587_v26 }
  0xa8   : > { %6868 = vst [vmem:[#allocation12_spill] sm:$0xff] %v5115_v56  ;;  %v1454_v10 = vsub.f32 %v4830_v28, %v5158_v13  ;;  %v5175_v48 = vpop.xlane.xlu2 %1418  ;;  %v1330_v28 = vsel %vm323_vm0, %v5167_v25, -inf  ;;  %v5192_v56 = vld [vmem:[%s4751_s11 + $0xd0] sm:$0xff] }
  0xa9   : > { %6872 = vst [vmem:[#allocation16_spill] sm:$0xff] %v5153_v57  ;;  %1331 = vmax.xlane.f32.xlu2 %v1330_v28 }
  0xaa   : > { %4094 = vmatmul.msk.f32.gmra.mxu0 %vm323_vm0, %v5030_v33  ;;  %6875 = vst [vmem:[#allocation19_spill] sm:$0xff] %v5175_v48 }
  0xab   : > { %4190 = vmatmul.msk.f32.gmra.mxu3 %vm323_vm0, %v4798_v18  ;;  %v4423_v34 = vpop.eup %4422 }
  0xac   : > { %4206 = vmatmul.msk.f32.gmra.mxu2 %vm323_vm0, %v4419_v0  ;;  %v1327_v0 = vsel %vm323_vm0, %v5145_v16, -inf }
  0xad   : > { %1328 = vmax.xlane.f32.xlu1 %v1327_v0  ;;  %v1518_v0 = vmul.f32 5.0, %v1454_v10  ;;  %v4425_v10 = vpop.eup %4424  ;;  %4158 = vmatmul.msk.f32.gmra.mxu1 %vm323_vm0, %v5030_v33 }
  0xae   : > { %v5135_v12 = vpop.f32.mrf.mxu3  ;;  %v5183_v23 = vpop.xlane.xlu0 %1280 }
  0xaf   : > { %6870 = vst [vmem:[#allocation14_spill] sm:$0xff] %v5135_v12  ;;  %v5140_v40 = vpop.f32.mrf.mxu0  ;;  %v1589_v60 = vmul.f32 1.442695, %v1518_v0  ;;  %v5200_v26 = vpop.xlane.xlu1 %1421  ;;  %v3443_v0 = vld [vmem:[%s6814_s4 + $0x60] sm:$0xff] }
  0xb0   : > { %6871 = vst [vmem:[#allocation15_spill] sm:$0xff] %v5140_v40  ;;  %v1455_v40 = vsub.f32 %v4852_v35, %v5183_v23  ;;  %3450 = vmatpush.msrb.mxu1 %v3443_v0 }
  0xb1   : > { %6878 = vst [vmem:[#allocation22_spill] sm:$0xff] %v5200_v26  ;;  %4426 = vpow2.f32 %v1589_v60  ;;  %v5217_v60 = vld [vmem:[%s4751_s11 + $0xd8] sm:$0xff] }
  0xb2   : > { %4095 = vmatmul.msk.f32.gmra.mxu0 %vm323_vm0, %v5053_v51  ;;  %v1519_v35 = vmul.f32 5.0, %v1455_v40 }
  0xb3   : > { %4191 = vmatmul.msk.f32.gmra.mxu3 %vm323_vm0, %v4817_v24 }
  0xb4   : > { %4207 = vmatmul.msk.f32.gmra.mxu2 %vm323_vm0, %v4421_v55  ;;  %v2833_v55 = vld [vmem:[%s6813_s3 + $0x28] sm:$0xff] }
  0xb5   : > { %3042 = vmatpush.msrb.mxu0 %v2833_v55  ;;  %v5205_v55 = vpop.xlane.xlu2 %1283  ;;  %4159 = vmatmul.msk.f32.gmra.mxu1 %vm323_vm0, %v5053_v51 }
  0xb6   : > { %v5160_v22 = vpop.f32.mrf.mxu3  ;;  %6879 = vst [vmem:[#allocation23_spill] sm:$0xff] %v5205_v55  ;;  %v1456_v31 = vsub.f32 %v4857_v36, %v5205_v55 }
  0xb7   : > { %6873 = vst [vmem:[#allocation17_spill] sm:$0xff] %v5160_v22  ;;  %v5162_v12 = vpop.f32.mrf.mxu0  ;;  %v4427_v40 = vpop.eup %4426 }
  0xb8   : > { %6874 = vst [vmem:[#allocation18_spill] sm:$0xff] %v5162_v12  ;;  %v1520_v36 = vmul.f32 5.0, %v1456_v31 }
  0xba   : > { %4096 = vmatmul.msk.f32.gmra.mxu0 %vm323_vm0, %v5076_v8 }
  0xbb   : > { %4192 = vmatmul.msk.f32.gmra.mxu3 %vm323_vm0, %v4833_v29 }
  0xbc   : > { %4208 = vmatmul.msk.f32.gmra.mxu2 %vm323_vm0, %v4423_v34  ;;  %v1333_v34 = vsel %vm323_vm0, %v5192_v56, -inf }
  0xbd   : > { %1334 = vmax.xlane.f32.xlu0 %v1333_v34  ;;  %v1336_v34 = vsel %vm323_vm0, %v5217_v60, -inf  ;;  %4160 = vmatmul.msk.f32.gmra.mxu1 %vm323_vm0, %v5076_v8 }
  0xbe   : > { %v5185_v22 = vpop.f32.mrf.mxu3  ;;  %1337 = vmax.xlane.f32.xlu1 %v1336_v34 }
  0xbf   : > { %6876 = vst [vmem:[#allocation20_spill] sm:$0xff] %v5185_v22  ;;  %v5187_v12 = vpop.f32.mrf.mxu0  ;;  %v1591_v22 = vmul.f32 1.442695, %v1519_v35  ;;  %v5230_v35 = vpop.xlane.xlu1 %1286 }
  0xc0   : > { %6877 = vst [vmem:[#allocation21_spill] sm:$0xff] %v5187_v12  ;;  %v1457_v1 = vsub.f32 %v4875_v41, %v5230_v35 }
  0xc1   : > { %4428 = vpow2.f32 %v1591_v22  ;;  %6883 = vst [vmem:[#allocation27_spill] sm:$0xff] %v5230_v35  ;;  %v5247_v22 = vpop.xlane.xlu2 %1427  ;;  %v5261_v35 = vld [vmem:[%s4751_s11 + $0xe8] sm:$0xff] }
  0xc2   : > { %4097 = vmatmul.msk.f32.gmra.mxu0 %vm323_vm0, %v5098_v39  ;;  %6886 = vst [vmem:[#allocation30_spill] sm:$0xff] %v5247_v22  ;;  %v1521_v41 = vmul.f32 5.0, %v1457_v1 }
  0xc3   : > { %4193 = vmatmul.msk.f32.gmra.mxu3 %vm323_vm0, %v4840_v32 }
  0xc4   : > { %4209 = vmatmul.msk.f32.gmra.mxu2 %vm323_vm0, %v4425_v10  ;;  %v5225_v10 = vpop.xlane.xlu0 %1424 }
  0xc5   : > { %6882 = vst [vmem:[#allocation26_spill] sm:$0xff] %v5225_v10  ;;  %4161 = vmatmul.msk.f32.gmra.mxu1 %vm323_vm0, %v5098_v39 }
  0xc6   : > { %v5207_v28 = vpop.f32.mrf.mxu3 }
  0xc7   : > { %6880 = vst [vmem:[#allocation24_spill] sm:$0xff] %v5207_v28  ;;  %v5212_v12 = vpop.f32.mrf.mxu0  ;;  %v1593_v28 = vmul.f32 1.442695, %v1520_v36  ;;  %v4429_v31 = vpop.eup %4428 }
  0xc8   : > { %6881 = vst [vmem:[#allocation25_spill] sm:$0xff] %v5212_v12  ;;  %v5269_v1 = vpop.xlane.xlu1 %1430 }
  0xc9   : > { %4430 = vpow2.f32 %v1593_v28  ;;  %6890 = vst [vmem:[#allocation34_spill] sm:$0xff] %v5269_v1 }
  0xca   : > { %4098 = vmatmul.msk.f32.gmra.mxu0 %vm323_vm0, %v5120_v61 }
  0xcb   : > { %4194 = vmatmul.msk.f32.gmra.mxu3 %vm323_vm0, %v4862_v38 }
  0xcc   : > { %4210 = vmatmul.msk.f32.gmra.mxu2 %vm323_vm0, %v4427_v40  ;;  %v1339_v40 = vsel %vm323_vm0, %v5239_v47, -inf  ;;  %v5252_v34 = vpop.xlane.xlu0 %1289 }
  0xcd   : > { %1340 = vmax.xlane.f32.xlu2 %v1339_v40  ;;  %6887 = vst [vmem:[#allocation31_spill] sm:$0xff] %v5252_v34  ;;  %v5274_v40 = vpop.xlane.xlu2 %1292  ;;  %4162 = vmatmul.msk.f32.gmra.mxu1 %vm323_vm0, %v5120_v61 }
  0xce   : > { %v5232_v0 = vpop.f32.mrf.mxu3  ;;  %6891 = vst [vmem:[#allocation35_spill] sm:$0xff] %v5274_v40 }
  0xcf   : > { %6884 = vst [vmem:[#allocation28_spill] sm:$0xff] %v5232_v0  ;;  %v5234_v12 = vpop.f32.mrf.mxu0  ;;  %v1595_v0 = vmul.f32 1.442695, %v1521_v41  ;;  %v4431_v28 = vpop.eup %4430 }
  0xd0   : > { %6885 = vst [vmem:[#allocation29_spill] sm:$0xff] %v5234_v12 }
  0xd1   : > { %4432 = vpow2.f32 %v1595_v0  ;;  %v5286_v0 = vld [vmem:[%s4751_s11 + $0xf0] sm:$0xff] }
  0xd2   : > { %4099 = vmatmul.msk.f32.gmra.mxu0 %vm323_vm0, %v5145_v16 }
  0xd3   : > { %4195 = vmatmul.msk.f32.gmra.mxu3 %vm323_vm0, %v4878_v42  ;;  %v1458_v42 = vsub.f32 %v4891_v45, %v5252_v34  ;;  %v1459_v34 = vsub.f32 %v4907_v49, %v5274_v40  ;;  %v5308_v40 = vld [vmem:[%s4751_s11 + $0xf8] sm:$0xff] }
  0xd4   : > { %4211 = vmatmul.msk.f32.gmra.mxu2 %vm323_vm0, %v4429_v31  ;;  %v1342_v31 = vsel %vm323_vm0, %v5261_v35, -inf }
  0xd5   : > { %v1522_v45 = vmul.f32 5.0, %v1458_v42  ;;  %1343 = vmax.xlane.f32.xlu0 %v1342_v31  ;;  %v1523_v49 = vmul.f32 5.0, %v1459_v34  ;;  %v5299_v31 = vpop.xlane.xlu1 %1295 }
  0xd6   : > { %v5254_v36 = vpop.f32.mrf.mxu3  ;;  %6895 = vst [vmem:[#allocation39_spill] sm:$0xff] %v5299_v31 }
  0xd7   : > { %6888 = vst [vmem:[#allocation32_spill] sm:$0xff] %v5254_v36  ;;  %v5256_v12 = vpop.f32.mrf.mxu0  ;;  %v3442_v36 = vld [vmem:[%s6814_s4 + $0x58] sm:$0xff]  ;;  %v4433_v42 = vpop.eup %4432 }
  0xd8   : > { %6889 = vst [vmem:[#allocation33_spill] sm:$0xff] %v5256_v12  ;;  %3451 = vmatpush.msrb.mxu1 %v3442_v36  ;;  %v5294_v36 = vpop.xlane.xlu0 %1433 }
  0xd9   : > { %6894 = vst [vmem:[#allocation38_spill] sm:$0xff] %v5294_v36 }
  0xda   : > { %4100 = vmatmul.msk.f32.gmra.mxu0 %vm323_vm0, %v5167_v25 }
  0xdb   : > { %4196 = vmatmul.msk.f32.gmra.mxu3 %vm323_vm0, %v4894_v46  ;;  %v1597_v46 = vmul.f32 1.442695, %v1522_v45 }
  0xdc   : > { %4212 = vmatmul.msk.f32.gmra.mxu2 %vm323_vm0, %v4431_v28  ;;  %v1345_v28 = vsel %vm323_vm0, %v5286_v0, -inf }
  0xdd   : > { %4434 = vpow2.f32 %v1597_v46  ;;  %1346 = vmax.xlane.f32.xlu1 %v1345_v28  ;;  %v5316_v46 = vpop.xlane.xlu2 %1436 }
  0xde   : > { %v5276_v41 = vpop.f32.mrf.mxu3  ;;  %6898 = vst [vmem:[#allocation42_spill] sm:$0xff] %v5316_v46 }
  0xdf   : > { %6892 = vst [vmem:[#allocation36_spill] sm:$0xff] %v5276_v41  ;;  %v5281_v12 = vpop.f32.mrf.mxu0  ;;  %v1599_v41 = vmul.f32 1.442695, %v1523_v49 }
  0xe0   : > { %6893 = vst [vmem:[#allocation37_spill] sm:$0xff] %v5281_v12  ;;  %v5321_v28 = vpop.xlane.xlu0 %1298 }
  0xe1   : > { %4436 = vpow2.f32 %v1599_v41  ;;  %6899 = vst [vmem:[#allocation43_spill] sm:$0xff] %v5321_v28 }
  0xe2   : > { %4101 = vmatmul.msk.f32.gmra.mxu0 %vm323_vm0, %v5192_v56 }
  0xe3   : > { %4197 = vmatmul.msk.f32.gmra.mxu3 %vm323_vm0, %v4910_v50  ;;  %v1460_v50 = vsub.f32 %v4923_v53, %v5299_v31  ;;  %v4435_v34 = vpop.eup %4434  ;;  %v5330_v31 = vld [vmem:[%s4751_s11 + $0x100] sm:$0xff] }
  0xe4   : > { %4213 = vmatmul.msk.f32.gmra.mxu2 %vm323_vm0, %v4433_v42  ;;  %v1348_v42 = vsel %vm323_vm0, %v5308_v40, -inf }
  0xe5   : > { %v1524_v53 = vmul.f32 5.0, %v1460_v50  ;;  %1349 = vmax.xlane.f32.xlu2 %v1348_v42  ;;  %v5338_v50 = vpop.xlane.xlu1 %1439 }
  0xe6   : > { %v5301_v45 = vpop.f32.mrf.mxu3  ;;  %6902 = vst [vmem:[#allocation46_spill] sm:$0xff] %v5338_v50 }
  0xe7   : > { %6896 = vst [vmem:[#allocation40_spill] sm:$0xff] %v5301_v45  ;;  %v5303_v12 = vpop.f32.mrf.mxu0  ;;  %v1601_v45 = vmul.f32 1.442695, %v1524_v53  ;;  %v4437_v41 = vpop.eup %4436 }
  0xe8   : > { %6897 = vst [vmem:[#allocation41_spill] sm:$0xff] %v5303_v12  ;;  %v5346_v53 = vpop.xlane.xlu2 %1301 }
  0xe9   : > { %4438 = vpow2.f32 %v1601_v45  ;;  %6903 = vst [vmem:[#allocation47_spill] sm:$0xff] %v5346_v53  ;;  %v1462_v55 = vsub.f32 %v4961_v63, %v5346_v53 }
  0xea   : > { %4102 = vmatmul.msk.f32.gmra.mxu0 %vm323_vm0, %v5217_v60 }
  0xeb   : > { %4198 = vmatmul.msk.f32.gmra.mxu3 %vm323_vm0, %v4926_v54  ;;  %v1461_v54 = vsub.f32 %v4942_v58, %v5321_v28  ;;  %v1351_v58 = vsel %vm323_vm0, %v5330_v31, -inf  ;;  %v1526_v63 = vmul.f32 5.0, %v1462_v55 }
  0xec   : > { %4214 = vmatmul.msk.f32.gmra.mxu2 %vm323_vm0, %v4435_v34  ;;  %v2365_v34 = vld [vmem:[%s6813_s3 + $0x18] sm:$0xff]  ;;  %1352 = vmax.xlane.f32.xlu0 %v1351_v58 }
  0xed   : > { %v1525_v42 = vmul.f32 5.0, %v1461_v54  ;;  %2571 = vmatpush.msrb.mxu3 %v2365_v34  ;;  %v5359_v54 = vld [vmem:[%s4751_s11 + $0x108] sm:$0xff]  ;;  %v5370_v58 = vpop.xlane.xlu1 %1304  ;;  %v1605_v53 = vmul.f32 1.442695, %v1526_v63 }
  0xee   : > { %v5323_v49 = vpop.f32.mrf.mxu3  ;;  %v1354_v34 = vsel %vm323_vm0, %v5359_v54, -inf  ;;  %6907 = vst [vmem:[#allocation51_spill] sm:$0xff] %v5370_v58  ;;  %v1463_v55 = vsub.f32 %v4980_v6, %v5370_v58 }
  0xef   : > { %6900 = vst [vmem:[#allocation44_spill] sm:$0xff] %v5323_v49  ;;  %v5325_v12 = vpop.f32.mrf.mxu0  ;;  %v5348_v49 = vpop.f32.mrf.mxu1  ;;  %4163 = vmatmul.msk.f32.gmra.mxu1 %vm323_vm0, %v5145_v16  ;;  %1355 = vmax.xlane.f32.xlu1 %v1354_v34  ;;  %v5388_v34 = vld [vmem:[%s4751_s11 + $0x110] sm:$0xff] }
  0xf0   : > { %6901 = vst [vmem:[#allocation45_spill] sm:$0xff] %v5325_v12  ;;  %v1603_v12 = vmul.f32 1.442695, %v1525_v42  ;;  %v4439_v45 = vpop.eup %4438  ;;  %v1495_v42 = vsub.f32 %v4757_v5, %v5025_v30  ;;  %v1357_v63 = vsel %vm323_vm0, %v5388_v34, -inf }
  0xf1   : > { %1358 = vmax.xlane.f32.xlu2 %v1357_v63  ;;  %v5415_v63 = vld [vmem:[%s4751_s11 + $0x118] sm:$0xff] }
  0xf2   : > { %4103 = vmatmul.msk.f32.gmra.mxu0 %vm323_vm0, %v5239_v47  ;;  %4440 = vpow2.f32 %v1603_v12  ;;  %v1559_v5 = vmul.f32 5.0, %v1495_v42 }
  0xf3   : > { %4199 = vmatmul.msk.f32.gmra.mxu3 %vm323_vm0, %v4945_v59  ;;  %4442 = vpow2.f32 %v1605_v53 }
  0xf4   : > { %4215 = vmatmul.msk.f32.gmra.mxu2 %vm323_vm0, %v4437_v41  ;;  %v5365_v41 = vpop.xlane.xlu0 %1442  ;;  %v1671_v42 = vmul.f32 1.442695, %v1559_v5 }
  0xf5   : > { %6906 = vst [vmem:[#allocation50_spill] sm:$0xff] %v5365_v41 }
  0xf6   : > { %v5350_v59 = vpop.f32.mrf.mxu3  ;;  %4444 = vpow2.f32 %v1671_v42  ;;  %v5426_v42 = vpop.xlane.xlu1 %1310 }
  0xf7   : > { %6904 = vst [vmem:[#allocation48_spill] sm:$0xff] %v5350_v59  ;;  %v5352_v28 = vpop.f32.mrf.mxu0 }
  0xf8   : > { %6905 = vst [vmem:[#allocation49_spill] sm:$0xff] %v5352_v28  ;;  %v5376_v28 = vpop.f32.mrf.mxu1  ;;  %4164 = vmatmul.msk.f32.gmra.mxu1 %vm323_vm0, %v5167_v25 }
  0xf9   : > { %6914 = vst [vmem:[#allocation58_spill] sm:$0xff] %v5426_v42 }
  0xfa   : > { %4104 = vmatmul.msk.f32.gmra.mxu0 %vm323_vm0, %v5261_v35 }
  0xfb   : > { %4200 = vmatmul.msk.f32.gmra.mxu3 %vm323_vm0, %v4958_v62  ;;  %v3441_v62 = vld [vmem:[%s6814_s4 + $0x50] sm:$0xff] }
  0xfc   : > { %4216 = vmatmul.msk.f32.gmra.mxu2 %vm323_vm0, %v4439_v45  ;;  %3452 = vmatpush.msrb.mxu1 %v3441_v62  ;;  %v4441_v45 = vpop.eup %4440  ;;  %v5397_v6 = vpop.xlane.xlu0 %1307  ;;  %v1496_v62 = vsub.f32 %v4766_v7, %v5038_v37 }
  0xfd   : > { %6910 = vst [vmem:[#allocation54_spill] sm:$0xff] %v5397_v6  ;;  %v4443_v5 = vpop.eup %4442 }
  0xfe   : > { %v5374_v59 = vpop.f32.mrf.mxu3  ;;  %v1560_v7 = vmul.f32 5.0, %v1496_v62 }
  0xff   : > { %6908 = vst [vmem:[#allocation52_spill] sm:$0xff] %v5374_v59  ;;  %v5381_v12 = vpop.f32.mrf.mxu0  ;;  %v1527_v59 = vmul.f32 5.0, %v1463_v55 }
 0x100   : > { %6909 = vst [vmem:[#allocation53_spill] sm:$0xff] %v5381_v12  ;;  %v5403_v12 = vpop.f32.mrf.mxu1  ;;  %4165 = vmatmul.msk.f32.gmra.mxu1 %vm323_vm0, %v5192_v56  ;;  %v1673_v62 = vmul.f32 1.442695, %v1560_v7  ;;  %v5441_v7 = vld [vmem:[%s4751_s11 + $0x120] sm:$0xff] }
 0x101   : > { %v1607_v53 = vmul.f32 1.442695, %v1527_v59  ;;  %v5421_v59 = vpop.xlane.xlu2 %1445 }
 0x102   : > { %4105 = vmatmul.msk.f32.gmra.mxu0 %vm323_vm0, %v5286_v0  ;;  %6913 = vst [vmem:[#allocation57_spill] sm:$0xff] %v5421_v59 }
 0x103   : > { %4201 = vmatmul.msk.f32.gmra.mxu3 %vm323_vm0, %v4977_v3  ;;  %v3735_v3 = vld [vmem:[%s6815_s5 + $0x78] sm:$0xff]  ;;  %4446 = vpow2.f32 %v1607_v53  ;;  %v1465_v53 = vsub.f32 %v5008_v20, %v5426_v42 }
 0x104   : > { %4217 = vmatmul.msk.f32.gmra.mxu2 %vm323_vm0, %v4441_v45  ;;  %v1464_v45 = vsub.f32 %v4996_v14, %v5397_v6  ;;  %v1360_v14 = vsel %vm323_vm0, %v5415_v63, -inf  ;;  %4448 = vpow2.f32 %v1673_v62 }
 0x105   : > { %3736 = vmatpush.msrb.mxu2 %v3735_v3  ;;  %1361 = vmax.xlane.f32.xlu0 %v1360_v14  ;;  %v1529_v14 = vmul.f32 5.0, %v1465_v53 }
 0x106   : > { %v5401_v30 = vpop.f32.mrf.mxu3  ;;  %v1528_v3 = vmul.f32 5.0, %v1464_v45 }
 0x107   : > { %6911 = vst [vmem:[#allocation55_spill] sm:$0xff] %v5401_v30  ;;  %v5408_v55 = vpop.f32.mrf.mxu0  ;;  %v1497_v30 = vsub.f32 %v4795_v17, %v5084_v9  ;;  %v1363_v17 = vsel %vm323_vm0, %v5441_v7, -inf  ;;  %v1611_v53 = vmul.f32 1.442695, %v1529_v14 }
 0x108   : > { %6912 = vst [vmem:[#allocation56_spill] sm:$0xff] %v5408_v55  ;;  %v4445_v55 = vpop.eup %4444  ;;  %v1609_v6 = vmul.f32 1.442695, %v1528_v3  ;;  %1364 = vmax.xlane.f32.xlu1 %v1363_v17 }
 0x109   : > { %v4447_v45 = vpop.eup %4446  ;;  %v5449_v20 = vpop.xlane.xlu2 %1313 }
 0x10a   : > { %4106 = vmatmul.msk.f32.gmra.mxu0 %vm323_vm0, %v5308_v40  ;;  %4450 = vpow2.f32 %v1609_v6  ;;  %6917 = vst [vmem:[#allocation61_spill] sm:$0xff] %v5449_v20  ;;  %v4449_v6 = vpop.eup %4448 }
 0x10b   : > { %4202 = vmatmul.msk.f32.gmra.mxu3 %vm323_vm0, %v5013_v21  ;;  %v5432_v21 = vpop.f32.mrf.mxu1  ;;  %4166 = vmatmul.msk.f32.gmra.mxu1 %vm323_vm0, %v5217_v60 }
 0x10c   : > { %4218 = vmatmul.msk.f32.gmra.mxu2 %vm323_vm0, %v4443_v5  ;;  %v1561_v5 = vmul.f32 5.0, %v1497_v30  ;;  %v1498_v30 = vsub.f32 %v4798_v18, %v5106_v44  ;;  %v5467_v44 = vld [vmem:[%s4751_s11 + $0x128] sm:$0xff] }
 0x10d   : > { %v1366_v14 = vsel %vm323_vm0, %v5467_v44, -inf }
 0x10e   : > { %v5430_v37 = vpop.f32.mrf.mxu3  ;;  %v1675_v3 = vmul.f32 1.442695, %v1561_v5  ;;  %v1562_v5 = vmul.f32 5.0, %v1498_v30  ;;  %1367 = vmax.xlane.f32.xlu2 %v1366_v14 }
 0x10f   : > { %6915 = vst [vmem:[#allocation59_spill] sm:$0xff] %v5430_v37  ;;  %v5434_v58 = vpop.f32.mrf.mxu0 }
 0x110   : > { %6916 = vst [vmem:[#allocation60_spill] sm:$0xff] %v5434_v58  ;;  %v4451_v18 = vpop.eup %4450  ;;  %4452 = vpow2.f32 %v1675_v3  ;;  %v5478_v3 = vpop.xlane.xlu0 %1316  ;;  %v1677_v30 = vmul.f32 1.442695, %v1562_v5 }
 0x111   : > { %4454 = vpow2.f32 %v1611_v53  ;;  %6920 = vst [vmem:[#allocation64_spill] sm:$0xff] %v5478_v3  ;;  %v1467_v5 = vsub.f32 %v5053_v51, %v5478_v3  ;;  %v2832_v51 = vld [vmem:[%s6813_s3 + $0x20] sm:$0xff] }
 0x112   : > { %4107 = vmatmul.msk.f32.gmra.mxu0 %vm323_vm0, %v5330_v31  ;;  %4456 = vpow2.f32 %v1677_v30  ;;  %v5509_v30 = vpop.xlane.xlu1 %1319 }
 0x113   : > { %4251 = vmatmul.msk.f32.vlgmr.msra.gmra.mxu3 %vm323_vm0, %v4445_v55  ;;  %v5455_v37 = vpop.f32.mrf.mxu1  ;;  %v3440_v55 = vld [vmem:[%s6814_s4 + $0x48] sm:$0xff]  ;;  %4167 = vmatmul.msk.f32.gmra.mxu1 %vm323_vm0, %v5239_v47  ;;  %6923 = vst [vmem:[#allocation67_spill] sm:$0xff] %v5509_v30 }
 0x114   : > { %4219 = vmatmul.msk.f32.gmra.mxu2 %vm323_vm0, %v4447_v45  ;;  %v1466_v45 = vsub.f32 %v5030_v33, %v5449_v20  ;;  %3453 = vmatpush.msrb.mxu1 %v3440_v55  ;;  %v2364_v33 = vld [vmem:[%s6813_s3 + $0x10] sm:$0xff]  ;;  %v1499_v55 = vsub.f32 %v4817_v24, %v5128_v2 }
 0x115   : > { %2572 = vmatpush.msrb.mxu3 %v2364_v33  ;;  %v5498_v2 = vld [vmem:[%s4751_s11 + $0x130] sm:$0xff]  ;;  %3043 = vmatpush.msrb.mxu0 %v2832_v51 }
 0x116   : > { %v5453_v62 = vpop.f32.mrf.mxu3  ;;  %v1530_v9 = vmul.f32 5.0, %v1466_v45  ;;  %v3734_v45 = vld [vmem:[%s6815_s5 + $0x70] sm:$0xff]  ;;  %v4453_v14 = vpop.eup %4452  ;;  %v1563_v33 = vmul.f32 5.0, %v1499_v55 }
 0x117   : > { %6918 = vst [vmem:[#allocation62_spill] sm:$0xff] %v5453_v62  ;;  %v5460_v17 = vpop.f32.mrf.mxu0  ;;  %v5486_v53 = vpop.f32.mrf.mxu2  ;;  %3737 = vmatpush.msrb.mxu2 %v3734_v45  ;;  %v1500_v45 = vsub.f32 %v4833_v29, %v5153_v57  ;;  %v5526_v29 = vld [vmem:[%s4751_s11 + $0x138] sm:$0xff] }
 0x118   : > { %6919 = vst [vmem:[#allocation63_spill] sm:$0xff] %v5460_v17  ;;  %v4455_v24 = vpop.eup %4454  ;;  %v1679_v55 = vmul.f32 1.442695, %v1563_v33  ;;  %v5534_v57 = vpop.xlane.xlu2 %1322 }
 0x119   : > { %v1564_v51 = vmul.f32 5.0, %v1500_v45  ;;  %6926 = vst [vmem:[#allocation70_spill] sm:$0xff] %v5534_v57  ;;  %v1501_v45 = vsub.f32 %v4840_v32, %v5175_v48  ;;  %v5552_v48 = vld [vmem:[%s4751_s11 + $0x140] sm:$0xff] }
 0x11a   : > { %4108 = vmatmul.msk.f32.gmra.mxu0 %vm323_vm0, %v5359_v54 }
 0x11b   : > { %4252 = vmatmul.msk.f32.gmra.mxu3 %vm323_vm0, %v4449_v6  ;;  %v5484_v62 = vpop.f32.mrf.mxu1  ;;  %4168 = vmatmul.msk.f32.gmra.mxu1 %vm323_vm0, %v5261_v35 }
 0x11c   : > { %4220 = vmatmul.msk.f32.gmra.mxu2 %vm323_vm0, %v4451_v18  ;;  %v1613_v18 = vmul.f32 1.442695, %v1530_v9  ;;  %v1369_v9 = vsel %vm323_vm0, %v5498_v2, -inf }
 0x11d   : > { %1370 = vmax.xlane.f32.xlu0 %v1369_v9  ;;  %v1468_v9 = vsub.f32 %v5076_v8, %v5509_v30 }
 0x11e   : > { %v5482_v6 = vpop.f32.mrf.mxu3  ;;  %4458 = vpow2.f32 %v1613_v18  ;;  %v4457_v18 = vpop.eup %4456 }
 0x11f   : > { %6921 = vst [vmem:[#allocation65_spill] sm:$0xff] %v5482_v6  ;;  %v5491_v17 = vpop.f32.mrf.mxu0  ;;  %v1531_v6 = vmul.f32 5.0, %v1467_v5  ;;  %4460 = vpow2.f32 %v1679_v55  ;;  %v1532_v8 = vmul.f32 5.0, %v1468_v9  ;;  %v1681_v55 = vmul.f32 1.442695, %v1564_v51 }
 0x120   : > { %6922 = vst [vmem:[#allocation66_spill] sm:$0xff] %v5491_v17  ;;  %v1565_v51 = vmul.f32 5.0, %v1501_v45 }
 0x121   : > { %v1615_v5 = vmul.f32 1.442695, %v1531_v6  ;;  %v1372_v6 = vsel %vm323_vm0, %v5526_v29, -inf  ;;  %v1617_v9 = vmul.f32 1.442695, %v1532_v8  ;;  %v1375_v8 = vsel %vm323_vm0, %v5552_v48, -inf }
 0x122   : > { %4109 = vmatmul.msk.f32.gmra.mxu0 %vm323_vm0, %v5388_v34  ;;  %1373 = vmax.xlane.f32.xlu1 %v1372_v6  ;;  %v1683_v45 = vmul.f32 1.442695, %v1565_v51 }
 0x123   : > { %4253 = vmatmul.msk.f32.gmra.mxu3 %vm323_vm0, %v4453_v14  ;;  %v5515_v17 = vpop.f32.mrf.mxu1  ;;  %4169 = vmatmul.msk.f32.gmra.mxu1 %vm323_vm0, %v5286_v0  ;;  %4462 = vpow2.f32 %v1615_v5 }
 0x124   : > { %4221 = vmatmul.msk.f32.gmra.mxu2 %vm323_vm0, %v4455_v24  ;;  %v5521_v24 = vpop.f32.mrf.mxu2  ;;  %v4459_v33 = vpop.eup %4458  ;;  %4464 = vpow2.f32 %v1681_v55  ;;  %1376 = vmax.xlane.f32.xlu2 %v1375_v8 }
 0x125   : > { %v4461_v5 = vpop.eup %4460  ;;  %4466 = vpow2.f32 %v1617_v9  ;;  %v5562_v55 = vpop.xlane.xlu0 %1325 }
 0x126   : > { %v5513_v14 = vpop.f32.mrf.mxu3  ;;  %6929 = vst [vmem:[#allocation73_spill] sm:$0xff] %v5562_v55  ;;  %4468 = vpow2.f32 %v1683_v45  ;;  %v5593_v45 = vpop.xlane.xlu1 %1328 }
 0x127   : > { %6924 = vst [vmem:[#allocation68_spill] sm:$0xff] %v5513_v14  ;;  %v5517_v58 = vpop.f32.mrf.mxu0 }
 0x128   : > { %6925 = vst [vmem:[#allocation69_spill] sm:$0xff] %v5517_v58 }
 0x129   : > { %v4463_v32 = vpop.eup %4462  ;;  %6932 = vst [vmem:[#allocation76_spill] sm:$0xff] %v5593_v45 }
 0x12a   : > { %4110 = vmatmul.msk.f32.gmra.mxu0 %vm323_vm0, %v5415_v63  ;;  %v4465_v9 = vpop.eup %4464 }
 0x12b   : > { %4254 = vmatmul.msk.f32.gmra.mxu3 %vm323_vm0, %v4457_v18  ;;  %v5540_v58 = vpop.f32.mrf.mxu1  ;;  %v3439_v18 = vld [vmem:[%s6814_s4 + $0x40] sm:$0xff]  ;;  %4170 = vmatmul.msk.f32.gmra.mxu1 %vm323_vm0, %v5308_v40 }
 0x12c   : > { %4222 = vmatmul.msk.f32.gmra.mxu2 %vm323_vm0, %v4459_v33  ;;  %v1469_v33 = vsub.f32 %v5098_v39, %v5534_v57  ;;  %3454 = vmatpush.msrb.mxu1 %v3439_v18  ;;  %v1502_v18 = vsub.f32 %v4862_v38, %v5200_v26  ;;  %v4467_v38 = vpop.eup %4466  ;;  %v5580_v26 = vld [vmem:[%s4751_s11 + $0x148] sm:$0xff] }
 0x12e   : > { %v5538_v14 = vpop.f32.mrf.mxu3  ;;  %v1533_v39 = vmul.f32 5.0, %v1469_v33  ;;  %v1566_v51 = vmul.f32 5.0, %v1502_v18 }
 0x12f   : > { %6927 = vst [vmem:[#allocation71_spill] sm:$0xff] %v5538_v14  ;;  %v5545_v6 = vpop.f32.mrf.mxu0  ;;  %v5554_v14 = vpop.f32.mrf.mxu2 }
 0x130   : > { %6928 = vst [vmem:[#allocation72_spill] sm:$0xff] %v5545_v6  ;;  %v1619_v33 = vmul.f32 1.442695, %v1533_v39  ;;  %v1378_v39 = vsel %vm323_vm0, %v5580_v26, -inf  ;;  %v1685_v18 = vmul.f32 1.442695, %v1566_v51 }
 0x131   : > { %1379 = vmax.xlane.f32.xlu0 %v1378_v39 }
 0x132   : > { %4111 = vmatmul.msk.f32.gmra.mxu0 %vm323_vm0, %v5441_v7  ;;  %4470 = vpow2.f32 %v1619_v33 }
 0x133   : > { %4255 = vmatmul.msk.f32.gmra.mxu3 %vm323_vm0, %v4461_v5  ;;  %v5568_v57 = vpop.f32.mrf.mxu1  ;;  %v3733_v5 = vld [vmem:[%s6815_s5 + $0x68] sm:$0xff]  ;;  %4171 = vmatmul.msk.f32.gmra.mxu1 %vm323_vm0, %v5330_v31  ;;  %4472 = vpow2.f32 %v1685_v18 }
 0x134   : > { %4223 = vmatmul.msk.f32.gmra.mxu2 %vm323_vm0, %v4463_v32  ;;  %v1470_v32 = vsub.f32 %v5120_v61, %v5562_v55 }
 0x135   : > { %3738 = vmatpush.msrb.mxu2 %v3733_v5  ;;  %v2363_v5 = vld [vmem:[%s6813_s3 + $0x8] sm:$0xff] }
 0x136   : > { %v5566_v6 = vpop.f32.mrf.mxu3  ;;  %v1534_v61 = vmul.f32 5.0, %v1470_v32  ;;  %2573 = vmatpush.msrb.mxu3 %v2363_v5  ;;  %v4469_v32 = vpop.eup %4468  ;;  %v5608_v5 = vld [vmem:[%s4751_s11 + $0x150] sm:$0xff] }
 0x137   : > { %6930 = vst [vmem:[#allocation74_spill] sm:$0xff] %v5566_v6  ;;  %v5573_v8 = vpop.f32.mrf.mxu0  ;;  %v5590_v6 = vpop.f32.mrf.mxu2 }
 0x138   : > { %6931 = vst [vmem:[#allocation75_spill] sm:$0xff] %v5573_v8  ;;  %v1621_v30 = vmul.f32 1.442695, %v1534_v61  ;;  %v4471_v39 = vpop.eup %4470  ;;  %v1381_v61 = vsel %vm323_vm0, %v5608_v5, -inf }
 0x139   : > { %1382 = vmax.xlane.f32.xlu1 %v1381_v61 }
 0x13a   : > { %4112 = vmatmul.msk.f32.gmra.mxu0 %vm323_vm0, %v5467_v44  ;;  %4474 = vpow2.f32 %v1621_v30  ;;  %v3438_v30 = vld [vmem:[%s6814_s4 + $0x38] sm:$0xff] }
 0x13b   : > { %4256 = vmatmul.msk.f32.gmra.mxu3 %vm323_vm0, %v4465_v9  ;;  %v4668_v9 = vld [vmem:[%s4751_s11 + $0x1c0] sm:$0xff]  ;;  %v5599_v33 = vpop.f32.mrf.mxu1  ;;  %4172 = vmatmul.msk.f32.gmra.mxu1 %vm323_vm0, %v5359_v54 }
 0x13c   : > { %4224 = vmatmul.msk.f32.gmra.mxu2 %vm323_vm0, %v4467_v38  ;;  %v1503_v8 = vsub.f32 %v4668_v9, %v5225_v10  ;;  %v1471_v38 = vsub.f32 %v5145_v16, %v5593_v45  ;;  %v5616_v16 = vpop.xlane.xlu2 %1331  ;;  %3455 = vmatpush.msrb.mxu1 %v3438_v30  ;;  %v5644_v30 = vpop.xlane.xlu0 %1334 }
 0x13d   : > { %6935 = vst [vmem:[#allocation79_spill] sm:$0xff] %v5616_v16 }
 0x13e   : > { %v5597_v55 = vpop.f32.mrf.mxu3  ;;  %v1567_v51 = vmul.f32 5.0, %v1503_v8  ;;  %v1535_v9 = vmul.f32 5.0, %v1471_v38  ;;  %v4669_v8 = vld [vmem:[%s4751_s11 + $0x1c8] sm:$0xff]  ;;  %v4473_v38 = vpop.eup %4472  ;;  %6938 = vst [vmem:[#allocation82_spill] sm:$0xff] %v5644_v30 }
 0x13f   : > { %6933 = vst [vmem:[#allocation77_spill] sm:$0xff] %v5597_v55  ;;  %v5601_v3 = vpop.f32.mrf.mxu0  ;;  %v1504_v18 = vsub.f32 %v4669_v8, %v5247_v22 }
 0x140   : > { %6934 = vst [vmem:[#allocation78_spill] sm:$0xff] %v5601_v3  ;;  %v1687_v10 = vmul.f32 1.442695, %v1567_v51  ;;  %v1623_v61 = vmul.f32 1.442695, %v1535_v9  ;;  %v1472_v51 = vsub.f32 %v5167_v25, %v5616_v16  ;;  %v4475_v8 = vpop.eup %4474 }
 0x141   : > { %v1568_v22 = vmul.f32 5.0, %v1504_v18 }
 0x142   : > { %4113 = vmatmul.msk.f32.gmra.mxu0 %vm323_vm0, %v5498_v2  ;;  %4476 = vpow2.f32 %v1687_v10  ;;  %v1536_v25 = vmul.f32 5.0, %v1472_v51  ;;  %v4670_v10 = vld [vmem:[%s4751_s11 + $0x1d0] sm:$0xff] }
 0x143   : > { %4257 = vmatmul.msk.f32.gmra.mxu3 %vm323_vm0, %v4469_v32  ;;  %v5622_v3 = vpop.f32.mrf.mxu1  ;;  %v5624_v32 = vpop.f32.mrf.mxu2  ;;  %4173 = vmatmul.msk.f32.gmra.mxu1 %vm323_vm0, %v5388_v34  ;;  %4478 = vpow2.f32 %v1623_v61  ;;  %v1505_v18 = vsub.f32 %v4670_v10, %v5269_v1 }
 0x144   : > { %4225 = vmatmul.msk.f32.gmra.mxu2 %vm323_vm0, %v4471_v39  ;;  %v1625_v51 = vmul.f32 1.442695, %v1536_v25 }
 0x145   : > { %v1569_v1 = vmul.f32 5.0, %v1505_v18  ;;  %v4671_v18 = vld [vmem:[%s4751_s11 + $0x1d8] sm:$0xff] }
 0x146   : > { %v5620_v55 = vpop.f32.mrf.mxu3 }
 0x147   : > { %6936 = vst [vmem:[#allocation80_spill] sm:$0xff] %v5620_v55  ;;  %v5629_v39 = vpop.f32.mrf.mxu0  ;;  %v5636_v55 = vld [vmem:[%s4751_s11 + $0x158] sm:$0xff] }
 0x148   : > { %6937 = vst [vmem:[#allocation81_spill] sm:$0xff] %v5629_v39  ;;  %v1384_v9 = vsel %vm323_vm0, %v5636_v55, -inf  ;;  %v1689_v39 = vmul.f32 1.442695, %v1568_v22  ;;  %v4477_v61 = vpop.eup %4476 }
 0x149   : > { %1385 = vmax.xlane.f32.xlu2 %v1384_v9  ;;  %v4479_v10 = vpop.eup %4478 }
 0x14a   : > { %4114 = vmatmul.msk.f32.gmra.mxu0 %vm323_vm0, %v5526_v29  ;;  %4480 = vpow2.f32 %v1689_v39  ;;  %v1691_v39 = vmul.f32 1.442695, %v1569_v1 }
 0x14b   : > { %4258 = vmatmul.msk.f32.gmra.mxu3 %vm323_vm0, %v4473_v38  ;;  %v5650_v45 = vpop.f32.mrf.mxu1  ;;  %v3732_v38 = vld [vmem:[%s6815_s5 + $0x60] sm:$0xff]  ;;  %v5659_v22 = vpop.f32.mrf.mxu2  ;;  %4174 = vmatmul.msk.f32.gmra.mxu1 %vm323_vm0, %v5415_v63  ;;  %4482 = vpow2.f32 %v1625_v51 }
 0x14c   : > { %4226 = vmatmul.msk.f32.gmra.mxu2 %vm323_vm0, %v4475_v8  ;;  %6940 = vst [vmem:[#allocation84_spill] sm:$0xff] %v5650_v45  ;;  %v1473_v8 = vsub.f32 %v5192_v56, %v5644_v30  ;;  %4484 = vpow2.f32 %v1691_v39 }
 0x14d   : > { %3739 = vmatpush.msrb.mxu2 %v3732_v38  ;;  %v5672_v38 = vpop.xlane.xlu1 %1337 }
 0x14e   : > { %v5648_v16 = vpop.f32.mrf.mxu3  ;;  %v1537_v25 = vmul.f32 5.0, %v1473_v8  ;;  %6942 = vst [vmem:[#allocation86_spill] sm:$0xff] %v5672_v38  ;;  %v1474_v51 = vsub.f32 %v5217_v60, %v5672_v38 }
 0x14f   : > { %6939 = vst [vmem:[#allocation83_spill] sm:$0xff] %v5648_v16  ;;  %v5655_v9 = vpop.f32.mrf.mxu0  ;;  %v5664_v16 = vld [vmem:[%s4751_s11 + $0x160] sm:$0xff] }
 0x150   : > { %6941 = vst [vmem:[#allocation85_spill] sm:$0xff] %v5655_v9  ;;  %v1387_v56 = vsel %vm323_vm0, %v5664_v16, -inf  ;;  %v1506_v9 = vsub.f32 %v4671_v18, %v5294_v36  ;;  %v1627_v42 = vmul.f32 1.442695, %v1537_v25  ;;  %v1538_v60 = vmul.f32 5.0, %v1474_v51  ;;  %v2362_v18 = vld [vmem:[%s6813_s3] sm:$0xff] }
 0x151   : > { %1388 = vmax.xlane.f32.xlu0 %v1387_v56  ;;  %2574 = vmatpush.msrb.mxu3 %v2362_v18  ;;  %v4672_v36 = vld [vmem:[%s4751_s11 + $0x1e0] sm:$0xff]  ;;  %v5718_v18 = vld [vmem:[%s4751_s11 + $0x170] sm:$0xff] }
 0x152   : > { %4115 = vmatmul.msk.f32.gmra.mxu0 %vm323_vm0, %v5552_v48  ;;  %v1570_v1 = vmul.f32 5.0, %v1506_v9  ;;  %4486 = vpow2.f32 %v1627_v42  ;;  %v5700_v9 = vpop.xlane.xlu2 %1340  ;;  %v3437_v42 = vld [vmem:[%s6814_s4 + $0x30] sm:$0xff] }
 0x153   : > { %4259 = vmatmul.msk.f32.gmra.mxu3 %vm323_vm0, %v4477_v61  ;;  %v5678_v20 = vpop.f32.mrf.mxu1  ;;  %v4481_v61 = vpop.eup %4480  ;;  %4175 = vmatmul.msk.f32.gmra.mxu1 %vm323_vm0, %v5441_v7  ;;  %6945 = vst [vmem:[#allocation89_spill] sm:$0xff] %v5700_v9 }
 0x154   : > { %4227 = vmatmul.msk.f32.gmra.mxu2 %vm323_vm0, %v4479_v10  ;;  %v4483_v8 = vpop.eup %4482  ;;  %v5687_v10 = vld [vmem:[%s4751_s11 + $0x168] sm:$0xff]  ;;  %v5689_v56 = vpop.f32.mrf.mxu2  ;;  %v1693_v39 = vmul.f32 1.442695, %v1570_v1  ;;  %3456 = vmatpush.msrb.mxu1 %v3437_v42 }
 0x155   : > { %v1390_v25 = vsel %vm323_vm0, %v5687_v10, -inf  ;;  %v4485_v51 = vpop.eup %4484 }
 0x156   : > { %v5676_v30 = vpop.f32.mrf.mxu3  ;;  %1391 = vmax.xlane.f32.xlu1 %v1390_v25  ;;  %v1629_v25 = vmul.f32 1.442695, %v1538_v60  ;;  %4488 = vpow2.f32 %v1693_v39  ;;  %v1393_v60 = vsel %vm323_vm0, %v5718_v18, -inf }
 0x157   : > { %6943 = vst [vmem:[#allocation87_spill] sm:$0xff] %v5676_v30  ;;  %v5680_v45 = vpop.f32.mrf.mxu0  ;;  %1394 = vmax.xlane.f32.xlu2 %v1393_v60 }
 0x158   : > { %6944 = vst [vmem:[#allocation88_spill] sm:$0xff] %v5680_v45  ;;  %4490 = vpow2.f32 %v1629_v25  ;;  %v3731_v25 = vld [vmem:[%s6815_s5 + $0x58] sm:$0xff] }
 0x159   : > { %3740 = vmatpush.msrb.mxu2 %v3731_v25  ;;  %v5754_v25 = vpop.xlane.xlu1 %1346 }
 0x15a   : > { %4116 = vmatmul.msk.f32.gmra.mxu0 %vm323_vm0, %v5580_v26  ;;  %6953 = vst [vmem:[#allocation97_spill] sm:$0xff] %v5754_v25 }
 0x15b   : > { %4260 = vmatmul.msk.f32.gmra.mxu3 %vm323_vm0, %v4481_v61  ;;  %v1507_v61 = vsub.f32 %v4672_v36, %v5316_v46  ;;  %v5706_v45 = vpop.f32.mrf.mxu1  ;;  %4176 = vmatmul.msk.f32.gmra.mxu1 %vm323_vm0, %v5467_v44  ;;  %v4487_v36 = vpop.eup %4486 }
 0x15c   : > { %4228 = vmatmul.msk.f32.gmra.mxu2 %vm323_vm0, %v4483_v8  ;;  %6947 = vst [vmem:[#allocation91_spill] sm:$0xff] %v5706_v45  ;;  %v1475_v8 = vsub.f32 %v5239_v47, %v5700_v9  ;;  %v5725_v42 = vpop.f32.mrf.mxu2  ;;  %v5728_v46 = vpop.xlane.xlu0 %1343 }
 0x15d   : > { %v1571_v1 = vmul.f32 5.0, %v1507_v61  ;;  %6949 = vst [vmem:[#allocation93_spill] sm:$0xff] %v5728_v46  ;;  %v4673_v61 = vld [vmem:[%s4751_s11 + $0x1e8] sm:$0xff] }
 0x15e   : > { %v5704_v30 = vpop.f32.mrf.mxu3  ;;  %v1539_v47 = vmul.f32 5.0, %v1475_v8  ;;  %v4489_v8 = vpop.eup %4488 }
 0x15f   : > { %6946 = vst [vmem:[#allocation90_spill] sm:$0xff] %v5704_v30  ;;  %v5711_v38 = vpop.f32.mrf.mxu0  ;;  %v1695_v39 = vmul.f32 1.442695, %v1571_v1  ;;  %v1508_v30 = vsub.f32 %v4673_v61, %v5338_v50  ;;  %v4491_v1 = vpop.eup %4490  ;;  %v5746_v50 = vld [vmem:[%s4751_s11 + $0x178] sm:$0xff] }
 0x160   : > { %6948 = vst [vmem:[#allocation92_spill] sm:$0xff] %v5711_v38  ;;  %v1631_v60 = vmul.f32 1.442695, %v1539_v47  ;;  %v1396_v47 = vsel %vm323_vm0, %v5746_v50, -inf }
 0x161   : > { %4492 = vpow2.f32 %v1695_v39  ;;  %v1572_v61 = vmul.f32 5.0, %v1508_v30  ;;  %1397 = vmax.xlane.f32.xlu0 %v1396_v47  ;;  %v4674_v39 = vld [vmem:[%s4751_s11 + $0x1f0] sm:$0xff] }
 0x162   : > { %4117 = vmatmul.msk.f32.gmra.mxu0 %vm323_vm0, %v5608_v5  ;;  %4494 = vpow2.f32 %v1631_v60  ;;  %v1509_v30 = vsub.f32 %v4674_v39, %v5365_v41  ;;  %v4675_v41 = vld [vmem:[%s4751_s11 + $0x1f8] sm:$0xff] }
 0x163   : > { %4261 = vmatmul.msk.f32.gmra.mxu3 %vm323_vm0, %v4485_v51  ;;  %v5734_v51 = vpop.f32.mrf.mxu1  ;;  %4177 = vmatmul.msk.f32.gmra.mxu1 %vm323_vm0, %v5498_v2 }
 0x164   : > { %4229 = vmatmul.msk.f32.gmra.mxu2 %vm323_vm0, %v4487_v36  ;;  %6951 = vst [vmem:[#allocation95_spill] sm:$0xff] %v5734_v51  ;;  %v1476_v36 = vsub.f32 %v5261_v35, %v5728_v46  ;;  %v5762_v51 = vpop.f32.mrf.mxu2 }
 0x166   : > { %v5732_v38 = vpop.f32.mrf.mxu3  ;;  %v1540_v35 = vmul.f32 5.0, %v1476_v36  ;;  %v1477_v36 = vsub.f32 %v5286_v0, %v5754_v25  ;;  %v1510_v0 = vsub.f32 %v4675_v41, %v5421_v59 }
 0x167   : > { %6950 = vst [vmem:[#allocation94_spill] sm:$0xff] %v5732_v38  ;;  %v5739_v9 = vpop.f32.mrf.mxu0  ;;  %v1697_v38 = vmul.f32 1.442695, %v1572_v61  ;;  %v1573_v61 = vmul.f32 5.0, %v1509_v30 }
 0x168   : > { %6952 = vst [vmem:[#allocation96_spill] sm:$0xff] %v5739_v9  ;;  %v1633_v45 = vmul.f32 1.442695, %v1540_v35  ;;  %v1541_v47 = vmul.f32 5.0, %v1477_v36  ;;  %v5774_v35 = vpop.xlane.xlu2 %1349 }
 0x169   : > { %4496 = vpow2.f32 %v1697_v38  ;;  %6956 = vst [vmem:[#allocation100_spill] sm:$0xff] %v5774_v35  ;;  %v1699_v39 = vmul.f32 1.442695, %v1573_v61  ;;  %v3436_v38 = vld [vmem:[%s6814_s4 + $0x28] sm:$0xff]  ;;  %v1478_v36 = vsub.f32 %v5308_v40, %v5774_v35  ;;  %v1574_v61 = vmul.f32 5.0, %v1510_v0 }
 0x16a   : > { %4118 = vmatmul.msk.f32.gmra.mxu0 %vm323_vm0, %v5636_v55  ;;  %4498 = vpow2.f32 %v1633_v45  ;;  %3457 = vmatpush.msrb.mxu1 %v3436_v38  ;;  %v5802_v38 = vpop.xlane.xlu0 %1352 }
 0x16b   : > { %4262 = vmatmul.msk.f32.gmra.mxu3 %vm323_vm0, %v4489_v8  ;;  %v5760_v46 = vpop.f32.mrf.mxu1  ;;  %v4493_v8 = vpop.eup %4492  ;;  %4178 = vmatmul.msk.f32.gmra.mxu1 %vm323_vm0, %v5526_v29  ;;  %4500 = vpow2.f32 %v1699_v39  ;;  %v1542_v40 = vmul.f32 5.0, %v1478_v36  ;;  %6959 = vst [vmem:[#allocation103_spill] sm:$0xff] %v5802_v38  ;;  %v1701_v59 = vmul.f32 1.442695, %v1574_v61 }
 0x16c   : > { %4230 = vmatmul.msk.f32.gmra.mxu2 %vm323_vm0, %v4491_v1  ;;  %v4495_v1 = vpop.eup %4494 }
 0x16e   : > { %v5758_v9 = vpop.f32.mrf.mxu3 }
 0x16f   : > { %6954 = vst [vmem:[#allocation98_spill] sm:$0xff] %v5758_v9  ;;  %v5764_v60 = vpop.f32.mrf.mxu0  ;;  %v4497_v30 = vpop.eup %4496 }
 0x170   : > { %6955 = vst [vmem:[#allocation99_spill] sm:$0xff] %v5764_v60  ;;  %v4499_v41 = vpop.eup %4498 }
 0x172   : > { %4119 = vmatmul.msk.f32.gmra.mxu0 %vm323_vm0, %v5664_v16 }
 0x173   : > { %4263 = vmatmul.msk.f32.gmra.mxu3 %vm323_vm0, %v4493_v8  ;;  %v5780_v60 = vpop.f32.mrf.mxu1  ;;  %v1635_v8 = vmul.f32 1.442695, %v1541_v47  ;;  %4179 = vmatmul.msk.f32.gmra.mxu1 %vm323_vm0, %v5552_v48  ;;  %v5799_v47 = vld [vmem:[%s6811_s1 + $0x28] ss:$0 sm:$0xff] }
 0x174   : > { %4231 = vmatmul.msk.f32.gmra.mxu2 %vm323_vm0, %v4495_v1  ;;  %v5789_v1 = vpop.f32.mrf.mxu2  ;;  %v935_v0 = vadd.f32 %v5799_v47, %v5348_v49 }
 0x175   : > { %4502 = vpow2.f32 %v1635_v8  ;;  %v1479_v8 = vsub.f32 %v5330_v31, %v5802_v38  ;;  %v5826_v31 = vpop.xlane.xlu1 %1355 }
 0x176   : > { %v5778_v9 = vpop.f32.mrf.mxu3  ;;  %4504 = vlog2.f32 %v5486_v53  ;;  %v999_v61 = vmul.f32 0.14285715, %v935_v0  ;;  %6963 = vst [vmem:[#allocation107_spill] sm:$0xff] %v5826_v31 }
 0x177   : > { %6957 = vst [vmem:[#allocation101_spill] sm:$0xff] %v5778_v9  ;;  %v5785_v45 = vpop.f32.mrf.mxu0  ;;  %4506 = vpow2.f32 %v1701_v59  ;;  %v1543_v53 = vmul.f32 5.0, %v1479_v8  ;;  %v936_v8 = vadd.f32 %v5799_v47, %v5376_v28 }
 0x178   : > { %6958 = vst [vmem:[#allocation102_spill] sm:$0xff] %v5785_v45  ;;  %v1637_v45 = vmul.f32 1.442695, %v1542_v40 }
 0x179   : > { %v1639_v25 = vmul.f32 1.442695, %v1543_v53  ;;  %v1000_v53 = vmul.f32 0.14285715, %v936_v8 }
 0x17a   : > { %4120 = vmatmul.msk.f32.gmra.mxu0 %vm323_vm0, %v5687_v10  ;;  %4508 = vpow2.f32 %v1637_v45  ;;  %v1480_v45 = vsub.f32 %v5359_v54, %v5826_v31  ;;  %v5847_v54 = vpop.xlane.xlu2 %1358 }
 0x17b   : > { %4264 = vmatmul.msk.f32.gmra.mxu3 %vm323_vm0, %v4497_v30  ;;  %v5806_v39 = vpop.f32.mrf.mxu1  ;;  %v4501_v30 = vpop.eup %4500  ;;  %4180 = vmatmul.msk.f32.gmra.mxu1 %vm323_vm0, %v5580_v26  ;;  %4510 = vlog2.f32 %v5521_v24 }
 0x17c   : > { %4232 = vmatmul.msk.f32.gmra.mxu2 %vm323_vm0, %v4499_v41  ;;  %6961 = vst [vmem:[#allocation105_spill] sm:$0xff] %v5806_v39  ;;  %v4503_v36 = vpop.eup %4502  ;;  %v3730_v41 = vld [vmem:[%s6815_s5 + $0x50] sm:$0xff]  ;;  %v5820_v49 = vpop.f32.mrf.mxu2  ;;  %4512 = vpow2.f32 %v1639_v25  ;;  %v1544_v24 = vmul.f32 5.0, %v1480_v45  ;;  %v1481_v25 = vsub.f32 %v5388_v34, %v5847_v54 }
 0x17d   : > { %3741 = vmatpush.msrb.mxu2 %v3730_v41  ;;  %v4505_v59 = vpop.eup %4504  ;;  %4514 = vlog2.f32 %v5554_v14  ;;  %v3435_v14 = vld [vmem:[%s6814_s4 + $0x20] sm:$0xff] }
 0x17e   : > { %v5804_v9 = vpop.f32.mrf.mxu3  ;;  %v4507_v38 = vpop.eup %4506  ;;  %v1641_v31 = vmul.f32 1.442695, %v1544_v24  ;;  %v1545_v34 = vmul.f32 5.0, %v1481_v25  ;;  %3458 = vmatpush.msrb.mxu1 %v3435_v14 }
 0x17f   : > { %6960 = vst [vmem:[#allocation104_spill] sm:$0xff] %v5804_v9  ;;  %v5811_v35 = vpop.f32.mrf.mxu0 }
 0x180   : > { %6962 = vst [vmem:[#allocation106_spill] sm:$0xff] %v5811_v35  ;;  %v1063_v35 = vfloor.f32 %v999_v61  ;;  %4516 = vpow2.f32 %v1641_v31  ;;  %v1643_v31 = vmul.f32 1.442695, %v1545_v34  ;;  %v5896_v34 = vpop.xlane.xlu1 %1364 }
 0x181   : > { %4518 = vlog2.f32 %v5590_v6 }
 0x182   : > { %4121 = vmatmul.msk.f32.gmra.mxu0 %vm323_vm0, %v5718_v18  ;;  %v1127_v41 = vmul.f32 7.0, %v1063_v35  ;;  %4520 = vpow2.f32 %v1643_v31  ;;  %v1483_v31 = vsub.f32 %v5441_v7, %v5896_v34 }
 0x183   : > { %4265 = vmatmul.msk.f32.gmra.mxu3 %vm323_vm0, %v4501_v30  ;;  %v5830_v9 = vpop.f32.mrf.mxu1  ;;  %v2107_v30 = vmul.f32 0.6931472, %v4505_v59  ;;  %4181 = vmatmul.msk.f32.gmra.mxu1 %vm323_vm0, %v5608_v5  ;;  %4522 = vlog2.f32 %v5624_v32 }
 0x184   : > { %4233 = vmatmul.msk.f32.gmra.mxu2 %vm323_vm0, %v4503_v36  ;;  %6965 = vst [vmem:[#allocation109_spill] sm:$0xff] %v5830_v9  ;;  %v4509_v36 = vpop.eup %4508  ;;  %v1191_v35 = vsub.f32 %v935_v0, %v1127_v41  ;;  %v937_v9 = vadd.f32 %v5799_v47, %v5403_v12  ;;  %v5869_v12 = vpop.xlane.xlu0 %1361  ;;  %v1547_v7 = vmul.f32 5.0, %v1483_v31 }
 0x185   : > { %v2234_v61 = vmul.f32 0.2, %v2107_v30  ;;  %v4511_v28 = vpop.eup %4510  ;;  %v1064_v30 = vfloor.f32 %v1000_v53 }
 0x186   : > { %v5828_v40 = vpop.f32.mrf.mxu3  ;;  %v4513_v0 = vpop.eup %4512  ;;  %v1001_v24 = vmul.f32 0.14285715, %v937_v9 }
 0x187   : > { %6964 = vst [vmem:[#allocation108_spill] sm:$0xff] %v5828_v40  ;;  %v5833_v39 = vpop.f32.mrf.mxu0  ;;  %v5844_v40 = vpop.f32.mrf.mxu2  ;;  %v2298_v45 = vadd.f32 %v2234_v61, %v5023_v27  ;;  %v1128_v27 = vmul.f32 7.0, %v1064_v30 }
 0x188   : > { %6966 = vst [vmem:[#allocation110_spill] sm:$0xff] %v5833_v39  ;;  %v4515_v61 = vpop.eup %4514 }
 0x189   : > { %v1192_v30 = vsub.f32 %v936_v8, %v1128_v27  ;;  %v2111_v14 = vmul.f32 0.6931472, %v4515_v61 }
 0x18a   : > { %4122 = vmatmul.msk.f32.gmra.mxu0 %vm323_vm0, %v5746_v50 }
 0x18b   : > { %4266 = vmatmul.msk.f32.gmra.mxu3 %vm323_vm0, %v4507_v38  ;;  %v5851_v39 = vpop.f32.mrf.mxu1  ;;  %4182 = vmatmul.msk.f32.gmra.mxu1 %vm323_vm0, %v5636_v55  ;;  %v2236_v8 = vmul.f32 0.2, %v2111_v14  ;;  %v939_v14 = vadd.f32 %v5799_v47, %v5455_v37 }
 0x18c   : > { %4234 = vmatmul.msk.f32.gmra.mxu2 %vm323_vm0, %v4509_v36  ;;  %v2109_v36 = vmul.f32 0.6931472, %v4511_v28 }
 0x18e   : > { %v5849_v59 = vpop.f32.mrf.mxu3  ;;  %v2235_v41 = vmul.f32 0.2, %v2109_v36 }
 0x18f   : > { %6967 = vst [vmem:[#allocation111_spill] sm:$0xff] %v5849_v59  ;;  %v5854_v38 = vpop.f32.mrf.mxu0  ;;  %v5875_v59 = vpop.f32.mrf.mxu2 }
 0x190   : > { %6968 = vst [vmem:[#allocation112_spill] sm:$0xff] %v5854_v38  ;;  %v2299_v36 = vadd.f32 %v2235_v41, %v5042_v4  ;;  %v4517_v38 = vpop.eup %4516 }
 0x191   : > { %v4519_v27 = vpop.eup %4518 }
 0x192   : > { %4331 = vmatmul.msk.f32.vlgmr.msrb.gmra.mxu0 %vm2366_vm1, %v2298_v45  ;;  %v1482_v45 = vsub.f32 %v5415_v63, %v5869_v12 }
 0x193   : > { %4267 = vmatmul.msk.f32.vlgmr.msrb.gmra.mxu3 %vm2366_vm1, %v1191_v35  ;;  %v5873_v28 = vpop.f32.mrf.mxu1  ;;  %v5879_v35 = vadd.f32 %v5799_v47, %v5432_v21  ;;  %4183 = vmatmul.msk.f32.gmra.mxu1 %vm323_vm0, %v5664_v16  ;;  %v3729_v21 = vld [vmem:[%s6815_s5 + $0x48] sm:$0xff] }
 0x194   : > { %4235 = vmatmul.msk.f32.gmra.mxu2 %vm323_vm0, %v4513_v0  ;;  %v1065_v0 = vfloor.f32 %v1001_v24  ;;  %v1546_v63 = vmul.f32 5.0, %v1482_v45 }
 0x195   : > { %v1002_v6 = vmul.f32 0.14285715, %v5879_v35  ;;  %3742 = vmatpush.msrb.mxu2 %v3729_v21 }
 0x196   : > { %v5871_v53 = vpop.f32.mrf.mxu3  ;;  %v1129_v4 = vmul.f32 7.0, %v1065_v0  ;;  %v2300_v0 = vadd.f32 %v2236_v8, %v5044_v43  ;;  %v5917_v43 = vpop.xlane.xlu2 %1367 }
 0x197   : > { %v5882_v25 = vpop.f32.mrf.mxu0  ;;  %v1066_v61 = vfloor.f32 %v1002_v6  ;;  %v5910_v21 = vpop.f32.mrf.mxu2 }
 0x198   : > { %6969 = vst [vmem:[#allocation113_spill] sm:$0xff] %v5882_v25  ;;  %v1193_v45 = vsub.f32 %v937_v9, %v1129_v4  ;;  %v4521_v6 = vpop.eup %4520 }
 0x199   : > { %v1130_v32 = vmul.f32 7.0, %v1066_v61  ;;  %v4523_v37 = vpop.eup %4522  ;;  %v1484_v61 = vsub.f32 %v5467_v44, %v5917_v43 }
 0x19a   : > { %4332 = vmatmul.msk.f32.gmra.mxu0 %vm2366_vm1, %v2299_v36 }
 0x19b   : > { %4268 = vmatmul.msk.f32.gmra.mxu3 %vm2366_vm1, %v1192_v30  ;;  %v5900_v24 = vpop.f32.mrf.mxu1  ;;  %v1645_v30 = vmul.f32 1.442695, %v1546_v63  ;;  %4184 = vmatmul.msk.f32.gmra.mxu1 %vm323_vm0, %v5687_v10  ;;  %v1003_v63 = vmul.f32 0.14285715, %v939_v14 }
 0x19c   : > { %4236 = vmatmul.msk.f32.gmra.mxu2 %vm323_vm0, %v4517_v38  ;;  %v2113_v38 = vmul.f32 0.6931472, %v4519_v27  ;;  %v1194_v27 = vsub.f32 %v5879_v35, %v1130_v32 }
 0x19d   : > { %4524 = vpow2.f32 %v1645_v30  ;;  %v1067_v31 = vfloor.f32 %v1003_v63 }
 0x19e   : > { %v5898_v41 = vpop.f32.mrf.mxu3  ;;  %v2237_v9 = vmul.f32 0.2, %v2113_v38  ;;  %4526 = vlog2.f32 %v5659_v22  ;;  %v2115_v38 = vmul.f32 0.6931472, %v4523_v37  ;;  %v3434_v22 = vld [vmem:[%s6814_s4 + $0x18] sm:$0xff] }
 0x19f   : > { %v5903_v36 = vpop.f32.mrf.mxu0  ;;  %v5937_v35 = vpop.f32.mrf.mxu2  ;;  %3459 = vmatpush.msrb.mxu1 %v3434_v22  ;;  %v1131_v44 = vmul.f32 7.0, %v1067_v31 }
 0x1a0   : > { %6970 = vst [vmem:[#allocation114_spill] sm:$0xff] %v5903_v36  ;;  %v2301_v30 = vadd.f32 %v2237_v9, %v5064_v11  ;;  %v1548_v11 = vmul.f32 5.0, %v1484_v61  ;;  %v2238_v32 = vmul.f32 0.2, %v2115_v38 }
 0x1a1   : > { %v1195_v31 = vsub.f32 %v939_v14, %v1131_v44  ;;  %v5966_v44 = vpop.xlane.xlu1 %1373 }
 0x1a2   : > { %4333 = vmatmul.msk.f32.gmra.mxu0 %vm2366_vm1, %v2300_v0 }
 0x1a3   : > { %4269 = vmatmul.msk.f32.gmra.mxu3 %vm2366_vm1, %v1193_v45  ;;  %v5921_v8 = vpop.f32.mrf.mxu1  ;;  %v1647_v45 = vmul.f32 1.442695, %v1547_v7  ;;  %4185 = vmatmul.msk.f32.gmra.mxu1 %vm323_vm0, %v5718_v18  ;;  %v4525_v36 = vpop.eup %4524 }
 0x1a4   : > { %4237 = vmatmul.msk.f32.gmra.mxu2 %vm323_vm0, %v4521_v6  ;;  %v940_v6 = vadd.f32 %v5799_v47, %v5484_v62  ;;  %v5942_v7 = vpop.xlane.xlu0 %1370  ;;  %v4527_v9 = vpop.eup %4526 }
 0x1a5   : > { %4528 = vpow2.f32 %v1647_v45  ;;  %v1649_v45 = vmul.f32 1.442695, %v1548_v11  ;;  %v2117_v22 = vmul.f32 0.6931472, %v4527_v9 }
 0x1a6   : > { %v5919_v4 = vpop.f32.mrf.mxu3  ;;  %v1004_v62 = vmul.f32 0.14285715, %v940_v6  ;;  %4530 = vlog2.f32 %v5689_v56 }
 0x1a7   : > { %v5925_v0 = vpop.f32.mrf.mxu0  ;;  %4532 = vpow2.f32 %v1649_v45  ;;  %v5963_v11 = vpop.f32.mrf.mxu2 }
 0x1a8   : > { %6971 = vst [vmem:[#allocation115_spill] sm:$0xff] %v5925_v0  ;;  %v1068_v38 = vfloor.f32 %v1004_v62  ;;  %4534 = vlog2.f32 %v5725_v42 }
 0x1aa   : > { %4334 = vmatmul.msk.f32.gmra.mxu0 %vm2366_vm1, %v2301_v30  ;;  %v1485_v30 = vsub.f32 %v5498_v2, %v5942_v7  ;;  %v1132_v14 = vmul.f32 7.0, %v1068_v38 }
 0x1ab   : > { %4270 = vmatmul.msk.f32.gmra.mxu3 %vm2366_vm1, %v1194_v27  ;;  %v5946_v37 = vpop.f32.mrf.mxu1  ;;  %v941_v27 = vadd.f32 %v5799_v47, %v5515_v17  ;;  %4186 = vmatmul.msk.f32.gmra.mxu1 %vm323_vm0, %v5746_v50  ;;  %v4529_v0 = vpop.eup %4528  ;;  %v3728_v17 = vld [vmem:[%s6815_s5 + $0x40] sm:$0xff] }
 0x1ac   : > { %4238 = vmatmul.msk.f32.gmra.mxu2 %vm323_vm0, %v4525_v36  ;;  %v2302_v36 = vadd.f32 %v2238_v32, %v5089_v19  ;;  %v1549_v2 = vmul.f32 5.0, %v1485_v30  ;;  %v2239_v19 = vmul.f32 0.2, %v2117_v22  ;;  %v4531_v32 = vpop.eup %4530  ;;  %v1486_v30 = vsub.f32 %v5526_v29, %v5966_v44  ;;  %v5983_v29 = vpop.xlane.xlu2 %1376 }
 0x1ad   : > { %v1005_v56 = vmul.f32 0.14285715, %v941_v27  ;;  %3743 = vmatpush.msrb.mxu2 %v3728_v17  ;;  %v1196_v38 = vsub.f32 %v940_v6, %v1132_v14  ;;  %v942_v17 = vadd.f32 %v5799_v47, %v5540_v58 }
 0x1ae   : > { %v5944_v63 = vpop.f32.mrf.mxu3  ;;  %v2303_v22 = vadd.f32 %v2239_v19, %v5111_v52  ;;  %v1550_v42 = vmul.f32 5.0, %v1486_v30 }
 0x1af   : > { %v5951_v61 = vpop.f32.mrf.mxu0  ;;  %v5989_v58 = vpop.f32.mrf.mxu2 }
 0x1b0   : > { %6972 = vst [vmem:[#allocation116_spill] sm:$0xff] %v5951_v61  ;;  %v4533_v61 = vpop.eup %4532 }
 0x1b1   : > { %v4535_v6 = vpop.eup %4534 }
 0x1b2   : > { %4335 = vmatmul.msk.f32.gmra.mxu0 %vm2366_vm1, %v2302_v36  ;;  %v1651_v36 = vmul.f32 1.442695, %v1549_v2 }
 0x1b3   : > { %4271 = vmatmul.msk.f32.gmra.mxu3 %vm2366_vm1, %v1195_v31  ;;  %v5970_v9 = vpop.f32.mrf.mxu1  ;;  %v1069_v31 = vfloor.f32 %v1005_v56 }
 0x1b4   : > { %4239 = vmatmul.msk.f32.gmra.mxu2 %vm323_vm0, %v4529_v0  ;;  %v2119_v0 = vmul.f32 0.6931472, %v4531_v32  ;;  %4536 = vpow2.f32 %v1651_v36  ;;  %v1653_v32 = vmul.f32 1.442695, %v1550_v42  ;;  %v1487_v36 = vsub.f32 %v5552_v48, %v5983_v29 }
 0x1b5   : > { %v1133_v56 = vmul.f32 7.0, %v1069_v31  ;;  %4538 = vlog2.f32 %v5762_v51 }
 0x1b6   : > { %v5968_v62 = vpop.f32.mrf.mxu3  ;;  %v2240_v2 = vmul.f32 0.2, %v2119_v0  ;;  %4540 = vpow2.f32 %v1653_v32  ;;  %v1551_v51 = vmul.f32 5.0, %v1487_v36 }
 0x1b7   : > { %6973 = vst [vmem:[#allocation117_spill] sm:$0xff] %v5968_v62  ;;  %v5973_v45 = vpop.f32.mrf.mxu0  ;;  %v1197_v19 = vsub.f32 %v941_v27, %v1133_v56  ;;  %v3433_v27 = vld [vmem:[%s6814_s4 + $0x10] sm:$0xff]  ;;  %4542 = vlog2.f32 %v5789_v1 }
 0x1b8   : > { %6974 = vst [vmem:[#allocation118_spill] sm:$0xff] %v5973_v45  ;;  %v1006_v45 = vmul.f32 0.14285715, %v942_v17  ;;  %3460 = vmatpush.msrb.mxu1 %v3433_v27  ;;  %v6019_v27 = vpop.f32.mrf.mxu2 }
 0x1ba   : > { %4336 = vmatmul.msk.f32.gmra.mxu0 %vm2366_vm1, %v2303_v22  ;;  %v1070_v30 = vfloor.f32 %v1006_v45  ;;  %v943_v22 = vadd.f32 %v5799_v47, %v5568_v57  ;;  %v4537_v0 = vpop.eup %4536  ;;  %v6005_v45 = vpop.xlane.xlu0 %1379 }
 0x1bb   : > { %4272 = vmatmul.msk.f32.gmra.mxu3 %vm2366_vm1, %v1196_v38  ;;  %v5987_v14 = vpop.f32.mrf.mxu1  ;;  %v2121_v38 = vmul.f32 0.6931472, %v4535_v6  ;;  %v4539_v57 = vpop.eup %4538  ;;  %v944_v6 = vadd.f32 %v5799_v47, %v5599_v33  ;;  %v1488_v36 = vsub.f32 %v5580_v26, %v6005_v45  ;;  %v3727_v33 = vld [vmem:[%s6815_s5 + $0x38] sm:$0xff] }
 0x1bc   : > { %4240 = vmatmul.msk.f32.gmra.mxu2 %vm323_vm0, %v4533_v61  ;;  %v2304_v61 = vadd.f32 %v2240_v2, %v5133_v15  ;;  %v1134_v48 = vmul.f32 7.0, %v1070_v30  ;;  %v1007_v15 = vmul.f32 0.14285715, %v943_v22 }
 0x1bd   : > { %v2241_v56 = vmul.f32 0.2, %v2121_v38  ;;  %v1008_v1 = vmul.f32 0.14285715, %v944_v6  ;;  %3744 = vmatpush.msrb.mxu2 %v3727_v33 }
 0x1be   : > { %v5985_v52 = vpop.f32.mrf.mxu3  ;;  %v1071_v38 = vfloor.f32 %v1007_v15 }
 0x1bf   : > { %6975 = vst [vmem:[#allocation119_spill] sm:$0xff] %v5985_v52  ;;  %v5992_v31 = vpop.f32.mrf.mxu0  ;;  %v2305_v30 = vadd.f32 %v2241_v56, %v5158_v13  ;;  %v6027_v13 = vpop.xlane.xlu1 %1382 }
 0x1c0   : > { %6976 = vst [vmem:[#allocation120_spill] sm:$0xff] %v5992_v31  ;;  %v4541_v31 = vpop.eup %4540  ;;  %v1135_v26 = vmul.f32 7.0, %v1071_v38 }
 0x1c2   : > { %4337 = vmatmul.msk.f32.gmra.mxu0 %vm2366_vm1, %v2304_v61  ;;  %v1198_v61 = vsub.f32 %v942_v17, %v1134_v48  ;;  %v4543_v48 = vpop.eup %4542 }
 0x1c3   : > { %4273 = vmatmul.msk.f32.gmra.mxu3 %vm2366_vm1, %v1197_v19  ;;  %v6009_v2 = vpop.f32.mrf.mxu1  ;;  %v1655_v19 = vmul.f32 1.442695, %v1551_v51  ;;  %v1552_v51 = vmul.f32 5.0, %v1488_v36  ;;  %v1199_v36 = vsub.f32 %v943_v22, %v1135_v26 }
 0x1c4   : > { %4241 = vmatmul.msk.f32.gmra.mxu2 %vm323_vm0, %v4537_v0  ;;  %v2123_v0 = vmul.f32 0.6931472, %v4539_v57  ;;  %v1072_v57 = vfloor.f32 %v1008_v1 }
 0x1c5   : > { %4544 = vpow2.f32 %v1655_v19  ;;  %v1489_v19 = vsub.f32 %v5608_v5, %v6027_v13  ;;  %v6046_v5 = vpop.xlane.xlu2 %1385 }
 0x1c6   : > { %v6007_v42 = vpop.f32.mrf.mxu3  ;;  %v2242_v17 = vmul.f32 0.2, %v2123_v0  ;;  %4546 = vlog2.f32 %v5820_v49  ;;  %v945_v0 = vadd.f32 %v5799_v47, %v5622_v3  ;;  %v1136_v49 = vmul.f32 7.0, %v1072_v57 }
 0x1c7   : > { %6977 = vst [vmem:[#allocation121_spill] sm:$0xff] %v6007_v42  ;;  %v6014_v32 = vpop.f32.mrf.mxu0  ;;  %v1553_v1 = vmul.f32 5.0, %v1489_v19  ;;  %v1490_v57 = vsub.f32 %v5636_v55, %v6046_v5 }
 0x1c8   : > { %6978 = vst [vmem:[#allocation122_spill] sm:$0xff] %v6014_v32  ;;  %v2306_v38 = vadd.f32 %v2242_v17, %v5183_v23  ;;  %v6041_v32 = vpop.f32.mrf.mxu2  ;;  %v1200_v26 = vsub.f32 %v944_v6, %v1136_v49  ;;  %v3432_v6 = vld [vmem:[%s6814_s4 + $0x8] sm:$0xff] }
 0x1c9   : > { %v1659_v17 = vmul.f32 1.442695, %v1553_v1  ;;  %3461 = vmatpush.msrb.mxu1 %v3432_v6 }
 0x1ca   : > { %4338 = vmatmul.msk.f32.gmra.mxu0 %vm2366_vm1, %v2305_v30 }
 0x1cb   : > { %4274 = vmatmul.msk.f32.gmra.mxu3 %vm2366_vm1, %v1198_v61  ;;  %v6031_v15 = vpop.f32.mrf.mxu1  ;;  %v1657_v61 = vmul.f32 1.442695, %v1552_v51  ;;  %v4545_v33 = vpop.eup %4544 }
 0x1cc   : > { %4242 = vmatmul.msk.f32.gmra.mxu2 %vm323_vm0, %v4541_v31  ;;  %v2125_v31 = vmul.f32 0.6931472, %v4543_v48  ;;  %v4547_v23 = vpop.eup %4546 }
 0x1cd   : > { %4548 = vpow2.f32 %v1657_v61  ;;  %v6983_v61 = vld [vmem:[#allocation23_spill] sm:$0xff] }
 0x1ce   : > { %v6029_v56 = vpop.f32.mrf.mxu3  ;;  %v2243_v51 = vmul.f32 0.2, %v2125_v31  ;;  %4550 = vlog2.f32 %v5844_v40  ;;  %v6984_v31 = vld [vmem:[#allocation84_spill] sm:$0xff]  ;;  %v1554_v40 = vmul.f32 5.0, %v1490_v57 }
 0x1cf   : > { %6979 = vst [vmem:[#allocation123_spill] sm:$0xff] %v6029_v56  ;;  %v6034_v30 = vpop.f32.mrf.mxu0  ;;  %4552 = vpow2.f32 %v1659_v17 }
 0x1d0   : > { %6980 = vst [vmem:[#allocation124_spill] sm:$0xff] %v6034_v30  ;;  %v1009_v30 = vmul.f32 0.14285715, %v945_v0  ;;  %v2307_v19 = vadd.f32 %v2243_v51, %v6983_v61  ;;  %v6068_v51 = vpop.xlane.xlu0 %1388  ;;  %4554 = vlog2.f32 %v5875_v59  ;;  %v1661_v17 = vmul.f32 1.442695, %v1554_v40 }
 0x1d2   : > { %4339 = vmatmul.msk.f32.gmra.mxu0 %vm2366_vm1, %v2306_v38  ;;  %v2127_v38 = vmul.f32 0.6931472, %v4547_v23  ;;  %4556 = vpow2.f32 %v1661_v17 }
 0x1d3   : > { %4275 = vmatmul.msk.f32.gmra.mxu3 %vm2366_vm1, %v1199_v36  ;;  %v6050_v3 = vpop.f32.mrf.mxu1  ;;  %v1073_v36 = vfloor.f32 %v1009_v30  ;;  %v4549_v56 = vpop.eup %4548  ;;  %4558 = vlog2.f32 %v5910_v21 }
 0x1d4   : > { %4243 = vmatmul.msk.f32.gmra.mxu2 %vm323_vm0, %v4545_v33  ;;  %v946_v33 = vadd.f32 %v5799_v47, %v6984_v31  ;;  %v2244_v49 = vmul.f32 0.2, %v2127_v38  ;;  %v6065_v30 = vpop.f32.mrf.mxu2  ;;  %v4551_v23 = vpop.eup %4550 }
 0x1d5   : > { %v1137_v55 = vmul.f32 7.0, %v1073_v36 }
 0x1d6   : > { %v6048_v22 = vpop.f32.mrf.mxu3  ;;  %v1010_v1 = vmul.f32 0.14285715, %v946_v33 }
 0x1d7   : > { %6981 = vst [vmem:[#allocation125_spill] sm:$0xff] %v6048_v22  ;;  %v6053_v48 = vpop.f32.mrf.mxu0  ;;  %v1201_v38 = vsub.f32 %v945_v0, %v1137_v55  ;;  %v4553_v22 = vpop.eup %4552 }
 0x1d8   : > { %6982 = vst [vmem:[#allocation126_spill] sm:$0xff] %v6053_v48  ;;  %v1074_v6 = vfloor.f32 %v1010_v1  ;;  %v2129_v48 = vmul.f32 0.6931472, %v4551_v23  ;;  %v6088_v0 = vpop.xlane.xlu1 %1391  ;;  %v4555_v55 = vpop.eup %4554 }
 0x1d9   : > { %v1492_v17 = vsub.f32 %v5687_v10, %v6088_v0  ;;  %v6107_v10 = vpop.xlane.xlu2 %1394 }
 0x1da   : > { %4340 = vmatmul.msk.f32.gmra.mxu0 %vm2366_vm1, %v2307_v19  ;;  %v1491_v19 = vsub.f32 %v5664_v16, %v6068_v51  ;;  %v1138_v16 = vmul.f32 7.0, %v1074_v6  ;;  %v6991_v6 = vld [vmem:[#allocation91_spill] sm:$0xff] }
 0x1db   : > { %4276 = vmatmul.msk.f32.gmra.mxu3 %vm2366_vm1, %v1200_v26  ;;  %v947_v26 = vadd.f32 %v5799_v47, %v5678_v20  ;;  %v6079_v36 = vpop.f32.mrf.mxu1  ;;  %v3726_v20 = vld [vmem:[%s6815_s5 + $0x30] sm:$0xff] }
 0x1dc   : > { %4244 = vmatmul.msk.f32.gmra.mxu2 %vm323_vm0, %v4549_v56  ;;  %v6987_v56 = vld [vmem:[#allocation27_spill] sm:$0xff]  ;;  %v1555_v40 = vmul.f32 5.0, %v1491_v19  ;;  %v6092_v1 = vpop.f32.mrf.mxu2  ;;  %v1202_v19 = vsub.f32 %v946_v33, %v1138_v16 }
 0x1dd   : > { %v2308_v31 = vadd.f32 %v2244_v49, %v6987_v56  ;;  %v1011_v59 = vmul.f32 0.14285715, %v947_v26  ;;  %3745 = vmatpush.msrb.mxu2 %v3726_v20  ;;  %v948_v20 = vadd.f32 %v5799_v47, %v6991_v6 }
 0x1de   : > { %v6070_v61 = vpop.f32.mrf.mxu3 }
 0x1df   : > { %6985 = vst [vmem:[#allocation23_spill] sm:$0xff] %v6070_v61  ;;  %v6075_v57 = vpop.f32.mrf.mxu0  ;;  %v1075_v23 = vfloor.f32 %v1011_v59  ;;  %v4557_v61 = vpop.eup %4556  ;;  %v1556_v59 = vmul.f32 5.0, %v1492_v17 }
 0x1e0   : > { %6986 = vst [vmem:[#allocation84_spill] sm:$0xff] %v6075_v57  ;;  %v2245_v57 = vmul.f32 0.2, %v2129_v48  ;;  %v6990_v48 = vld [vmem:[#allocation31_spill] sm:$0xff]  ;;  %v4559_v33 = vpop.eup %4558 }
 0x1e1   : > { %v1139_v21 = vmul.f32 7.0, %v1075_v23  ;;  %v1493_v23 = vsub.f32 %v5718_v18, %v6107_v10 }
 0x1e2   : > { %4341 = vmatmul.msk.f32.gmra.mxu0 %vm2366_vm1, %v2308_v31  ;;  %v2309_v31 = vadd.f32 %v2245_v57, %v6990_v48 }
 0x1e3   : > { %4277 = vmatmul.msk.f32.gmra.mxu3 %vm2366_vm1, %v1201_v38  ;;  %v1663_v38 = vmul.f32 1.442695, %v1555_v40  ;;  %v1203_v16 = vsub.f32 %v947_v26, %v1139_v21  ;;  %v1557_v18 = vmul.f32 5.0, %v1493_v23 }
 0x1e4   : > { %4245 = vmatmul.msk.f32.gmra.mxu2 %vm323_vm0, %v4553_v22  ;;  %v2131_v22 = vmul.f32 0.6931472, %v4555_v55  ;;  %v1665_v55 = vmul.f32 1.442695, %v1556_v59  ;;  %v6119_v6 = vpop.f32.mrf.mxu2 }
 0x1e5   : > { %4560 = vpow2.f32 %v1663_v38  ;;  %v6994_v38 = vld [vmem:[#allocation35_spill] sm:$0xff] }
 0x1e6   : > { %v6090_v49 = vpop.f32.mrf.mxu3  ;;  %v2246_v40 = vmul.f32 0.2, %v2131_v22  ;;  %4562 = vlog2.f32 %v5937_v35  ;;  %v6995_v22 = vld [vmem:[#allocation95_spill] sm:$0xff]  ;;  %v3431_v35 = vld [vmem:[%s6814_s4] sm:$0xff] }
 0x1e7   : > { %6988 = vst [vmem:[#allocation27_spill] sm:$0xff] %v6090_v49  ;;  %v6095_v56 = vpop.f32.mrf.mxu0  ;;  %v6102_v49 = vpop.f32.mrf.mxu1  ;;  %4564 = vpow2.f32 %v1665_v55  ;;  %3462 = vmatpush.msrb.mxu1 %v3431_v35  ;;  %v1667_v55 = vmul.f32 1.442695, %v1557_v18 }
 0x1e8   : > { %6989 = vst [vmem:[#allocation127_spill] sm:$0xff] %v6095_v56  ;;  %v1012_v56 = vmul.f32 0.14285715, %v948_v20  ;;  %v2310_v17 = vadd.f32 %v2246_v40, %v6994_v38  ;;  %v6129_v40 = vpop.xlane.xlu0 %1397  ;;  %4566 = vlog2.f32 %v5963_v11 }
 0x1e9   : > { %4568 = vpow2.f32 %v1667_v55 }
 0x1ea   : > { %4342 = vmatmul.msk.f32.gmra.mxu0 %vm2366_vm1, %v2309_v31  ;;  %v2133_v31 = vmul.f32 0.6931472, %v4559_v33  ;;  %4570 = vlog2.f32 %v5989_v58 }
 0x1eb   : > { %4278 = vmatmul.msk.f32.gmra.mxu3 %vm2366_vm1, %v1202_v19  ;;  %v1076_v19 = vfloor.f32 %v1012_v56  ;;  %v4561_v42 = vpop.eup %4560 }
 0x1ec   : > { %4246 = vmatmul.msk.f32.gmra.mxu2 %vm323_vm0, %v4557_v61  ;;  %v949_v61 = vadd.f32 %v5799_v47, %v6995_v22  ;;  %v2247_v21 = vmul.f32 0.2, %v2133_v31  ;;  %v4563_v33 = vpop.eup %4562  ;;  %v6998_v31 = vld [vmem:[#allocation39_spill] sm:$0xff] }
 0x1ed   : > { %v1140_v56 = vmul.f32 7.0, %v1076_v19  ;;  %v2135_v35 = vmul.f32 0.6931472, %v4563_v33 }
 0x1ee   : > { %v6109_v57 = vpop.f32.mrf.mxu3  ;;  %v1013_v59 = vmul.f32 0.14285715, %v949_v61  ;;  %v2311_v22 = vadd.f32 %v2247_v21, %v6998_v31 }
 0x1ef   : > { %6992 = vst [vmem:[#allocation31_spill] sm:$0xff] %v6109_v57  ;;  %v6112_v48 = vpop.f32.mrf.mxu0  ;;  %v6126_v26 = vpop.f32.mrf.mxu1  ;;  %v1204_v19 = vsub.f32 %v948_v20, %v1140_v56  ;;  %v2248_v20 = vmul.f32 0.2, %v2135_v35 }
 0x1f0   : > { %6993 = vst [vmem:[#allocation91_spill] sm:$0xff] %v6112_v48  ;;  %v4565_v48 = vpop.eup %4564  ;;  %v6144_v57 = vpop.f32.mrf.mxu2 }
 0x1f1   : > { %v4567_v18 = vpop.eup %4566 }
 0x1f2   : > { %4343 = vmatmul.msk.f32.gmra.mxu0 %vm2366_vm1, %v2310_v17  ;;  %v1494_v17 = vsub.f32 %v5746_v50, %v6129_v40 }
 0x1f3   : > { %4279 = vmatmul.msk.f32.gmra.mxu3 %vm2366_vm1, %v1203_v16  ;;  %v950_v16 = vadd.f32 %v5799_v47, %v5760_v46 }
 0x1f4   : > { %4247 = vmatmul.msk.f32.gmra.mxu2 %vm323_vm0, %v4561_v42  ;;  %v1077_v42 = vfloor.f32 %v1013_v59  ;;  %v1558_v11 = vmul.f32 5.0, %v1494_v17  ;;  %v2137_v17 = vmul.f32 0.6931472, %v4567_v18  ;;  %v7004_v18 = vld [vmem:[#allocation47_spill] sm:$0xff] }
 0x1f5   : > { %v1014_v46 = vmul.f32 0.14285715, %v950_v16 }
 0x1f6   : > { %v6131_v38 = vpop.f32.mrf.mxu3  ;;  %v1141_v50 = vmul.f32 7.0, %v1077_v42  ;;  %v1669_v33 = vmul.f32 1.442695, %v1558_v11  ;;  %v4569_v42 = vpop.eup %4568  ;;  %v2249_v35 = vmul.f32 0.2, %v2137_v17 }
 0x1f7   : > { %6996 = vst [vmem:[#allocation35_spill] sm:$0xff] %v6131_v38  ;;  %v6136_v23 = vpop.f32.mrf.mxu0  ;;  %v3725_v38 = vld [vmem:[%s6815_s5 + $0x28] sm:$0xff]  ;;  %v6151_v21 = vpop.f32.mrf.mxu1  ;;  %v1078_v59 = vfloor.f32 %v1014_v46 }
 0x1f8   : > { %6997 = vst [vmem:[#allocation95_spill] sm:$0xff] %v6136_v23  ;;  %3746 = vmatpush.msrb.mxu2 %v3725_v38  ;;  %v1205_v31 = vsub.f32 %v949_v61, %v1141_v50  ;;  %v951_v38 = vadd.f32 %v5799_v47, %v5780_v60  ;;  %4572 = vpow2.f32 %v1669_v33  ;;  %v6161_v58 = vpop.f32.mrf.mxu2  ;;  %v4571_v61 = vpop.eup %4570 }
 0x1f9   : > { %4574 = vlog2.f32 %v6019_v27  ;;  %v2139_v33 = vmul.f32 0.6931472, %v4571_v61  ;;  %v3724_v27 = vld [vmem:[%s6815_s5 + $0x20] sm:$0xff] }
 0x1fa   : > { %4344 = vmatmul.msk.f32.gmra.mxu0 %vm2366_vm1, %v2311_v22  ;;  %v7001_v22 = vld [vmem:[#allocation43_spill] sm:$0xff]  ;;  %v1015_v46 = vmul.f32 0.14285715, %v951_v38  ;;  %3747 = vmatpush.msrb.mxu2 %v3724_v27  ;;  %4576 = vlog2.f32 %v6041_v32  ;;  %v6196_v32 = vld [vmem:[%s6813_s3 + $0x40] ss:$0 sm:$0xff] }
 0x1fb   : > { %4280 = vmatmul.msk.f32.gmra.mxu3 %vm2366_vm1, %v1204_v19  ;;  %v2312_v55 = vadd.f32 %v2248_v20, %v7001_v22  ;;  %v7005_v22 = vld [vmem:[#allocation105_spill] sm:$0xff]  ;;  %4578 = vlog2.f32 %v6065_v30 }
 0x1fc   : > { %4248 = vmatmul.msk.f32.gmra.mxu2 %vm323_vm0, %v4565_v48  ;;  %v1142_v48 = vmul.f32 7.0, %v1078_v59  ;;  %v1079_v59 = vfloor.f32 %v1015_v46  ;;  %4580 = vlog2.f32 %v6092_v1  ;;  %v3723_v1 = vld [vmem:[%s6815_s5 + $0x18] sm:$0xff] }
 0x1fd   : > { %3748 = vmatpush.msrb.mxu2 %v3723_v1  ;;  %4582 = vlog2.f32 %v6119_v6 }
 0x1fe   : > { %v6149_v56 = vpop.f32.mrf.mxu3  ;;  %v1206_v50 = vsub.f32 %v950_v16, %v1142_v48  ;;  %v4573_v17 = vpop.eup %4572  ;;  %v1143_v16 = vmul.f32 7.0, %v1079_v59  ;;  %4584 = vlog2.f32 %v6144_v57 }
 0x1ff   : > { %6999 = vst [vmem:[#allocation39_spill] sm:$0xff] %v6149_v56  ;;  %v6154_v19 = vpop.f32.mrf.mxu0  ;;  %v6169_v20 = vpop.f32.mrf.mxu1  ;;  %4586 = vlog2.f32 %v6161_v58  ;;  %v3722_v58 = vld [vmem:[%s6815_s5 + $0x10] sm:$0xff] }
 0x200   : > { %7000 = vst [vmem:[#allocation128_spill] sm:$0xff] %v6154_v19  ;;  %v6182_v61 = vpop.f32.mrf.mxu2  ;;  %3749 = vmatpush.msrb.mxu2 %v3722_v58 }
 0x201   : > { %4588 = vlog2.f32 %v6182_v61 }
 0x202   : > { %4345 = vmatmul.msk.f32.gmra.mxu0 %vm2366_vm1, %v2312_v55  ;;  %v952_v55 = vadd.f32 %v5799_v47, %v7005_v22  ;;  %v1207_v22 = vsub.f32 %v951_v38, %v1143_v16 }
 0x203   : > { %4281 = vmatmul.msk.f32.gmra.mxu3 %vm2366_vm1, %v1205_v31  ;;  %v2313_v31 = vadd.f32 %v2249_v35, %v7004_v18  ;;  %v4575_v35 = vpop.eup %4574  ;;  %v7007_v18 = vld [vmem:[#allocation109_spill] sm:$0xff] }
 0x204   : > { %4249 = vmatmul.msk.f32.gmra.mxu2 %vm323_vm0, %v4569_v42  ;;  %v2250_v42 = vmul.f32 0.2, %v2139_v33  ;;  %v1016_v48 = vmul.f32 0.14285715, %v952_v55  ;;  %v2141_v33 = vmul.f32 0.6931472, %v4575_v35 }
 0x206   : > { %v6164_v11 = vpop.f32.mrf.mxu3  ;;  %v1080_v59 = vfloor.f32 %v1016_v48 }
 0x207   : > { %7002 = vst [vmem:[#allocation43_spill] sm:$0xff] %v6164_v11  ;;  %v6167_v60 = vpop.f32.mrf.mxu0  ;;  %v6188_v23 = vpop.f32.mrf.mxu1 }
 0x208   : > { %7003 = vst [vmem:[#allocation129_spill] sm:$0xff] %v6167_v60  ;;  %v7008_v60 = vld [vmem:[#allocation51_spill] sm:$0xff]  ;;  %v1144_v27 = vmul.f32 7.0, %v1080_v59  ;;  %v4577_v11 = vpop.eup %4576 }
 0x209   : > { %v2314_v19 = vadd.f32 %v2250_v42, %v7008_v60  ;;  %v954_v60 = vadd.f32 %v5799_v47, %v5851_v39  ;;  %v7010_v42 = vld [vmem:[#allocation54_spill] sm:$0xff]  ;;  %v2143_v35 = vmul.f32 0.6931472, %v4577_v11  ;;  %v4579_v62 = vpop.eup %4578 }
 0x20a   : > { %4346 = vmatmul.msk.f32.gmra.mxu0 %vm2366_vm1, %v2313_v31 }
 0x20b   : > { %4282 = vmatmul.msk.f32.gmra.mxu3 %vm2366_vm1, %v1206_v50  ;;  %v953_v50 = vadd.f32 %v5799_v47, %v7007_v18  ;;  %v7009_v18 = vld [vmem:[#allocation4_spill] sm:$0xff]  ;;  %v2252_v39 = vmul.f32 0.2, %v2143_v35 }
 0x20c   : > { %4250 = vmatmul.msk.f32.gmra.mxu2 %vm323_vm0, %v4573_v17 }
 0x20d   : > { %v1017_v17 = vmul.f32 0.14285715, %v953_v50 }
 0x20e   : > { %v6180_v46 = vpop.f32.mrf.mxu3 }
 0x20f   : > { %7006 = vst [vmem:[#allocation47_spill] sm:$0xff] %v6180_v46  ;;  %v3045_v31 = vpop.f32.mrf.mxu0  ;;  %v2251_v46 = vmul.f32 0.2, %v2141_v33  ;;  %v1081_v38 = vfloor.f32 %v1017_v17  ;;  %v1018_v17 = vmul.f32 0.14285715, %v954_v60 }
 0x211   : > { %v2315_v48 = vadd.f32 %v2251_v46, %v7010_v42  ;;  %v1145_v33 = vmul.f32 7.0, %v1081_v38  ;;  %v1082_v42 = vfloor.f32 %v1018_v17  ;;  %v955_v38 = vadd.f32 %v5799_v47, %v5873_v28  ;;  %v4581_v17 = vpop.eup %4580 }
 0x212   : > { %4347 = vmatmul.msk.f32.gmra.mxu0 %vm2366_vm1, %v2314_v19  ;;  %v1208_v19 = vsub.f32 %v952_v55, %v1144_v27  ;;  %v7011_v27 = vld [vmem:[#allocation6_spill] sm:$0xff] }
 0x213   : > { %4283 = vmatmul.msk.f32.gmra.mxu3 %vm2366_vm1, %v1207_v22  ;;  %v6202_v22 = vpop.f32.mrf.mxu2  ;;  %v1209_v11 = vsub.f32 %v953_v50, %v1145_v33  ;;  %v1146_v50 = vmul.f32 7.0, %v1082_v42  ;;  %v1019_v33 = vmul.f32 0.14285715, %v955_v38 }
 0x214   : > { %4590 = vlog2.f32 %v6202_v22 }
 0x216   : > { %v2576_v56 = vpop.f32.mrf.mxu3 }
 0x217   : > { %v2768_v52 = vadd.f32 %v2576_v56, %v7009_v18  ;;  %v3048_v16 = vpop.f32.mrf.mxu0  ;;  %v6207_v18 = vpop.f32.mrf.mxu1 }
 0x219   : > { %v3237_v59 = vadd.f32 %v3045_v31, %v2768_v52  ;;  %v7012_v31 = vld [vmem:[#allocation58_spill] sm:$0xff] }
 0x21a   : > { %4348 = vmatmul.msk.f32.gmra.mxu0 %vm2366_vm1, %v2315_v48 }
 0x21b   : > { %v3303_v56 = vadd.f32 %v6196_v32, %v3237_v59  ;;  %4284 = vmatmul.msk.f32.gmra.mxu3 %vm2366_vm1, %v1208_v19  ;;  %v2316_v19 = vadd.f32 %v2252_v39, %v7012_v31  ;;  %v2145_v59 = vmul.f32 0.6931472, %v4579_v62  ;;  %v6214_v25 = vpop.f32.mrf.mxu2  ;;  %v7013_v39 = vld [vmem:[#allocation9_spill] sm:$0xff]  ;;  %v1083_v31 = vfloor.f32 %v1019_v33 }
 0x21c   : > { %4592 = vlog2.f32 %v6214_v25 }
 0x21d   : > { %v3367_v30 = vmax.f32 %v3303_v56, 0.0  ;;  %v2253_v56 = vmul.f32 0.2, %v2145_v59  ;;  %v1147_v1 = vmul.f32 7.0, %v1083_v31 }
 0x21e   : > { %v2579_v55 = vpop.f32.mrf.mxu3 }
 0x21f   : > { %v2769_v46 = vadd.f32 %v2579_v55, %v7011_v27  ;;  %3463 = vmatmul.f32.vlgmr.msrb.gmra.mxu1 %v3367_v30  ;;  %v3051_v52 = vpop.f32.mrf.mxu0  ;;  %v1210_v55 = vsub.f32 %v954_v60, %v1146_v50  ;;  %v956_v27 = vadd.f32 %v5799_v47, %v5900_v24  ;;  %v4583_v24 = vpop.eup %4582 }
 0x221   : > { %v3238_v48 = vadd.f32 %v3048_v16, %v2769_v46  ;;  %v6222_v16 = vpop.f32.mrf.mxu1 }
 0x222   : > { %4349 = vmatmul.msk.f32.gmra.mxu0 %vm2366_vm1, %v2316_v19  ;;  %v2147_v19 = vmul.f32 0.6931472, %v4581_v17 }
 0x223   : > { %4285 = vmatmul.msk.f32.gmra.mxu3 %vm2366_vm1, %v1209_v11  ;;  %v3304_v35 = vadd.f32 %v6196_v32, %v3238_v48  ;;  %v7014_v11 = vld [vmem:[#allocation61_spill] sm:$0xff]  ;;  %v6232_v50 = vpop.f32.mrf.mxu2 }
 0x224   : > { %v2317_v42 = vadd.f32 %v2253_v56, %v7014_v11  ;;  %v2254_v60 = vmul.f32 0.2, %v2147_v19  ;;  %4594 = vlog2.f32 %v6232_v50 }
 0x225   : > { %v3368_v62 = vmax.f32 %v3304_v35, 0.0  ;;  %v1020_v35 = vmul.f32 0.14285715, %v956_v27 }
 0x226   : > { %v2582_v28 = vpop.f32.mrf.mxu3 }
 0x227   : > { %v2770_v30 = vadd.f32 %v2582_v28, %v7013_v39  ;;  %3466 = vmatmul.f32.gmra.mxu1 %v3368_v62  ;;  %v3054_v46 = vpop.f32.mrf.mxu0  ;;  %v7015_v62 = vld [vmem:[#allocation12_spill] sm:$0xff]  ;;  %v1084_v56 = vfloor.f32 %v1020_v35 }
 0x229   : > { %v3239_v59 = vadd.f32 %v3051_v52, %v2770_v30  ;;  %v6238_v52 = vld [vmem:[%s6811_s1 + $0x28] ss:$0 sm:$0xff]  ;;  %v6243_v39 = vpop.f32.mrf.mxu1  ;;  %v1211_v30 = vsub.f32 %v955_v38, %v1147_v1 }
 0x22a   : > { %4350 = vmatmul.msk.f32.gmra.mxu0 %vm2366_vm1, %v2317_v42  ;;  %v957_v33 = vadd.f32 %v6238_v52, %v5921_v8  ;;  %v2149_v42 = vmul.f32 0.6931472, %v4583_v24  ;;  %v7018_v24 = vld [vmem:[#allocation67_spill] sm:$0xff] }
 0x22b   : > { %4286 = vmatmul.msk.f32.gmra.mxu3 %vm2366_vm1, %v1210_v55  ;;  %v3305_v48 = vadd.f32 %v6196_v32, %v3239_v59  ;;  %v7016_v55 = vld [vmem:[#allocation64_spill] sm:$0xff]  ;;  %v1148_v59 = vmul.f32 7.0, %v1084_v56  ;;  %v958_v56 = vadd.f32 %v6238_v52, %v5946_v37 }
 0x22c   : > { %v2318_v11 = vadd.f32 %v2254_v60, %v7016_v55  ;;  %v2255_v35 = vmul.f32 0.2, %v2149_v42 }
 0x22d   : > { %v3369_v47 = vmax.f32 %v3305_v48, 0.0  ;;  %v1021_v48 = vmul.f32 0.14285715, %v957_v33  ;;  %v1212_v1 = vsub.f32 %v956_v27, %v1148_v59 }
 0x22e   : > { %v2585_v6 = vpop.f32.mrf.mxu3 }
 0x22f   : > { %v2771_v28 = vadd.f32 %v2585_v6, %v7015_v62  ;;  %3469 = vmatmul.f32.gmra.mxu1 %v3369_v47  ;;  %v3057_v17 = vpop.f32.mrf.mxu0  ;;  %v4585_v47 = vpop.eup %4584  ;;  %v7017_v62 = vld [vmem:[#allocation15_spill] sm:$0xff]  ;;  %v1085_v60 = vfloor.f32 %v1021_v48 }
 0x230   : > { %v6249_v6 = vpop.f32.mrf.mxu2  ;;  %v4587_v48 = vpop.eup %4586 }
 0x231   : > { %v3240_v31 = vadd.f32 %v3054_v46, %v2771_v28  ;;  %v2319_v28 = vadd.f32 %v2255_v35, %v7018_v24  ;;  %v1149_v27 = vmul.f32 7.0, %v1085_v60  ;;  %v2153_v60 = vmul.f32 0.6931472, %v4587_v48 }
 0x232   : > { %4351 = vmatmul.msk.f32.gmra.mxu0 %vm2366_vm1, %v2318_v11  ;;  %v6256_v11 = vpop.f32.mrf.mxu1  ;;  %4596 = vlog2.f32 %v6249_v6 }
 0x233   : > { %4287 = vmatmul.msk.f32.gmra.mxu3 %vm2366_vm1, %v1211_v30  ;;  %v3306_v19 = vadd.f32 %v6196_v32, %v3240_v31  ;;  %v2151_v30 = vmul.f32 0.6931472, %v4585_v47  ;;  %v959_v47 = vadd.f32 %v6238_v52, %v5970_v9 }
 0x235   : > { %v3370_v8 = vmax.f32 %v3306_v19, 0.0  ;;  %v2256_v31 = vmul.f32 0.2, %v2151_v30  ;;  %v1022_v19 = vmul.f32 0.14285715, %v958_v56 }
 0x236   : > { %v2588_v57 = vpop.f32.mrf.mxu3 }
 0x237   : > { %v2772_v38 = vadd.f32 %v2588_v57, %v7017_v62  ;;  %3472 = vmatmul.f32.gmra.mxu1 %v3370_v8  ;;  %v3060_v46 = vpop.f32.mrf.mxu0  ;;  %v1213_v8 = vsub.f32 %v957_v33, %v1149_v27  ;;  %v7020_v62 = vld [vmem:[#allocation70_spill] sm:$0xff]  ;;  %v1023_v33 = vmul.f32 0.14285715, %v959_v47  ;;  %v4589_v27 = vpop.eup %4588 }
 0x238   : > { %v6269_v24 = vpop.f32.mrf.mxu2 }
 0x239   : > { %v3241_v55 = vadd.f32 %v3057_v17, %v2772_v38  ;;  %v7019_v17 = vld [vmem:[#allocation18_spill] sm:$0xff]  ;;  %v2320_v38 = vadd.f32 %v2256_v31, %v7020_v62  ;;  %v7021_v31 = vld [vmem:[#allocation21_spill] sm:$0xff]  ;;  %4598 = vlog2.f32 %v6269_v24 }
 0x23a   : > { %4352 = vmatmul.msk.f32.gmra.mxu0 %vm2366_vm1, %v2319_v28  ;;  %v3720_v24 = vld [vmem:[%s6815_s5] sm:$0xff] }
 0x23b   : > { %4288 = vmatmul.msk.f32.gmra.mxu3 %vm2366_vm1, %v1212_v1  ;;  %v3307_v42 = vadd.f32 %v6196_v32, %v3241_v55  ;;  %v1086_v1 = vfloor.f32 %v1022_v19  ;;  %v6274_v55 = vpop.f32.mrf.mxu1 }
 0x23d   : > { %v3371_v59 = vmax.f32 %v3307_v42, 0.0  ;;  %v1150_v9 = vmul.f32 7.0, %v1086_v1  ;;  %v2257_v42 = vmul.f32 0.2, %v2153_v60 }
 0x23e   : > { %v2591_v37 = vpop.f32.mrf.mxu3 }
 0x23f   : > { %v2773_v35 = vadd.f32 %v2591_v37, %v7019_v17  ;;  %3475 = vmatmul.f32.gmra.mxu1 %v3371_v59  ;;  %v3063_v57 = vpop.f32.mrf.mxu0  ;;  %v1087_v59 = vfloor.f32 %v1023_v33  ;;  %v1214_v37 = vsub.f32 %v958_v56, %v1150_v9  ;;  %v7022_v17 = vld [vmem:[#allocation73_spill] sm:$0xff]  ;;  %v4591_v33 = vpop.eup %4590 }
 0x240   : > { %v7023_v56 = vld [vmem:[#allocation25_spill] sm:$0xff] }
 0x241   : > { %v3242_v28 = vadd.f32 %v3060_v46, %v2773_v35  ;;  %v960_v46 = vadd.f32 %v6238_v52, %v5987_v14  ;;  %v2321_v35 = vadd.f32 %v2257_v42, %v7022_v17  ;;  %v1151_v60 = vmul.f32 7.0, %v1087_v59 }
 0x242   : > { %4353 = vmatmul.msk.f32.gmra.mxu0 %vm2366_vm1, %v2320_v38  ;;  %v6281_v38 = vpop.f32.mrf.mxu2  ;;  %v961_v59 = vadd.f32 %v6238_v52, %v6009_v2 }
 0x243   : > { %4289 = vmatmul.msk.f32.gmra.mxu3 %vm2366_vm1, %v1213_v8  ;;  %v3308_v30 = vadd.f32 %v6196_v32, %v3242_v28  ;;  %v2155_v8 = vmul.f32 0.6931472, %v4589_v27  ;;  %v1024_v28 = vmul.f32 0.14285715, %v960_v46  ;;  %4600 = vlog2.f32 %v6281_v38 }
 0x245   : > { %v3372_v61 = vmax.f32 %v3308_v30, 0.0  ;;  %v2258_v30 = vmul.f32 0.2, %v2155_v8  ;;  %v1088_v42 = vfloor.f32 %v1024_v28  ;;  %v1025_v8 = vmul.f32 0.14285715, %v961_v59 }
 0x246   : > { %v2594_v58 = vpop.f32.mrf.mxu3 }
 0x247   : > { %v2774_v19 = vadd.f32 %v2594_v58, %v7021_v31  ;;  %3478 = vmatmul.f32.gmra.mxu1 %v3372_v61  ;;  %v3066_v48 = vpop.f32.mrf.mxu0  ;;  %v6286_v61 = vpop.f32.mrf.mxu1  ;;  %v7024_v58 = vld [vmem:[#allocation76_spill] sm:$0xff] }
 0x248   : > { %v2322_v31 = vadd.f32 %v2258_v30, %v7024_v58 }
 0x249   : > { %v3243_v62 = vadd.f32 %v3063_v57, %v2774_v19  ;;  %v1215_v57 = vsub.f32 %v959_v47, %v1151_v60  ;;  %v2157_v19 = vmul.f32 0.6931472, %v4591_v33  ;;  %v3721_v47 = vld [vmem:[%s6815_s5 + $0x8] sm:$0xff]  ;;  %v4593_v60 = vpop.eup %4592 }
 0x24a   : > { %4354 = vmatmul.msk.f32.gmra.mxu0 %vm2366_vm1, %v2321_v35  ;;  %v1152_v35 = vmul.f32 7.0, %v1088_v42  ;;  %3750 = vmatpush.msrb.mxu2 %v3721_v47  ;;  %v2159_v42 = vmul.f32 0.6931472, %v4593_v60  ;;  %v7027_v47 = vld [vmem:[#allocation33_spill] sm:$0xff] }
 0x24b   : > { %4290 = vmatmul.msk.f32.gmra.mxu3 %vm2366_vm1, %v1214_v37  ;;  %v3309_v1 = vadd.f32 %v6196_v32, %v3243_v62  ;;  %v2259_v25 = vmul.f32 0.2, %v2157_v19  ;;  %v6299_v62 = vpop.f32.mrf.mxu2 }
 0x24c   : > { %v1216_v30 = vsub.f32 %v960_v46, %v1152_v35  ;;  %3751 = vmatpush.msrb.mxu2 %v3720_v24  ;;  %4602 = vlog2.f32 %v6299_v62 }
 0x24d   : > { %v3373_v14 = vmax.f32 %v3309_v1, 0.0 }
 0x24e   : > { %v2597_v22 = vpop.f32.mrf.mxu3 }
 0x24f   : > { %v2775_v9 = vadd.f32 %v2597_v22, %v7023_v56  ;;  %3481 = vmatmul.f32.gmra.mxu1 %v3373_v14  ;;  %v3069_v27 = vpop.f32.mrf.mxu0  ;;  %v962_v14 = vadd.f32 %v6238_v52, %v6031_v15  ;;  %v6305_v22 = vpop.f32.mrf.mxu1  ;;  %v7026_v56 = vld [vmem:[#allocation79_spill] sm:$0xff] }
 0x251   : > { %v3244_v37 = vadd.f32 %v3066_v48, %v2775_v9  ;;  %v7025_v48 = vld [vmem:[#allocation29_spill] sm:$0xff]  ;;  %v2323_v9 = vadd.f32 %v2259_v25, %v7026_v56  ;;  %v1026_v46 = vmul.f32 0.14285715, %v962_v14 }
 0x252   : > { %4355 = vmatmul.msk.f32.gmra.mxu0 %vm2366_vm1, %v2322_v31 }
 0x253   : > { %4291 = vmatmul.msk.f32.gmra.mxu3 %vm2366_vm1, %v1215_v57  ;;  %v3310_v17 = vadd.f32 %v6196_v32, %v3244_v37  ;;  %v1089_v57 = vfloor.f32 %v1025_v8  ;;  %v2260_v37 = vmul.f32 0.2, %v2159_v42  ;;  %v6311_v35 = vpop.f32.mrf.mxu2  ;;  %v1090_v25 = vfloor.f32 %v1026_v46  ;;  %v7029_v46 = vld [vmem:[#allocation37_spill] sm:$0xff] }
 0x254   : > { %4604 = vlog2.f32 %v6311_v35 }
 0x255   : > { %v3374_v1 = vmax.f32 %v3310_v17, 0.0  ;;  %v1153_v19 = vmul.f32 7.0, %v1089_v57  ;;  %v4595_v17 = vpop.eup %4594  ;;  %v1154_v57 = vmul.f32 7.0, %v1090_v25 }
 0x256   : > { %v2600_v2 = vpop.f32.mrf.mxu3 }
 0x257   : > { %v2776_v28 = vadd.f32 %v2600_v2, %v7025_v48  ;;  %3484 = vmatmul.f32.gmra.mxu1 %v3374_v1  ;;  %v3072_v33 = vpop.f32.mrf.mxu0  ;;  %v1217_v60 = vsub.f32 %v961_v59, %v1153_v19  ;;  %v7028_v2 = vld [vmem:[#allocation82_spill] sm:$0xff]  ;;  %v6318_v56 = vpop.f32.mrf.mxu1  ;;  %v1218_v19 = vsub.f32 %v962_v14, %v1154_v57 }
 0x258   : > { %v2324_v48 = vadd.f32 %v2260_v37, %v7028_v2 }
 0x259   : > { %v3245_v58 = vadd.f32 %v3069_v27, %v2776_v28  ;;  %v963_v27 = vadd.f32 %v6238_v52, %v6050_v3  ;;  %v2161_v28 = vmul.f32 0.6931472, %v4595_v17 }
 0x25a   : > { %4356 = vmatmul.msk.f32.gmra.mxu0 %vm2366_vm1, %v2323_v9 }
 0x25b   : > { %4292 = vmatmul.msk.f32.gmra.mxu3 %vm2366_vm1, %v1216_v30  ;;  %v3311_v31 = vadd.f32 %v6196_v32, %v3245_v58  ;;  %v1027_v42 = vmul.f32 0.14285715, %v963_v27  ;;  %v2261_v58 = vmul.f32 0.2, %v2161_v28 }
 0x25d   : > { %v3375_v15 = vmax.f32 %v3311_v31, 0.0  ;;  %v4597_v31 = vpop.eup %4596  ;;  %v1091_v37 = vfloor.f32 %v1027_v42 }
 0x25e   : > { %v2603_v50 = vpop.f32.mrf.mxu3 }
 0x25f   : > { %v2777_v1 = vadd.f32 %v2603_v50, %v7027_v47  ;;  %3487 = vmatmul.f32.gmra.mxu1 %v3375_v15  ;;  %v3075_v8 = vpop.f32.mrf.mxu0  ;;  %v7030_v15 = vld [vmem:[#allocation86_spill] sm:$0xff]  ;;  %v2163_v50 = vmul.f32 0.6931472, %v4597_v31  ;;  %v964_v47 = vadd.f32 %v6238_v52, %v6079_v36  ;;  %v1155_v14 = vmul.f32 7.0, %v1091_v37  ;;  %v6333_v2 = vpop.f32.mrf.mxu1  ;;  %v7032_v31 = vld [vmem:[#allocation89_spill] sm:$0xff] }
 0x260   : > { %v2325_v17 = vadd.f32 %v2261_v58, %v7030_v15  ;;  %v4599_v36 = vpop.eup %4598  ;;  %v965_v58 = vadd.f32 %v6238_v52, %v6102_v49 }
 0x261   : > { %v3246_v30 = vadd.f32 %v3072_v33, %v2777_v1  ;;  %v6328_v1 = vpop.f32.mrf.mxu2  ;;  %v1028_v28 = vmul.f32 0.14285715, %v964_v47  ;;  %v1219_v42 = vsub.f32 %v963_v27, %v1155_v14  ;;  %v7033_v14 = vld [vmem:[#allocation45_spill] sm:$0xff] }
 0x262   : > { %4357 = vmatmul.msk.f32.gmra.mxu0 %vm2366_vm1, %v2324_v48  ;;  %v2262_v48 = vmul.f32 0.2, %v2163_v50  ;;  %v1029_v27 = vmul.f32 0.14285715, %v965_v58  ;;  %4606 = vlog2.f32 %v6328_v1 }
 0x263   : > { %4293 = vmatmul.msk.f32.gmra.mxu3 %vm2366_vm1, %v1217_v60  ;;  %v3312_v9 = vadd.f32 %v6196_v32, %v3246_v30 }
 0x265   : > { %v3376_v3 = vmax.f32 %v3312_v9, 0.0 }
 0x266   : > { %v2606_v6 = vpop.f32.mrf.mxu3 }
 0x267   : > { %v2778_v59 = vadd.f32 %v2606_v6, %v7029_v46  ;;  %3490 = vmatmul.f32.gmra.mxu1 %v3376_v3  ;;  %v3078_v33 = vpop.f32.mrf.mxu0  ;;  %v2326_v6 = vadd.f32 %v2262_v48, %v7032_v31  ;;  %v1092_v46 = vfloor.f32 %v1028_v28  ;;  %v6348_v38 = vpop.f32.mrf.mxu1  ;;  %v966_v48 = vadd.f32 %v6238_v52, %v6126_v26 }
 0x269   : > { %v3247_v25 = vadd.f32 %v3075_v8, %v2778_v59  ;;  %v7031_v8 = vld [vmem:[#allocation41_spill] sm:$0xff]  ;;  %v2165_v59 = vmul.f32 0.6931472, %v4599_v36  ;;  %v6343_v37 = vpop.f32.mrf.mxu2 }
 0x26a   : > { %4358 = vmatmul.msk.f32.gmra.mxu0 %vm2366_vm1, %v2325_v17  ;;  %v1156_v17 = vmul.f32 7.0, %v1092_v46  ;;  %v7034_v36 = vld [vmem:[#allocation93_spill] sm:$0xff]  ;;  %4608 = vlog2.f32 %v6343_v37 }
 0x26b   : > { %4294 = vmatmul.msk.f32.gmra.mxu3 %vm2366_vm1, %v1218_v19  ;;  %v3313_v60 = vadd.f32 %v6196_v32, %v3247_v25  ;;  %v2263_v50 = vmul.f32 0.2, %v2165_v59  ;;  %v4601_v25 = vpop.eup %4600 }
 0x26d   : > { %v3377_v30 = vmax.f32 %v3313_v60, 0.0 }
 0x26e   : > { %v2609_v9 = vpop.f32.mrf.mxu3 }
 0x26f   : > { %v2779_v57 = vadd.f32 %v2609_v9, %v7031_v8  ;;  %3493 = vmatmul.f32.gmra.mxu1 %v3377_v30  ;;  %v3081_v3 = vpop.f32.mrf.mxu0  ;;  %v1220_v30 = vsub.f32 %v964_v47, %v1156_v17  ;;  %v2327_v9 = vadd.f32 %v2263_v50, %v7034_v36  ;;  %v2167_v8 = vmul.f32 0.6931472, %v4601_v25 }
 0x271   : > { %v3248_v19 = vadd.f32 %v3078_v33, %v2779_v57  ;;  %v1093_v33 = vfloor.f32 %v1029_v27  ;;  %v2264_v46 = vmul.f32 0.2, %v2167_v8  ;;  %v6358_v59 = vpop.f32.mrf.mxu2 }
 0x272   : > { %4359 = vmatmul.msk.f32.gmra.mxu0 %vm2366_vm1, %v2326_v6  ;;  %v1030_v6 = vmul.f32 0.14285715, %v966_v48  ;;  %4610 = vlog2.f32 %v6358_v59 }
 0x273   : > { %4295 = vmatmul.msk.f32.gmra.mxu3 %vm2366_vm1, %v1219_v42  ;;  %v3314_v15 = vadd.f32 %v6196_v32, %v3248_v19  ;;  %v1157_v31 = vmul.f32 7.0, %v1093_v33  ;;  %v4603_v19 = vpop.eup %4602 }
 0x274   : > { %v1094_v17 = vfloor.f32 %v1030_v6 }
 0x275   : > { %v3378_v49 = vmax.f32 %v3314_v15, 0.0  ;;  %v7035_v15 = vld [vmem:[#allocation49_spill] sm:$0xff]  ;;  %v1221_v27 = vsub.f32 %v965_v58, %v1157_v31 }
 0x276   : > { %v2612_v60 = vpop.f32.mrf.mxu3  ;;  %v1158_v58 = vmul.f32 7.0, %v1094_v17 }
 0x277   : > { %v2780_v24 = vadd.f32 %v2612_v60, %v7033_v14  ;;  %3496 = vmatmul.f32.gmra.mxu1 %v3378_v49  ;;  %v3084_v28 = vpop.f32.mrf.mxu0  ;;  %v7036_v49 = vld [vmem:[#allocation97_spill] sm:$0xff]  ;;  %v2169_v60 = vmul.f32 0.6931472, %v4603_v19  ;;  %v967_v14 = vadd.f32 %v6238_v52, %v6151_v21  ;;  %v968_v21 = vadd.f32 %v6238_v52, %v6169_v20 }
 0x278   : > { %v2328_v25 = vadd.f32 %v2264_v46, %v7036_v49  ;;  %v1222_v6 = vsub.f32 %v966_v48, %v1158_v58  ;;  %v7038_v46 = vld [vmem:[#allocation100_spill] sm:$0xff] }
 0x279   : > { %v3249_v57 = vadd.f32 %v3081_v3, %v2780_v24  ;;  %v6362_v3 = vpop.f32.mrf.mxu1  ;;  %v1031_v36 = vmul.f32 0.14285715, %v967_v14  ;;  %v1032_v48 = vmul.f32 0.14285715, %v968_v21 }
 0x27a   : > { %4360 = vmatmul.msk.f32.gmra.mxu0 %vm2366_vm1, %v2327_v9  ;;  %v4605_v9 = vpop.eup %4604 }
 0x27b   : > { %4296 = vmatmul.msk.f32.gmra.mxu3 %vm2366_vm1, %v1220_v30  ;;  %v3315_v42 = vadd.f32 %v6196_v32, %v3249_v57  ;;  %v2265_v30 = vmul.f32 0.2, %v2169_v60  ;;  %v6370_v57 = vpop.f32.mrf.mxu2  ;;  %v1095_v19 = vfloor.f32 %v1031_v36  ;;  %v7039_v60 = vld [vmem:[#allocation56_spill] sm:$0xff]  ;;  %v7040_v36 = vld [vmem:[#allocation103_spill] sm:$0xff] }
 0x27c   : > { %4612 = vlog2.f32 %v6370_v57 }
 0x27d   : > { %v3379_v26 = vmax.f32 %v3315_v42, 0.0  ;;  %v7037_v42 = vld [vmem:[#allocation53_spill] sm:$0xff]  ;;  %v1159_v17 = vmul.f32 7.0, %v1095_v19 }
 0x27e   : > { %v2615_v62 = vpop.f32.mrf.mxu3 }
 0x27f   : > { %v2781_v47 = vadd.f32 %v2615_v62, %v7035_v15  ;;  %3499 = vmatmul.f32.gmra.mxu1 %v3379_v26  ;;  %v3087_v50 = vpop.f32.mrf.mxu0  ;;  %v2329_v26 = vadd.f32 %v2265_v30, %v7038_v46  ;;  %v2171_v62 = vmul.f32 0.6931472, %v4605_v9  ;;  %v1223_v30 = vsub.f32 %v967_v14, %v1159_v17  ;;  %v7041_v14 = vld [vmem:[#allocation60_spill] sm:$0xff]  ;;  %v7042_v17 = vld [vmem:[#allocation107_spill] sm:$0xff] }
 0x281   : > { %v3250_v24 = vadd.f32 %v3084_v28, %v2781_v47  ;;  %v6377_v47 = vpop.f32.mrf.mxu1  ;;  %v2266_v49 = vmul.f32 0.2, %v2171_v62 }
 0x282   : > { %4361 = vmatmul.msk.f32.gmra.mxu0 %vm2366_vm1, %v2328_v25  ;;  %v4607_v25 = vpop.eup %4606 }
 0x283   : > { %4297 = vmatmul.msk.f32.gmra.mxu3 %vm2366_vm1, %v1221_v27  ;;  %v3316_v33 = vadd.f32 %v6196_v32, %v3250_v24  ;;  %v2173_v9 = vmul.f32 0.6931472, %v4607_v25  ;;  %v4609_v37 = vpop.eup %4608  ;;  %v970_v25 = vadd.f32 %v6238_v52, %v6207_v18 }
 0x285   : > { %v3380_v35 = vmax.f32 %v3316_v33, 0.0  ;;  %v1096_v33 = vfloor.f32 %v1032_v48 }
 0x286   : > { %v2618_v8 = vpop.f32.mrf.mxu3 }
 0x287   : > { %v2782_v31 = vadd.f32 %v2618_v8, %v7037_v42  ;;  %3502 = vmatmul.f32.gmra.mxu1 %v3380_v35  ;;  %v3090_v28 = vpop.f32.mrf.mxu0  ;;  %v2330_v35 = vadd.f32 %v2266_v49, %v7040_v36  ;;  %v2025_v8 = vpop.f32.mrf.mxu2  ;;  %v1034_v36 = vmul.f32 0.14285715, %v970_v25 }
 0x288   : > { %4614 = vlog2.f32 %v2025_v8 }
 0x289   : > { %v3251_v15 = vadd.f32 %v3087_v50, %v2782_v31  ;;  %v969_v50 = vadd.f32 %v6238_v52, %v6188_v23  ;;  %v2267_v23 = vmul.f32 0.2, %v2173_v9  ;;  %v4611_v9 = vpop.eup %4610 }
 0x28a   : > { %4362 = vmatmul.msk.f32.gmra.mxu0 %vm2366_vm1, %v2329_v26  ;;  %v6390_v26 = vpop.f32.mrf.mxu1  ;;  %v4613_v57 = vpop.eup %4612 }
 0x28b   : > { %4298 = vmatmul.msk.f32.gmra.mxu3 %vm2366_vm1, %v1222_v6  ;;  %v3317_v27 = vadd.f32 %v6196_v32, %v3251_v15  ;;  %v1160_v6 = vmul.f32 7.0, %v1096_v33  ;;  %v1033_v46 = vmul.f32 0.14285715, %v969_v50  ;;  %v2331_v49 = vadd.f32 %v2267_v23, %v7042_v17 }
 0x28d   : > { %v3381_v20 = vmax.f32 %v3317_v27, 0.0  ;;  %v1224_v27 = vsub.f32 %v968_v21, %v1160_v6  ;;  %v1097_v48 = vfloor.f32 %v1033_v46 }
 0x28e   : > { %v2621_v1 = vpop.f32.mrf.mxu3 }
 0x28f   : > { %v2783_v24 = vadd.f32 %v2621_v1, %v7039_v60  ;;  %3505 = vmatmul.f32.gmra.mxu1 %v3381_v20  ;;  %v3093_v58 = vpop.f32.mrf.mxu0  ;;  %v2175_v20 = vmul.f32 0.6931472, %v4609_v37  ;;  %v2028_v60 = vpop.f32.mrf.mxu2  ;;  %v1161_v33 = vmul.f32 7.0, %v1097_v48  ;;  %v2177_v37 = vmul.f32 0.6931472, %v4611_v9 }
 0x290   : > { %4616 = vlog2.f32 %v2028_v60 }
 0x291   : > { %v3252_v42 = vadd.f32 %v3090_v28, %v2783_v24  ;;  %v1225_v18 = vsub.f32 %v969_v50, %v1161_v33  ;;  %v2269_v48 = vmul.f32 0.2, %v2177_v37 }
 0x292   : > { %4363 = vmatmul.msk.f32.gmra.mxu0 %vm2366_vm1, %v2330_v35 }
 0x293   : > { %4299 = vmatmul.msk.f32.gmra.mxu3 %vm2366_vm1, %v1223_v30  ;;  %v3318_v31 = vadd.f32 %v6196_v32, %v3252_v42  ;;  %v2268_v30 = vmul.f32 0.2, %v2175_v20 }
 0x295   : > { %v3382_v19 = vmax.f32 %v3318_v31, 0.0  ;;  %v7043_v31 = vld [vmem:[#allocation63_spill] sm:$0xff]  ;;  %v2332_v23 = vadd.f32 %v2268_v30, %v5847_v54  ;;  %v2333_v30 = vadd.f32 %v2269_v48, %v5869_v12 }
 0x296   : > { %v2624_v62 = vpop.f32.mrf.mxu3 }
 0x297   : > { %v2784_v15 = vadd.f32 %v2624_v62, %v7041_v14  ;;  %3508 = vmatmul.f32.gmra.mxu1 %v3382_v19  ;;  %v3096_v28 = vpop.f32.mrf.mxu0  ;;  %v1098_v19 = vfloor.f32 %v1034_v36  ;;  %v2031_v17 = vpop.f32.mrf.mxu2  ;;  %v2179_v36 = vmul.f32 0.6931472, %v4613_v57 }
 0x298   : > { %4618 = vlog2.f32 %v2031_v17 }
 0x299   : > { %v3253_v1 = vadd.f32 %v3093_v58, %v2784_v15  ;;  %v971_v58 = vadd.f32 %v6238_v52, %v6222_v16  ;;  %v1162_v50 = vmul.f32 7.0, %v1098_v19 }
 0x29a   : > { %4364 = vmatmul.msk.f32.gmra.mxu0 %vm2366_vm1, %v2331_v49 }
 0x29b   : > { %4300 = vmatmul.msk.f32.gmra.mxu3 %vm2366_vm1, %v1224_v27  ;;  %v3319_v24 = vadd.f32 %v6196_v32, %v3253_v1  ;;  %v1035_v15 = vmul.f32 0.14285715, %v971_v58  ;;  %v7044_v1 = vld [vmem:[#allocation66_spill] sm:$0xff] }
 0x29c   : > { %v3464_v21 = vpop.f32.mrf.mxu1 }
 0x29d   : > { %v3656_v59 = vmax.f32 %v3464_v21, 0.0  ;;  %v3383_v35 = vmax.f32 %v3319_v24, 0.0  ;;  %v972_v24 = vadd.f32 %v6238_v52, %v6243_v39  ;;  %v1226_v21 = vsub.f32 %v970_v25, %v1162_v50  ;;  %v4615_v39 = vpop.eup %4614  ;;  %v7045_v25 = vld [vmem:[#allocation69_spill] sm:$0xff] }
 0x29e   : > { %v2627_v42 = vpop.f32.mrf.mxu3 }
 0x29f   : > { %v2785_v6 = vadd.f32 %v2627_v42, %v7043_v31  ;;  %3511 = vmatmul.f32.gmra.mxu1 %v3383_v35  ;;  %3752 = vmatmul.f32.vlgmr.msrb.gmra.mxu2 %v3656_v59  ;;  %v3099_v46 = vpop.f32.mrf.mxu0  ;;  %v1036_v42 = vmul.f32 0.14285715, %v972_v24  ;;  %v2034_v19 = vpop.f32.mrf.mxu2 }
 0x2a0   : > { %4620 = vlog2.f32 %v2034_v19 }
 0x2a1   : > { %v3254_v62 = vadd.f32 %v3096_v28, %v2785_v6  ;;  %v1099_v28 = vfloor.f32 %v1035_v15  ;;  %v2270_v6 = vmul.f32 0.2, %v2179_v36  ;;  %v2181_v15 = vmul.f32 0.6931472, %v4615_v39 }
 0x2a2   : > { %4365 = vmatmul.msk.f32.gmra.mxu0 %vm2366_vm1, %v2332_v23 }
 0x2a3   : > { %4301 = vmatmul.msk.f32.gmra.mxu3 %vm2366_vm1, %v1225_v18  ;;  %v3320_v14 = vadd.f32 %v6196_v32, %v3254_v62  ;;  %v1163_v9 = vmul.f32 7.0, %v1099_v28  ;;  %v2271_v57 = vmul.f32 0.2, %v2181_v15 }
 0x2a4   : > { %v3467_v27 = vpop.f32.mrf.mxu1 }
 0x2a5   : > { %v3657_v16 = vmax.f32 %v3467_v27, 0.0  ;;  %v3384_v49 = vmax.f32 %v3320_v14, 0.0  ;;  %v1227_v12 = vsub.f32 %v971_v58, %v1163_v9  ;;  %v2334_v14 = vadd.f32 %v2270_v6, %v5896_v34  ;;  %v7046_v34 = vld [vmem:[#allocation72_spill] sm:$0xff] }
 0x2a6   : > { %v2630_v20 = vpop.f32.mrf.mxu3  ;;  %v973_v27 = vadd.f32 %v6238_v52, %v6256_v11 }
 0x2a7   : > { %v2786_v54 = vadd.f32 %v2630_v20, %v7044_v1  ;;  %3514 = vmatmul.f32.gmra.mxu1 %v3384_v49  ;;  %3755 = vmatmul.f32.gmra.mxu2 %v3657_v16  ;;  %v3102_v33 = vpop.f32.mrf.mxu0  ;;  %v4617_v1 = vpop.eup %4616 }
 0x2a8   : > { %v1037_v58 = vmul.f32 0.14285715, %v973_v27  ;;  %v4619_v17 = vpop.eup %4618 }
 0x2a9   : > { %v3255_v59 = vadd.f32 %v3099_v46, %v2786_v54  ;;  %v1100_v46 = vfloor.f32 %v1036_v42  ;;  %v4621_v19 = vpop.eup %4620 }
 0x2aa   : > { %4366 = vmatmul.msk.f32.gmra.mxu0 %vm2366_vm1, %v2333_v30  ;;  %v2335_v30 = vadd.f32 %v2271_v57, %v5917_v43  ;;  %v1101_v36 = vfloor.f32 %v1037_v58 }
 0x2ab   : > { %4302 = vmatmul.msk.f32.gmra.mxu3 %vm2366_vm1, %v1226_v21  ;;  %v3321_v35 = vadd.f32 %v6196_v32, %v3255_v59  ;;  %v1164_v16 = vmul.f32 7.0, %v1100_v46  ;;  %v2183_v59 = vmul.f32 0.6931472, %v4617_v1 }
 0x2ac   : > { %v3470_v31 = vpop.f32.mrf.mxu1 }
 0x2ad   : > { %v3658_v18 = vmax.f32 %v3470_v31, 0.0  ;;  %v3385_v23 = vmax.f32 %v3321_v35, 0.0  ;;  %v1228_v11 = vsub.f32 %v972_v24, %v1164_v16  ;;  %v2037_v35 = vpop.f32.mrf.mxu2  ;;  %v1165_v24 = vmul.f32 7.0, %v1101_v36 }
 0x2ae   : > { %v2633_v8 = vpop.f32.mrf.mxu3  ;;  %4622 = vlog2.f32 %v2037_v35 }
 0x2af   : > { %v2787_v37 = vadd.f32 %v2633_v8, %v7045_v25  ;;  %3517 = vmatmul.f32.gmra.mxu1 %v3385_v23  ;;  %3758 = vmatmul.f32.gmra.mxu2 %v3658_v18  ;;  %v3105_v62 = vpop.f32.mrf.mxu0  ;;  %v2272_v18 = vmul.f32 0.2, %v2183_v59  ;;  %v7047_v8 = vld [vmem:[#allocation75_spill] sm:$0xff]  ;;  %v1229_v46 = vsub.f32 %v973_v27, %v1165_v24  ;;  %v7048_v27 = vld [vmem:[#allocation78_spill] sm:$0xff] }
 0x2b1   : > { %v3256_v50 = vadd.f32 %v3102_v33, %v2787_v37  ;;  %v974_v33 = vadd.f32 %v6238_v52, %v6274_v55  ;;  %v975_v37 = vadd.f32 %v6238_v52, %v6286_v61 }
 0x2b2   : > { %4367 = vmatmul.msk.f32.gmra.mxu0 %vm2366_vm1, %v2334_v14  ;;  %v2185_v14 = vmul.f32 0.6931472, %v4619_v17 }
 0x2b3   : > { %4303 = vmatmul.msk.f32.gmra.mxu3 %vm2366_vm1, %v1227_v12  ;;  %v3322_v48 = vadd.f32 %v6196_v32, %v3256_v50  ;;  %v1038_v31 = vmul.f32 0.14285715, %v974_v33 }
 0x2b4   : > { %v3473_v49 = vpop.f32.mrf.mxu1  ;;  %v2273_v58 = vmul.f32 0.2, %v2185_v14  ;;  %v4623_v24 = vpop.eup %4622 }
 0x2b5   : > { %v3659_v20 = vmax.f32 %v3473_v49, 0.0  ;;  %v3386_v60 = vmax.f32 %v3322_v48, 0.0  ;;  %v1102_v25 = vfloor.f32 %v1038_v31  ;;  %v2040_v50 = vpop.f32.mrf.mxu2  ;;  %v1039_v49 = vmul.f32 0.14285715, %v975_v37 }
 0x2b6   : > { %v2636_v54 = vpop.f32.mrf.mxu3  ;;  %4624 = vlog2.f32 %v2040_v50 }
 0x2b7   : > { %v2788_v28 = vadd.f32 %v2636_v54, %v7046_v34  ;;  %3520 = vmatmul.f32.gmra.mxu1 %v3386_v60  ;;  %3761 = vmatmul.f32.gmra.mxu2 %v3659_v20  ;;  %v3108_v21 = vpop.f32.mrf.mxu0  ;;  %v1166_v16 = vmul.f32 7.0, %v1102_v25  ;;  %v1103_v54 = vfloor.f32 %v1039_v49  ;;  %v7050_v49 = vld [vmem:[#allocation85_spill] sm:$0xff] }
 0x2b9   : > { %v3257_v9 = vadd.f32 %v3105_v62, %v2788_v28  ;;  %v2336_v62 = vadd.f32 %v2272_v18, %v5942_v7  ;;  %v1230_v7 = vsub.f32 %v974_v33, %v1166_v16  ;;  %v2337_v28 = vadd.f32 %v2273_v58, %v5966_v44  ;;  %v7049_v18 = vld [vmem:[#allocation81_spill] sm:$0xff] }
 0x2ba   : > { %4368 = vmatmul.msk.f32.gmra.mxu0 %vm2366_vm1, %v2335_v30  ;;  %v1167_v59 = vmul.f32 7.0, %v1103_v54  ;;  %v978_v58 = vadd.f32 %v6238_v52, %v6333_v2 }
 0x2bb   : > { %4304 = vmatmul.msk.f32.gmra.mxu3 %vm2366_vm1, %v1228_v11  ;;  %v3323_v42 = vadd.f32 %v6196_v32, %v3257_v9  ;;  %v2187_v11 = vmul.f32 0.6931472, %v4621_v19 }
 0x2bc   : > { %v3476_v6 = vpop.f32.mrf.mxu1  ;;  %v1042_v2 = vmul.f32 0.14285715, %v978_v58 }
 0x2bd   : > { %v3660_v23 = vmax.f32 %v3476_v6, 0.0  ;;  %v3387_v55 = vmax.f32 %v3323_v42, 0.0  ;;  %v2274_v42 = vmul.f32 0.2, %v2187_v11  ;;  %v2043_v31 = vpop.f32.mrf.mxu2 }
 0x2be   : > { %v2639_v39 = vpop.f32.mrf.mxu3  ;;  %4626 = vlog2.f32 %v2043_v31 }
 0x2bf   : > { %v2789_v43 = vadd.f32 %v2639_v39, %v7047_v8  ;;  %3523 = vmatmul.f32.gmra.mxu1 %v3387_v55  ;;  %3764 = vmatmul.f32.gmra.mxu2 %v3660_v23  ;;  %v3111_v12 = vpop.f32.mrf.mxu0  ;;  %v977_v55 = vadd.f32 %v6238_v52, %v6318_v56  ;;  %v2338_v39 = vadd.f32 %v2274_v42, %v5983_v29  ;;  %v4625_v56 = vpop.eup %4624 }
 0x2c0   : > { %v2191_v19 = vmul.f32 0.6931472, %v4625_v56 }
 0x2c1   : > { %v3258_v15 = vadd.f32 %v3108_v21, %v2789_v43  ;;  %v976_v21 = vadd.f32 %v6238_v52, %v6305_v22  ;;  %v1231_v22 = vsub.f32 %v975_v37, %v1167_v59  ;;  %v2189_v43 = vmul.f32 0.6931472, %v4623_v24 }
 0x2c2   : > { %4369 = vmatmul.msk.f32.gmra.mxu0 %vm2366_vm1, %v2336_v62 }
 0x2c3   : > { %4305 = vmatmul.msk.f32.gmra.mxu3 %vm2366_vm1, %v1229_v46  ;;  %v3324_v48 = vadd.f32 %v6196_v32, %v3258_v15  ;;  %v1040_v33 = vmul.f32 0.14285715, %v976_v21  ;;  %v1041_v46 = vmul.f32 0.14285715, %v977_v55  ;;  %v2275_v37 = vmul.f32 0.2, %v2189_v43 }
 0x2c4   : > { %v3479_v57 = vpop.f32.mrf.mxu1  ;;  %v7052_v43 = vld [vmem:[#allocation92_spill] sm:$0xff] }
 0x2c5   : > { %v3661_v20 = vmax.f32 %v3479_v57, 0.0  ;;  %v3388_v61 = vmax.f32 %v3324_v48, 0.0  ;;  %v1104_v8 = vfloor.f32 %v1040_v33  ;;  %v2046_v16 = vpop.f32.mrf.mxu2  ;;  %v1105_v57 = vfloor.f32 %v1041_v46 }
 0x2c6   : > { %v2642_v60 = vpop.f32.mrf.mxu3  ;;  %4628 = vlog2.f32 %v2046_v16 }
 0x2c7   : > { %v2790_v1 = vadd.f32 %v2642_v60, %v7048_v27  ;;  %3526 = vmatmul.f32.gmra.mxu1 %v3388_v61  ;;  %3767 = vmatmul.f32.gmra.mxu2 %v3661_v20  ;;  %v3114_v34 = vpop.f32.mrf.mxu0  ;;  %v1168_v14 = vmul.f32 7.0, %v1104_v8  ;;  %v2339_v61 = vadd.f32 %v2275_v37, %v6005_v45  ;;  %v6459_v27 = vld [vmem:[%s6813_s3 + $0x40] ss:$0 sm:$0xff]  ;;  %v4627_v45 = vpop.eup %4626 }
 0x2c8   : > { %v2193_v31 = vmul.f32 0.6931472, %v4627_v45 }
 0x2c9   : > { %v3259_v30 = vadd.f32 %v3111_v12, %v2790_v1 }
 0x2ca   : > { %4370 = vmatmul.msk.f32.gmra.mxu0 %vm2366_vm1, %v2337_v28 }
 0x2cb   : > { %4306 = vmatmul.msk.f32.gmra.mxu3 %vm2366_vm1, %v1230_v7  ;;  %v3325_v36 = vadd.f32 %v6196_v32, %v3259_v30  ;;  %v1169_v7 = vmul.f32 7.0, %v1105_v57  ;;  %v7051_v30 = vld [vmem:[#allocation88_spill] sm:$0xff] }
 0x2cc   : > { %v3482_v9 = vpop.f32.mrf.mxu1  ;;  %v4629_v8 = vpop.eup %4628 }
 0x2cd   : > { %v3662_v35 = vmax.f32 %v3482_v9, 0.0  ;;  %v3389_v6 = vmax.f32 %v3325_v36, 0.0  ;;  %v1233_v59 = vsub.f32 %v977_v55, %v1169_v7  ;;  %v1106_v9 = vfloor.f32 %v1042_v2 }
 0x2ce   : > { %v2645_v44 = vpop.f32.mrf.mxu3  ;;  %v2195_v37 = vmul.f32 0.6931472, %v4629_v8 }
 0x2cf   : > { %v2791_v23 = vadd.f32 %v2645_v44, %v7049_v18  ;;  %3529 = vmatmul.f32.gmra.mxu1 %v3389_v6  ;;  %3770 = vmatmul.f32.gmra.mxu2 %v3662_v35  ;;  %v3117_v17 = vpop.f32.mrf.mxu0  ;;  %v979_v35 = vadd.f32 %v6238_v52, %v6348_v38  ;;  %v2049_v6 = vpop.f32.mrf.mxu2  ;;  %v1170_v18 = vmul.f32 7.0, %v1106_v9 }
 0x2d0   : > { %4630 = vlog2.f32 %v2049_v6 }
 0x2d1   : > { %v3260_v25 = vadd.f32 %v3114_v34, %v2791_v23  ;;  %v2276_v34 = vmul.f32 0.2, %v2191_v19  ;;  %v1043_v55 = vmul.f32 0.14285715, %v979_v35  ;;  %v1234_v38 = vsub.f32 %v978_v58, %v1170_v18 }
 0x2d2   : > { %4371 = vmatmul.msk.f32.gmra.mxu0 %vm2366_vm1, %v2338_v39 }
 0x2d3   : > { %4307 = vmatmul.msk.f32.gmra.mxu3 %vm2366_vm1, %v1231_v22  ;;  %v3326_v12 = vadd.f32 %v6196_v32, %v3260_v25  ;;  %v1232_v32 = vsub.f32 %v976_v21, %v1168_v14  ;;  %v2340_v33 = vadd.f32 %v2276_v34, %v6027_v13  ;;  %v2277_v22 = vmul.f32 0.2, %v2193_v31 }
 0x2d4   : > { %v3485_v62 = vpop.f32.mrf.mxu1  ;;  %v1107_v14 = vfloor.f32 %v1043_v55 }
 0x2d5   : > { %v3663_v15 = vmax.f32 %v3485_v62, 0.0  ;;  %v3390_v48 = vmax.f32 %v3326_v12, 0.0  ;;  %v980_v12 = vadd.f32 %v6238_v52, %v6362_v3  ;;  %v2341_v62 = vadd.f32 %v2277_v22, %v6046_v5 }
 0x2d6   : > { %v2648_v50 = vpop.f32.mrf.mxu3  ;;  %v4631_v3 = vpop.eup %4630 }
 0x2d7   : > { %v2792_v29 = vadd.f32 %v2648_v50, %v7050_v49  ;;  %3532 = vmatmul.f32.gmra.mxu1 %v3390_v48  ;;  %3773 = vmatmul.f32.gmra.mxu2 %v3663_v15  ;;  %v3120_v20 = vpop.f32.mrf.mxu0  ;;  %v2052_v48 = vpop.f32.mrf.mxu2  ;;  %v1044_v50 = vmul.f32 0.14285715, %v980_v12  ;;  %v1171_v49 = vmul.f32 7.0, %v1107_v14  ;;  %v2197_v2 = vmul.f32 0.6931472, %v4631_v3 }
 0x2d8   : > { %4632 = vlog2.f32 %v2052_v48 }
 0x2d9   : > { %v3261_v60 = vadd.f32 %v3117_v17, %v2792_v29  ;;  %v2278_v29 = vmul.f32 0.2, %v2195_v37 }
 0x2da   : > { %4372 = vmatmul.msk.f32.gmra.mxu0 %vm2366_vm1, %v2339_v61  ;;  %v6480_v61 = vld [vmem:[%s6811_s1 + $0x28] ss:$0 sm:$0xff] }
 0x2db   : > { %4308 = vmatmul.msk.f32.gmra.mxu3 %vm2366_vm1, %v1232_v32  ;;  %v3327_v1 = vadd.f32 %v6459_v27, %v3261_v60  ;;  %v1108_v32 = vfloor.f32 %v1044_v50  ;;  %v981_v19 = vadd.f32 %v6480_v61, %v6377_v47  ;;  %v2342_v7 = vadd.f32 %v2278_v29, %v6068_v51 }
 0x2dc   : > { %v3488_v54 = vpop.f32.mrf.mxu1 }
 0x2dd   : > { %v3664_v28 = vmax.f32 %v3488_v54, 0.0  ;;  %v3391_v11 = vmax.f32 %v3327_v1, 0.0  ;;  %v1235_v1 = vsub.f32 %v979_v35, %v1171_v49 }
 0x2de   : > { %v2651_v21 = vpop.f32.mrf.mxu3 }
 0x2df   : > { %v2793_v36 = vadd.f32 %v2651_v21, %v7051_v30  ;;  %3535 = vmatmul.f32.gmra.mxu1 %v3391_v11  ;;  %3776 = vmatmul.f32.gmra.mxu2 %v3664_v28  ;;  %v3123_v42 = vpop.f32.mrf.mxu0  ;;  %v1172_v28 = vmul.f32 7.0, %v1108_v32  ;;  %v1045_v11 = vmul.f32 0.14285715, %v981_v19  ;;  %v2279_v21 = vmul.f32 0.2, %v2197_v2  ;;  %v2055_v30 = vpop.f32.mrf.mxu2 }
 0x2e0   : > { %4634 = vlog2.f32 %v2055_v30 }
 0x2e1   : > { %v3262_v24 = vadd.f32 %v3120_v20, %v2793_v36  ;;  %v7053_v20 = vld [vmem:[#allocation96_spill] sm:$0xff]  ;;  %v1236_v51 = vsub.f32 %v980_v12, %v1172_v28  ;;  %v1109_v31 = vfloor.f32 %v1045_v11  ;;  %v2343_v6 = vadd.f32 %v2279_v21, %v6088_v0  ;;  %v7055_v0 = vld [vmem:[#allocation102_spill] sm:$0xff] }
 0x2e2   : > { %4373 = vmatmul.msk.f32.gmra.mxu0 %vm2366_vm1, %v2340_v33  ;;  %4636 = vlog2.f32 %v5871_v53 }
 0x2e3   : > { %4309 = vmatmul.msk.f32.gmra.mxu3 %vm2366_vm1, %v1233_v59  ;;  %v3328_v44 = vadd.f32 %v6459_v27, %v3262_v24  ;;  %v4633_v59 = vpop.eup %4632  ;;  %v1173_v22 = vmul.f32 7.0, %v1109_v31  ;;  %4638 = vlog2.f32 %v5898_v41  ;;  %v7061_v31 = vld [vmem:[#allocation2_spill] sm:$0xff] }
 0x2e4   : > { %v3491_v23 = vpop.f32.mrf.mxu1  ;;  %v2199_v24 = vmul.f32 0.6931472, %v4633_v59  ;;  %4640 = vlog2.f32 %v5919_v4 }
 0x2e5   : > { %v3665_v17 = vmax.f32 %v3491_v23, 0.0  ;;  %v3392_v39 = vmax.f32 %v3328_v44, 0.0  ;;  %v982_v44 = vadd.f32 %v6480_v61, %v6390_v26  ;;  %v7056_v26 = vld [vmem:[#allocation62_spill] sm:$0xff]  ;;  %4642 = vlog2.f32 %v5944_v63 }
 0x2e6   : > { %v2654_v13 = vpop.f32.mrf.mxu3  ;;  %v983_v12 = vadd.f32 %v6480_v61, %v7056_v26  ;;  %v7063_v26 = vld [vmem:[#allocation71_spill] sm:$0xff] }
 0x2e7   : > { %v2794_v25 = vadd.f32 %v2654_v13, %v7052_v43  ;;  %3538 = vmatmul.f32.gmra.mxu1 %v3392_v39  ;;  %3779 = vmatmul.f32.gmra.mxu2 %v3665_v17  ;;  %v3126_v46 = vpop.f32.mrf.mxu0  ;;  %v2280_v17 = vmul.f32 0.2, %v2199_v24  ;;  %v1046_v39 = vmul.f32 0.14285715, %v982_v44  ;;  %v4635_v43 = vpop.eup %4634 }
 0x2e8   : > { %v1047_v50 = vmul.f32 0.14285715, %v983_v12  ;;  %v4637_v53 = vpop.eup %4636 }
 0x2e9   : > { %v3263_v15 = vadd.f32 %v3123_v42, %v2794_v25  ;;  %v7054_v42 = vld [vmem:[#allocation99_spill] sm:$0xff]  ;;  %v2344_v14 = vadd.f32 %v2280_v17, %v6107_v10  ;;  %v1110_v37 = vfloor.f32 %v1046_v39 }
 0x2ea   : > { %4374 = vmatmul.msk.f32.gmra.mxu0 %vm2366_vm1, %v2341_v62  ;;  %v1111_v10 = vfloor.f32 %v1047_v50 }
 0x2eb   : > { %4310 = vmatmul.msk.f32.gmra.mxu3 %vm2366_vm1, %v1234_v38  ;;  %v3329_v56 = vadd.f32 %v6459_v27, %v3263_v15  ;;  %v2201_v15 = vmul.f32 0.6931472, %v4635_v43  ;;  %v1174_v49 = vmul.f32 7.0, %v1110_v37 }
 0x2ec   : > { %v3494_v16 = vpop.f32.mrf.mxu1  ;;  %v1175_v11 = vmul.f32 7.0, %v1111_v10  ;;  %v7067_v10 = vld [vmem:[#allocation117_spill] sm:$0xff] }
 0x2ed   : > { %v3666_v57 = vmax.f32 %v3494_v16, 0.0  ;;  %v3393_v52 = vmax.f32 %v3329_v56, 0.0  ;;  %v2281_v29 = vmul.f32 0.2, %v2201_v15  ;;  %4644 = vlog2.f32 %v7067_v10 }
 0x2ee   : > { %v2657_v58 = vpop.f32.mrf.mxu3 }
 0x2ef   : > { %v2795_v5 = vadd.f32 %v2657_v58, %v7053_v20  ;;  %3541 = vmatmul.f32.gmra.mxu1 %v3393_v52  ;;  %3782 = vmatmul.f32.gmra.mxu2 %v3666_v57  ;;  %v3129_v60 = vpop.f32.mrf.mxu0  ;;  %v7057_v58 = vld [vmem:[#allocation106_spill] sm:$0xff] }
 0x2f1   : > { %v3264_v54 = vadd.f32 %v3126_v46, %v2795_v5  ;;  %v1237_v46 = vsub.f32 %v981_v19, %v1173_v22  ;;  %v7058_v5 = vld [vmem:[#allocation65_spill] sm:$0xff] }
 0x2f2   : > { %4375 = vmatmul.msk.f32.gmra.mxu0 %vm2366_vm1, %v2342_v7  ;;  %v984_v32 = vadd.f32 %v6480_v61, %v7058_v5  ;;  %v2345_v7 = vadd.f32 %v2281_v29, %v6129_v40 }
 0x2f3   : > { %4311 = vmatmul.msk.f32.gmra.mxu3 %vm2366_vm1, %v1235_v1  ;;  %v3330_v34 = vadd.f32 %v6459_v27, %v3264_v54  ;;  %v1238_v1 = vsub.f32 %v982_v44, %v1174_v49 }
 0x2f4   : > { %v3497_v45 = vpop.f32.mrf.mxu1 }
 0x2f5   : > { %v3667_v36 = vmax.f32 %v3497_v45, 0.0  ;;  %v3394_v47 = vmax.f32 %v3330_v34, 0.0  ;;  %v1048_v34 = vmul.f32 0.14285715, %v984_v32 }
 0x2f6   : > { %v2660_v9 = vpop.f32.mrf.mxu3 }
 0x2f7   : > { %v2796_v33 = vadd.f32 %v2660_v9, %v7054_v42  ;;  %3544 = vmatmul.f32.gmra.mxu1 %v3394_v47  ;;  %3785 = vmatmul.f32.gmra.mxu2 %v3667_v36  ;;  %v3132_v35 = vpop.f32.mrf.mxu0  ;;  %v4639_v36 = vpop.eup %4638  ;;  %v7059_v47 = vld [vmem:[#allocation110_spill] sm:$0xff]  ;;  %v1112_v40 = vfloor.f32 %v1048_v34  ;;  %v7060_v9 = vld [vmem:[#allocation68_spill] sm:$0xff] }
 0x2f8   : > { %v985_v42 = vadd.f32 %v6480_v61, %v7060_v9  ;;  %v7070_v9 = vld [vmem:[#allocation77_spill] sm:$0xff] }
 0x2f9   : > { %v3265_v18 = vadd.f32 %v3129_v60, %v2796_v33  ;;  %v2203_v60 = vmul.f32 0.6931472, %v4637_v53 }
 0x2fa   : > { %4376 = vmatmul.msk.f32.gmra.mxu0 %vm2366_vm1, %v2343_v6  ;;  %v2205_v6 = vmul.f32 0.6931472, %v4639_v36 }
 0x2fb   : > { %4312 = vmatmul.msk.f32.gmra.mxu3 %vm2366_vm1, %v1236_v51  ;;  %v3331_v23 = vadd.f32 %v6459_v27, %v3265_v18  ;;  %v2282_v45 = vmul.f32 0.2, %v2203_v60  ;;  %v1239_v51 = vsub.f32 %v983_v12, %v1175_v11  ;;  %v1176_v18 = vmul.f32 7.0, %v1112_v40 }
 0x2fc   : > { %v3500_v55 = vpop.f32.mrf.mxu1  ;;  %v986_v12 = vadd.f32 %v6480_v61, %v7063_v26 }
 0x2fd   : > { %v3668_v8 = vmax.f32 %v3500_v55, 0.0  ;;  %v3395_v13 = vmax.f32 %v3331_v23, 0.0  ;;  %v1049_v23 = vmul.f32 0.14285715, %v985_v42  ;;  %v2283_v55 = vmul.f32 0.2, %v2205_v6 }
 0x2fe   : > { %v2663_v25 = vpop.f32.mrf.mxu3  ;;  %v1050_v50 = vmul.f32 0.14285715, %v986_v12 }
 0x2ff   : > { %v2797_v38 = vadd.f32 %v2663_v25, %v7055_v0  ;;  %3547 = vmatmul.f32.gmra.mxu1 %v3395_v13  ;;  %3788 = vmatmul.f32.gmra.mxu2 %v3668_v8  ;;  %v3135_v62 = vpop.f32.mrf.mxu0  ;;  %v4641_v8 = vpop.eup %4640  ;;  %v7062_v13 = vld [vmem:[#allocation112_spill] sm:$0xff]  ;;  %v1240_v25 = vsub.f32 %v984_v32, %v1176_v18  ;;  %v1113_v0 = vfloor.f32 %v1049_v23 }
 0x300   : > { %v4643_v29 = vpop.eup %4642  ;;  %v1114_v32 = vfloor.f32 %v1050_v50 }
 0x301   : > { %v3266_v48 = vadd.f32 %v3132_v35, %v2797_v38  ;;  %v2346_v35 = vadd.f32 %v2282_v45, %v7061_v31  ;;  %v4645_v36 = vpop.eup %4644 }
 0x302   : > { %4377 = vmatmul.msk.f32.gmra.mxu0 %vm2366_vm1, %v2344_v14  ;;  %v2207_v14 = vmul.f32 0.6931472, %v4641_v8  ;;  %v1178_v11 = vmul.f32 7.0, %v1114_v32  ;;  %v7078_v32 = vld [vmem:[#allocation83_spill] sm:$0xff] }
 0x303   : > { %4313 = vmatmul.msk.f32.gmra.mxu3 %vm2366_vm1, %v1237_v46  ;;  %v3332_v56 = vadd.f32 %v6459_v27, %v3266_v48  ;;  %v7064_v46 = vld [vmem:[#allocation3_spill] sm:$0xff]  ;;  %v1177_v48 = vmul.f32 7.0, %v1113_v0 }
 0x304   : > { %v3503_v16 = vpop.f32.mrf.mxu1  ;;  %v1242_v31 = vsub.f32 %v986_v12, %v1178_v11  ;;  %v7074_v12 = vld [vmem:[#allocation121_spill] sm:$0xff] }
 0x305   : > { %v3669_v57 = vmax.f32 %v3503_v16, 0.0  ;;  %v3396_v52 = vmax.f32 %v3332_v56, 0.0  ;;  %v2284_v16 = vmul.f32 0.2, %v2207_v14 }
 0x306   : > { %v2666_v3 = vpop.f32.mrf.mxu3 }
 0x307   : > { %v2798_v20 = vadd.f32 %v2666_v3, %v7057_v58  ;;  %3550 = vmatmul.f32.gmra.mxu1 %v3396_v52  ;;  %3791 = vmatmul.f32.gmra.mxu2 %v3669_v57  ;;  %v3138_v19 = vpop.f32.mrf.mxu0  ;;  %v7065_v52 = vld [vmem:[#allocation113_spill] sm:$0xff]  ;;  %v1241_v3 = vsub.f32 %v985_v42, %v1177_v48  ;;  %v7066_v58 = vld [vmem:[#allocation74_spill] sm:$0xff]  ;;  %v988_v42 = vadd.f32 %v6480_v61, %v7070_v9 }
 0x309   : > { %v3267_v2 = vadd.f32 %v3135_v62, %v2798_v20  ;;  %v2347_v62 = vadd.f32 %v2283_v55, %v7064_v46  ;;  %v987_v20 = vadd.f32 %v6480_v61, %v7066_v58  ;;  %v1052_v55 = vmul.f32 0.14285715, %v988_v42 }
 0x30a   : > { %4378 = vmatmul.msk.f32.gmra.mxu0 %vm2366_vm1, %v2345_v7 }
 0x30b   : > { %4314 = vmatmul.msk.f32.gmra.mxu3 %vm2366_vm1, %v1238_v1  ;;  %v3333_v54 = vadd.f32 %v6459_v27, %v3267_v2  ;;  %v2209_v1 = vmul.f32 0.6931472, %v4643_v29  ;;  %v1051_v34 = vmul.f32 0.14285715, %v987_v20  ;;  %v1116_v26 = vfloor.f32 %v1052_v55 }
 0x30c   : > { %v3506_v28 = vpop.f32.mrf.mxu1 }
 0x30d   : > { %v3670_v21 = vmax.f32 %v3506_v28, 0.0  ;;  %v3397_v30 = vmax.f32 %v3333_v54, 0.0  ;;  %v2285_v45 = vmul.f32 0.2, %v2209_v1  ;;  %v1115_v40 = vfloor.f32 %v1051_v34 }
 0x30e   : > { %v2669_v41 = vpop.f32.mrf.mxu3 }
 0x30f   : > { %v2799_v59 = vadd.f32 %v2669_v41, %v7059_v47  ;;  %3553 = vmatmul.f32.gmra.mxu1 %v3397_v30  ;;  %3794 = vmatmul.f32.gmra.mxu2 %v3670_v21  ;;  %v3141_v33 = vpop.f32.mrf.mxu0  ;;  %v7069_v47 = vld [vmem:[#allocation114_spill] sm:$0xff] }
 0x311   : > { %v3268_v24 = vadd.f32 %v3138_v19, %v2799_v59  ;;  %v7068_v19 = vld [vmem:[#allocation7_spill] sm:$0xff] }
 0x312   : > { %4379 = vmatmul.msk.f32.gmra.mxu0 %vm2366_vm1, %v2346_v35  ;;  %v2348_v60 = vadd.f32 %v2284_v16, %v7068_v19  ;;  %v7072_v35 = vld [vmem:[#allocation10_spill] sm:$0xff]  ;;  %v990_v19 = vadd.f32 %v6480_v61, %v7078_v32 }
 0x313   : > { %4315 = vmatmul.msk.f32.gmra.mxu3 %vm2366_vm1, %v1239_v51  ;;  %v3334_v44 = vadd.f32 %v6459_v27, %v3268_v24  ;;  %v2349_v6 = vadd.f32 %v2285_v45, %v7072_v35  ;;  %v2211_v24 = vmul.f32 0.6931472, %v4645_v36 }
 0x314   : > { %v3509_v22 = vpop.f32.mrf.mxu1 }
 0x315   : > { %v3671_v17 = vmax.f32 %v3509_v22, 0.0  ;;  %v3398_v39 = vmax.f32 %v3334_v44, 0.0  ;;  %v1179_v22 = vmul.f32 7.0, %v1115_v40 }
 0x316   : > { %v2672_v4 = vpop.f32.mrf.mxu3 }
 0x317   : > { %v2800_v43 = vadd.f32 %v2672_v4, %v7062_v13  ;;  %3556 = vmatmul.f32.gmra.mxu1 %v3398_v39  ;;  %3797 = vmatmul.f32.gmra.mxu2 %v3671_v17  ;;  %v3144_v38 = vpop.f32.mrf.mxu0  ;;  %v2286_v39 = vmul.f32 0.2, %v2211_v24 }
 0x319   : > { %v3269_v37 = vadd.f32 %v3141_v33, %v2800_v43  ;;  %v7071_v33 = vld [vmem:[#allocation119_spill] sm:$0xff] }
 0x31a   : > { %4380 = vmatmul.msk.f32.gmra.mxu0 %vm2366_vm1, %v2347_v62  ;;  %4646 = vlog2.f32 %v7071_v33  ;;  %v7075_v62 = vld [vmem:[#allocation80_spill] sm:$0xff] }
 0x31b   : > { %4316 = vmatmul.msk.f32.gmra.mxu3 %vm2366_vm1, %v1240_v25  ;;  %v3335_v15 = vadd.f32 %v6459_v27, %v3269_v37  ;;  %v7073_v25 = vld [vmem:[#allocation115_spill] sm:$0xff]  ;;  %4648 = vlog2.f32 %v7074_v12  ;;  %v989_v14 = vadd.f32 %v6480_v61, %v7075_v62  ;;  %v7076_v37 = vld [vmem:[#allocation13_spill] sm:$0xff]  ;;  %v7085_v12 = vld [vmem:[#allocation120_spill] sm:$0xff] }
 0x31c   : > { %v3512_v56 = vpop.f32.mrf.mxu1 }
 0x31d   : > { %v3672_v63 = vmax.f32 %v3512_v56, 0.0  ;;  %v3399_v49 = vmax.f32 %v3335_v15, 0.0  ;;  %v2350_v15 = vadd.f32 %v2286_v39, %v7076_v37  ;;  %v1053_v29 = vmul.f32 0.14285715, %v989_v14  ;;  %v7086_v37 = vld [vmem:[#allocation23_spill] sm:$0xff] }
 0x31e   : > { %v2675_v57 = vpop.f32.mrf.mxu3 }
 0x31f   : > { %v2801_v53 = vadd.f32 %v2675_v57, %v7065_v52  ;;  %3559 = vmatmul.f32.gmra.mxu1 %v3399_v49  ;;  %3800 = vmatmul.f32.gmra.mxu2 %v3672_v63  ;;  %v3147_v5 = vpop.f32.mrf.mxu0  ;;  %v1180_v63 = vmul.f32 7.0, %v1116_v26 }
 0x320   : > { %v4647_v13 = vpop.eup %4646 }
 0x321   : > { %v3270_v7 = vadd.f32 %v3144_v38, %v2801_v53  ;;  %v1243_v38 = vsub.f32 %v987_v20, %v1179_v22  ;;  %v2213_v48 = vmul.f32 0.6931472, %v4647_v13  ;;  %v7077_v20 = vld [vmem:[#allocation116_spill] sm:$0xff] }
 0x322   : > { %v3753_v2 = vpop.f32.mrf.mxu2  ;;  %4381 = vmatmul.msk.f32.gmra.mxu0 %vm2366_vm1, %v2348_v60  ;;  %v7079_v60 = vld [vmem:[#allocation123_spill] sm:$0xff] }
 0x323   : > { %3946 = vst.msk [vmem:[%s6536_s26] sm:$0xff] %vm3945_vm2, %v3753_v2  ;;  %4317 = vmatmul.msk.f32.gmra.mxu3 %vm2366_vm1, %v1241_v3  ;;  %v3336_v54 = vadd.f32 %v6459_v27, %v3270_v7  ;;  %v2287_v57 = vmul.f32 0.2, %v2213_v48  ;;  %v4649_v3 = vpop.eup %4648  ;;  %4650 = vlog2.f32 %v7079_v60  ;;  %v1117_v7 = vfloor.f32 %v1053_v29  ;;  %v7080_v2 = vld [vmem:[#allocation16_spill] sm:$0xff]  ;;  %v7087_v48 = vld [vmem:[#allocation90_spill] sm:$0xff] }
 0x324   : > { %v3515_v28 = vpop.f32.mrf.mxu1  ;;  %v2215_v34 = vmul.f32 0.6931472, %v4649_v3 }
 0x325   : > { %v3673_v21 = vmax.f32 %v3515_v28, 0.0  ;;  %v3400_v30 = vmax.f32 %v3336_v54, 0.0  ;;  %v2351_v54 = vadd.f32 %v2287_v57, %v7080_v2  ;;  %v1181_v36 = vmul.f32 7.0, %v1117_v7  ;;  %v7090_v7 = vld [vmem:[#allocation94_spill] sm:$0xff] }
 0x326   : > { %v2678_v41 = vpop.f32.mrf.mxu3  ;;  %v993_v2 = vadd.f32 %v6480_v61, %v7090_v7 }
 0x327   : > { %v2802_v59 = vadd.f32 %v2678_v41, %v7069_v47  ;;  %3562 = vmatmul.f32.gmra.mxu1 %v3400_v30  ;;  %3803 = vmatmul.f32.gmra.mxu2 %v3673_v21  ;;  %v3150_v51 = vpop.f32.mrf.mxu0  ;;  %v1054_v21 = vmul.f32 0.14285715, %v990_v19  ;;  %v2288_v41 = vmul.f32 0.2, %v2215_v34 }
 0x329   : > { %v3271_v44 = vadd.f32 %v3147_v5, %v2802_v59  ;;  %v1244_v5 = vsub.f32 %v988_v42, %v1180_v63  ;;  %v4651_v40 = vpop.eup %4650  ;;  %v7081_v42 = vld [vmem:[#allocation118_spill] sm:$0xff] }
 0x32a   : > { %v3756_v18 = vpop.f32.mrf.mxu2  ;;  %4382 = vmatmul.msk.f32.gmra.mxu0 %vm2366_vm1, %v2349_v6  ;;  %v7083_v6 = vld [vmem:[#allocation125_spill] sm:$0xff]  ;;  %v2217_v22 = vmul.f32 0.6931472, %v4651_v40 }
 0x32b   : > { %3947 = vst.msk [vmem:[%s6536_s26 + $0x8] sm:$0xff] %vm3945_vm2, %v3756_v18  ;;  %4318 = vmatmul.msk.f32.gmra.mxu3 %vm2366_vm1, %v1242_v31  ;;  %v3337_v23 = vadd.f32 %v6459_v27, %v3271_v44  ;;  %v7082_v31 = vld [vmem:[#allocation87_spill] sm:$0xff]  ;;  %4652 = vlog2.f32 %v7083_v6  ;;  %v1245_v44 = vsub.f32 %v989_v14, %v1181_v36 }
 0x32c   : > { %v3518_v17 = vpop.f32.mrf.mxu1  ;;  %v991_v35 = vadd.f32 %v6480_v61, %v7082_v31  ;;  %v7084_v18 = vld [vmem:[#allocation19_spill] sm:$0xff]  ;;  %4654 = vlog2.f32 %v7086_v37  ;;  %v7097_v37 = vld [vmem:[#allocation126_spill] sm:$0xff] }
 0x32d   : > { %v3674_v8 = vmax.f32 %v3518_v17, 0.0  ;;  %v3401_v4 = vmax.f32 %v3337_v23, 0.0  ;;  %v2352_v23 = vadd.f32 %v2288_v41, %v7084_v18 }
 0x32e   : > { %v2681_v43 = vpop.f32.mrf.mxu3 }
 0x32f   : > { %v2803_v0 = vadd.f32 %v2681_v43, %v7073_v25  ;;  %3565 = vmatmul.f32.gmra.mxu1 %v3401_v4  ;;  %3806 = vmatmul.f32.gmra.mxu2 %v3674_v8  ;;  %v3153_v46 = vpop.f32.mrf.mxu0  ;;  %v1055_v4 = vmul.f32 0.14285715, %v991_v35  ;;  %v2289_v43 = vmul.f32 0.2, %v2217_v22 }
 0x331   : > { %v3272_v56 = vadd.f32 %v3150_v51, %v2803_v0  ;;  %v1118_v51 = vfloor.f32 %v1054_v21  ;;  %v1119_v14 = vfloor.f32 %v1055_v4 }
 0x332   : > { %v3759_v50 = vpop.f32.mrf.mxu2  ;;  %4383 = vmatmul.msk.f32.gmra.mxu0 %vm2366_vm1, %v2350_v15 }
 0x333   : > { %3948 = vst.msk [vmem:[%s6536_s26 + $0x10] sm:$0xff] %vm3945_vm2, %v3759_v50  ;;  %4319 = vmatmul.msk.f32.gmra.mxu3 %vm2366_vm1, %v1243_v38  ;;  %v3338_v16 = vadd.f32 %v6459_v27, %v3272_v56  ;;  %v1182_v8 = vmul.f32 7.0, %v1118_v51  ;;  %v4653_v38 = vpop.eup %4652  ;;  %v992_v56 = vadd.f32 %v6480_v61, %v7087_v48  ;;  %v7088_v50 = vld [vmem:[#allocation22_spill] sm:$0xff] }
 0x334   : > { %v3521_v49 = vpop.f32.mrf.mxu1  ;;  %v2219_v63 = vmul.f32 0.6931472, %v4653_v38 }
 0x335   : > { %v3675_v52 = vmax.f32 %v3521_v49, 0.0  ;;  %v3402_v53 = vmax.f32 %v3338_v16, 0.0  ;;  %v1246_v62 = vsub.f32 %v990_v19, %v1182_v8  ;;  %v2353_v16 = vadd.f32 %v2289_v43, %v7088_v50  ;;  %v7089_v19 = vld [vmem:[#allocation122_spill] sm:$0xff]  ;;  %v7098_v50 = vld [vmem:[#allocation35_spill] sm:$0xff] }
 0x336   : > { %v2684_v58 = vpop.f32.mrf.mxu3  ;;  %v1056_v3 = vmul.f32 0.14285715, %v992_v56 }
 0x337   : > { %v2804_v10 = vadd.f32 %v2684_v58, %v7077_v20  ;;  %3568 = vmatmul.f32.gmra.mxu1 %v3402_v53  ;;  %3809 = vmatmul.f32.gmra.mxu2 %v3675_v52  ;;  %v3156_v1 = vpop.f32.mrf.mxu0  ;;  %v1183_v52 = vmul.f32 7.0, %v1119_v14  ;;  %v2290_v58 = vmul.f32 0.2, %v2219_v63  ;;  %v7099_v63 = vld [vmem:[#allocation101_spill] sm:$0xff] }
 0x339   : > { %v3273_v28 = vadd.f32 %v3153_v46, %v2804_v10 }
 0x33a   : > { %v3762_v11 = vpop.f32.mrf.mxu2  ;;  %4384 = vmatmul.msk.f32.gmra.mxu0 %vm2366_vm1, %v2351_v54  ;;  %v7091_v54 = vld [vmem:[#allocation27_spill] sm:$0xff] }
 0x33b   : > { %3949 = vst.msk [vmem:[%s6536_s26 + $0x18] sm:$0xff] %vm3945_vm2, %v3762_v11  ;;  %4320 = vmatmul.msk.f32.gmra.mxu3 %vm2366_vm1, %v1244_v5  ;;  %v3339_v45 = vadd.f32 %v6459_v27, %v3273_v28  ;;  %v4655_v5 = vpop.eup %4654  ;;  %4656 = vlog2.f32 %v7091_v54  ;;  %v1120_v28 = vfloor.f32 %v1056_v3  ;;  %v7092_v11 = vld [vmem:[#allocation26_spill] sm:$0xff] }
 0x33c   : > { %v3524_v30 = vpop.f32.mrf.mxu1  ;;  %v2221_v21 = vmul.f32 0.6931472, %v4655_v5 }
 0x33d   : > { %v3676_v47 = vmax.f32 %v3524_v30, 0.0  ;;  %v3403_v59 = vmax.f32 %v3339_v45, 0.0  ;;  %v2354_v45 = vadd.f32 %v2290_v58, %v7092_v11  ;;  %v1184_v40 = vmul.f32 7.0, %v1120_v28  ;;  %v7102_v28 = vld [vmem:[#allocation104_spill] sm:$0xff] }
 0x33e   : > { %v2687_v9 = vpop.f32.mrf.mxu3  ;;  %v996_v11 = vadd.f32 %v6480_v61, %v7102_v28  ;;  %v7113_v28 = vld [vmem:[#allocation95_spill] sm:$0xff] }
 0x33f   : > { %v2805_v33 = vadd.f32 %v2687_v9, %v7081_v42  ;;  %3571 = vmatmul.f32.gmra.mxu1 %v3403_v59  ;;  %3812 = vmatmul.f32.gmra.mxu2 %v3676_v47  ;;  %v3159_v24 = vpop.f32.mrf.mxu0  ;;  %v1057_v47 = vmul.f32 0.14285715, %v993_v2  ;;  %v2291_v9 = vmul.f32 0.2, %v2221_v21 }
 0x341   : > { %v3274_v55 = vadd.f32 %v3156_v1, %v2805_v33  ;;  %v1247_v1 = vsub.f32 %v991_v35, %v1183_v52  ;;  %v4657_v51 = vpop.eup %4656  ;;  %v7093_v35 = vld [vmem:[#allocation124_spill] sm:$0xff] }
 0x342   : > { %v3765_v17 = vpop.f32.mrf.mxu2  ;;  %4385 = vmatmul.msk.f32.gmra.mxu0 %vm2366_vm1, %v2352_v23  ;;  %v7095_v23 = vld [vmem:[#allocation31_spill] sm:$0xff]  ;;  %v2223_v8 = vmul.f32 0.6931472, %v4657_v51 }
 0x343   : > { %3950 = vst.msk [vmem:[%s6536_s26 + $0x20] sm:$0xff] %vm3945_vm2, %v3765_v17  ;;  %4321 = vmatmul.msk.f32.gmra.mxu3 %vm2366_vm1, %v1245_v44  ;;  %v3340_v39 = vadd.f32 %v6459_v27, %v3274_v55  ;;  %v7094_v44 = vld [vmem:[#allocation98_spill] sm:$0xff]  ;;  %4658 = vlog2.f32 %v7095_v23  ;;  %v1248_v55 = vsub.f32 %v992_v56, %v1184_v40 }
 0x344   : > { %v3527_v13 = vpop.f32.mrf.mxu1  ;;  %v994_v18 = vadd.f32 %v6480_v61, %v7094_v44  ;;  %v7096_v17 = vld [vmem:[#allocation30_spill] sm:$0xff]  ;;  %4660 = vlog2.f32 %v7098_v50  ;;  %v7109_v50 = vld [vmem:[#allocation91_spill] sm:$0xff] }
 0x345   : > { %v3677_v25 = vmax.f32 %v3527_v13, 0.0  ;;  %v3404_v0 = vmax.f32 %v3340_v39, 0.0  ;;  %v2355_v39 = vadd.f32 %v2291_v9, %v7096_v17 }
 0x346   : > { %v2690_v26 = vpop.f32.mrf.mxu3 }
 0x347   : > { %v2806_v46 = vadd.f32 %v2690_v26, %v7085_v12  ;;  %3574 = vmatmul.f32.gmra.mxu1 %v3404_v0  ;;  %3815 = vmatmul.f32.gmra.mxu2 %v3677_v25  ;;  %v3162_v15 = vpop.f32.mrf.mxu0  ;;  %v1058_v0 = vmul.f32 0.14285715, %v994_v18  ;;  %v2292_v26 = vmul.f32 0.2, %v2223_v8 }
 0x349   : > { %v3275_v49 = vadd.f32 %v3159_v24, %v2806_v46  ;;  %v1121_v24 = vfloor.f32 %v1057_v47  ;;  %v1122_v56 = vfloor.f32 %v1058_v0 }
 0x34a   : > { %v3768_v29 = vpop.f32.mrf.mxu2  ;;  %4386 = vmatmul.msk.f32.gmra.mxu0 %vm2366_vm1, %v2353_v16 }
 0x34b   : > { %3951 = vst.msk [vmem:[%s6536_s26 + $0x28] sm:$0xff] %vm3945_vm2, %v3768_v29  ;;  %4322 = vmatmul.msk.f32.gmra.mxu3 %vm2366_vm1, %v1246_v62  ;;  %v3341_v57 = vadd.f32 %v6459_v27, %v3275_v49  ;;  %v1185_v25 = vmul.f32 7.0, %v1121_v24  ;;  %v4659_v62 = vpop.eup %4658  ;;  %v995_v49 = vadd.f32 %v6480_v61, %v7099_v63  ;;  %v7100_v29 = vld [vmem:[#allocation34_spill] sm:$0xff] }
 0x34c   : > { %v3530_v53 = vpop.f32.mrf.mxu1  ;;  %v2225_v52 = vmul.f32 0.6931472, %v4659_v62 }
 0x34d   : > { %v3678_v20 = vmax.f32 %v3530_v53, 0.0  ;;  %v3405_v10 = vmax.f32 %v3341_v57, 0.0  ;;  %v1249_v48 = vsub.f32 %v993_v2, %v1185_v25  ;;  %v2356_v57 = vadd.f32 %v2292_v26, %v7100_v29  ;;  %v7101_v2 = vld [vmem:[#allocation84_spill] sm:$0xff]  ;;  %v7110_v29 = vld [vmem:[#allocation47_spill] sm:$0xff] }
 0x34e   : > { %v2693_v32 = vpop.f32.mrf.mxu3  ;;  %v1059_v5 = vmul.f32 0.14285715, %v995_v49 }
 0x34f   : > { %v2807_v60 = vadd.f32 %v2693_v32, %v7089_v19  ;;  %3577 = vmatmul.f32.gmra.mxu1 %v3405_v10  ;;  %3818 = vmatmul.f32.gmra.mxu2 %v3678_v20  ;;  %v3165_v34 = vpop.f32.mrf.mxu0  ;;  %v1186_v20 = vmul.f32 7.0, %v1122_v56  ;;  %v2293_v32 = vmul.f32 0.2, %v2225_v52  ;;  %v7111_v52 = vld [vmem:[#allocation111_spill] sm:$0xff] }
 0x351   : > { %v3276_v30 = vadd.f32 %v3162_v15, %v2807_v60 }
 0x352   : > { %v3771_v36 = vpop.f32.mrf.mxu2  ;;  %4387 = vmatmul.msk.f32.gmra.mxu0 %vm2366_vm1, %v2354_v45  ;;  %v7103_v45 = vld [vmem:[#allocation39_spill] sm:$0xff] }
 0x353   : > { %3952 = vst.msk [vmem:[%s6536_s26 + $0x30] sm:$0xff] %vm3945_vm2, %v3771_v36  ;;  %4323 = vmatmul.msk.f32.gmra.mxu3 %vm2366_vm1, %v1247_v1  ;;  %v3342_v41 = vadd.f32 %v6459_v27, %v3276_v30  ;;  %v4661_v1 = vpop.eup %4660  ;;  %4662 = vlog2.f32 %v7103_v45  ;;  %v1123_v30 = vfloor.f32 %v1059_v5  ;;  %v7104_v36 = vld [vmem:[#allocation38_spill] sm:$0xff] }
 0x354   : > { %v3533_v59 = vpop.f32.mrf.mxu1  ;;  %v2227_v47 = vmul.f32 0.6931472, %v4661_v1 }
 0x355   : > { %v3679_v42 = vmax.f32 %v3533_v59, 0.0  ;;  %v3406_v33 = vmax.f32 %v3342_v41, 0.0  ;;  %v2357_v41 = vadd.f32 %v2293_v32, %v7104_v36  ;;  %v1187_v51 = vmul.f32 7.0, %v1123_v30  ;;  %v7114_v36 = vld [vmem:[#allocation50_spill] sm:$0xff] }
 0x356   : > { %v2696_v31 = vpop.f32.mrf.mxu3 }
 0x357   : > { %v2808_v6 = vadd.f32 %v2696_v31, %v7093_v35  ;;  %3580 = vmatmul.f32.gmra.mxu1 %v3406_v33  ;;  %3821 = vmatmul.f32.gmra.mxu2 %v3679_v42  ;;  %v3168_v22 = vpop.f32.mrf.mxu0  ;;  %v1060_v42 = vmul.f32 0.14285715, %v996_v11  ;;  %v2294_v31 = vmul.f32 0.2, %v2227_v47 }
 0x359   : > { %v3277_v4 = vadd.f32 %v3165_v34, %v2808_v6  ;;  %v1250_v34 = vsub.f32 %v994_v18, %v1186_v20  ;;  %v4663_v24 = vpop.eup %4662  ;;  %v7105_v18 = vld [vmem:[#allocation127_spill] sm:$0xff] }
 0x35a   : > { %v3774_v13 = vpop.f32.mrf.mxu2  ;;  %4388 = vmatmul.msk.f32.gmra.mxu0 %vm2366_vm1, %v2355_v39  ;;  %v7107_v39 = vld [vmem:[#allocation43_spill] sm:$0xff]  ;;  %v2229_v25 = vmul.f32 0.6931472, %v4663_v24  ;;  %v7115_v24 = vld [vmem:[#allocation128_spill] sm:$0xff] }
 0x35b   : > { %3953 = vst.msk [vmem:[%s6536_s26 + $0x38] sm:$0xff] %vm3945_vm2, %v3774_v13  ;;  %4324 = vmatmul.msk.f32.gmra.mxu3 %vm2366_vm1, %v1248_v55  ;;  %v3343_v43 = vadd.f32 %v6459_v27, %v3277_v4  ;;  %v7106_v55 = vld [vmem:[#allocation108_spill] sm:$0xff]  ;;  %4664 = vlog2.f32 %v7107_v39  ;;  %v1251_v4 = vsub.f32 %v995_v49, %v1187_v51  ;;  %v7108_v13 = vld [vmem:[#allocation42_spill] sm:$0xff] }
 0x35c   : > { %v3536_v38 = vpop.f32.mrf.mxu1  ;;  %v997_v17 = vadd.f32 %v6480_v61, %v7106_v55  ;;  %4666 = vlog2.f32 %v7110_v29 }
 0x35d   : > { %v3680_v12 = vmax.f32 %v3536_v38, 0.0  ;;  %v3407_v46 = vmax.f32 %v3343_v43, 0.0  ;;  %v2358_v43 = vadd.f32 %v2294_v31, %v7108_v13 }
 0x35e   : > { %v2699_v14 = vpop.f32.mrf.mxu3 }
 0x35f   : > { %v2809_v15 = vadd.f32 %v2699_v14, %v7097_v37  ;;  %3583 = vmatmul.f32.gmra.mxu1 %v3407_v46  ;;  %3824 = vmatmul.f32.gmra.mxu2 %v3680_v12  ;;  %v3171_v16 = vpop.f32.mrf.mxu0  ;;  %v1061_v46 = vmul.f32 0.14285715, %v997_v17  ;;  %v2295_v14 = vmul.f32 0.2, %v2229_v25 }
 0x361   : > { %v3278_v53 = vadd.f32 %v3168_v22, %v2809_v15  ;;  %v1124_v22 = vfloor.f32 %v1060_v42  ;;  %v1125_v49 = vfloor.f32 %v1061_v46 }
 0x362   : > { %v3777_v3 = vpop.f32.mrf.mxu2  ;;  %4389 = vmatmul.msk.f32.gmra.mxu0 %vm2366_vm1, %v2356_v57 }
 0x363   : > { %3954 = vst.msk [vmem:[%s6536_s26 + $0x40] sm:$0xff] %vm3945_vm2, %v3777_v3  ;;  %4325 = vmatmul.msk.f32.gmra.mxu3 %vm2366_vm1, %v1249_v48  ;;  %v3344_v58 = vadd.f32 %v6459_v27, %v3278_v53  ;;  %v1188_v12 = vmul.f32 7.0, %v1124_v22  ;;  %v4665_v48 = vpop.eup %4664  ;;  %v998_v53 = vadd.f32 %v6480_v61, %v7111_v52  ;;  %v7112_v3 = vld [vmem:[#allocation46_spill] sm:$0xff]  ;;  %v7116_v22 = vld [vmem:[#allocation57_spill] sm:$0xff] }
 0x364   : > { %v3539_v10 = vpop.f32.mrf.mxu1  ;;  %v2231_v20 = vmul.f32 0.6931472, %v4665_v48 }
 0x365   : > { %v3681_v19 = vmax.f32 %v3539_v10, 0.0  ;;  %v3408_v60 = vmax.f32 %v3344_v58, 0.0  ;;  %v1252_v63 = vsub.f32 %v996_v11, %v1188_v12  ;;  %v2359_v58 = vadd.f32 %v2295_v14, %v7112_v3 }
 0x366   : > { %v2702_v7 = vpop.f32.mrf.mxu3  ;;  %v1062_v1 = vmul.f32 0.14285715, %v998_v53 }
 0x367   : > { %v2810_v54 = vadd.f32 %v2702_v7, %v7101_v2  ;;  %3586 = vmatmul.f32.gmra.mxu1 %v3408_v60  ;;  %3827 = vmatmul.f32.gmra.mxu2 %v3681_v19  ;;  %v3174_v21 = vpop.f32.mrf.mxu0  ;;  %v1189_v19 = vmul.f32 7.0, %v1125_v49  ;;  %v2296_v7 = vmul.f32 0.2, %v2231_v20 }
 0x368   : > { %v1126_v30 = vfloor.f32 %v1062_v1 }
 0x369   : > { %v3279_v59 = vadd.f32 %v3171_v16, %v2810_v54  ;;  %v4667_v54 = vpop.eup %4666  ;;  %v1253_v45 = vsub.f32 %v997_v17, %v1189_v19 }
 0x36a   : > { %v3780_v40 = vpop.f32.mrf.mxu2  ;;  %4390 = vmatmul.msk.f32.gmra.mxu0 %vm2366_vm1, %v2357_v41  ;;  %v2360_v41 = vadd.f32 %v2296_v7, %v7114_v36  ;;  %v2233_v47 = vmul.f32 0.6931472, %v4667_v54 }
 0x36b   : > { %3955 = vst.msk [vmem:[%s6536_s26 + $0x48] sm:$0xff] %vm3945_vm2, %v3780_v40  ;;  %4326 = vmatmul.msk.f32.gmra.mxu3 %vm2366_vm1, %v1250_v34  ;;  %v3345_v9 = vadd.f32 %v6459_v27, %v3279_v59 }
 0x36c   : > { %v3542_v33 = vpop.f32.mrf.mxu1  ;;  %v2297_v51 = vmul.f32 0.2, %v2233_v47  ;;  %v7121_v47 = vld [vmem:[#allocation14_spill] sm:$0xff] }
 0x36d   : > { %v3682_v35 = vmax.f32 %v3542_v33, 0.0  ;;  %v3409_v6 = vmax.f32 %v3345_v9, 0.0  ;;  %v1190_v33 = vmul.f32 7.0, %v1126_v30 }
 0x36e   : > { %v2705_v44 = vpop.f32.mrf.mxu3  ;;  %v2361_v55 = vadd.f32 %v2297_v51, %v7116_v22 }
 0x36f   : > { %v2811_v23 = vadd.f32 %v2705_v44, %v7105_v18  ;;  %3589 = vmatmul.f32.gmra.mxu1 %v3409_v6  ;;  %3830 = vmatmul.f32.gmra.mxu2 %v3682_v35  ;;  %v3177_v8 = vpop.f32.mrf.mxu0 }
 0x371   : > { %v3280_v0 = vadd.f32 %v3174_v21, %v2811_v23  ;;  %v1254_v23 = vsub.f32 %v998_v53, %v1190_v33 }
 0x372   : > { %v3783_v38 = vpop.f32.mrf.mxu2  ;;  %4391 = vmatmul.msk.f32.gmra.mxu0 %vm2366_vm1, %v2358_v43 }
 0x373   : > { %3956 = vst.msk [vmem:[%s6536_s26 + $0x50] sm:$0xff] %vm3945_vm2, %v3783_v38  ;;  %4327 = vmatmul.msk.f32.gmra.mxu3 %vm2366_vm1, %v1251_v4  ;;  %v3346_v26 = vadd.f32 %v6459_v27, %v3280_v0  ;;  %v7117_v0 = vld [vmem:[#allocation129_spill] sm:$0xff] }
 0x374   : > { %v3545_v62 = vpop.f32.mrf.mxu1 }
 0x375   : > { %v3683_v37 = vmax.f32 %v3545_v62, 0.0  ;;  %v3410_v15 = vmax.f32 %v3346_v26, 0.0  ;;  %v6674_v62 = vld [vmem:[%s6813_s3 + $0x40] ss:$0 sm:$0xff] }
 0x376   : > { %v2708_v56 = vpop.f32.mrf.mxu3 }
 0x377   : > { %v2812_v16 = vadd.f32 %v2708_v56, %v7109_v50  ;;  %3592 = vmatmul.f32.gmra.mxu1 %v3410_v15  ;;  %3833 = vmatmul.f32.gmra.mxu2 %v3683_v37  ;;  %v3180_v57 = vpop.f32.mrf.mxu0  ;;  %v7118_v56 = vld [vmem:[#allocation5_spill] sm:$0xff] }
 0x379   : > { %v3281_v10 = vadd.f32 %v3177_v8, %v2812_v16 }
 0x37a   : > { %v3786_v5 = vpop.f32.mrf.mxu2  ;;  %4392 = vmatmul.msk.f32.gmra.mxu0 %vm2366_vm1, %v2359_v58  ;;  %v7119_v58 = vld [vmem:[#allocation8_spill] sm:$0xff] }
 0x37b   : > { %3957 = vst.msk [vmem:[%s6536_s26 + $0x58] sm:$0xff] %vm3945_vm2, %v3786_v5  ;;  %4328 = vmatmul.msk.f32.gmra.mxu3 %vm2366_vm1, %v1252_v63  ;;  %v3347_v32 = vadd.f32 %v6459_v27, %v3281_v10 }
 0x37c   : > { %v3548_v60 = vpop.f32.mrf.mxu1 }
 0x37d   : > { %v3684_v2 = vmax.f32 %v3548_v60, 0.0  ;;  %v3411_v61 = vmax.f32 %v3347_v32, 0.0 }
 0x37e   : > { %v2711_v34 = vpop.f32.mrf.mxu3 }
 0x37f   : > { %v2813_v11 = vadd.f32 %v2711_v34, %v7113_v28  ;;  %3595 = vmatmul.f32.gmra.mxu1 %v3411_v61  ;;  %3836 = vmatmul.f32.gmra.mxu2 %v3684_v2  ;;  %v3183_v21 = vpop.f32.mrf.mxu0  ;;  %v7120_v61 = vld [vmem:[#allocation11_spill] sm:$0xff] }
 0x381   : > { %v3282_v59 = vadd.f32 %v3180_v57, %v2813_v11 }
 0x382   : > { %v3789_v40 = vpop.f32.mrf.mxu2  ;;  %4393 = vmatmul.msk.f32.gmra.mxu0 %vm2366_vm1, %v2360_v41 }
 0x383   : > { %3958 = vst.msk [vmem:[%s6536_s26 + $0x60] sm:$0xff] %vm3945_vm2, %v3789_v40  ;;  %4329 = vmatmul.msk.f32.gmra.mxu3 %vm2366_vm1, %v1253_v45  ;;  %v3348_v9 = vadd.f32 %v6459_v27, %v3282_v59 }
 0x384   : > { %v3551_v42 = vpop.f32.mrf.mxu1 }
 0x385   : > { %v3685_v31 = vmax.f32 %v3551_v42, 0.0  ;;  %v3412_v35 = vmax.f32 %v3348_v9, 0.0 }
 0x386   : > { %v2714_v6 = vpop.f32.mrf.mxu3 }
 0x387   : > { %v2814_v44 = vadd.f32 %v2714_v6, %v7115_v24  ;;  %3598 = vmatmul.f32.gmra.mxu1 %v3412_v35  ;;  %3839 = vmatmul.f32.gmra.mxu2 %v3685_v31  ;;  %v3186_v18 = vpop.f32.mrf.mxu0  ;;  %v7122_v24 = vld [vmem:[#allocation17_spill] sm:$0xff] }
 0x389   : > { %v3283_v17 = vadd.f32 %v3183_v21, %v2814_v44 }
 0x38a   : > { %v3792_v39 = vpop.f32.mrf.mxu2  ;;  %4394 = vmatmul.msk.f32.gmra.mxu0 %vm2366_vm1, %v2361_v55 }
 0x38b   : > { %3959 = vst.msk [vmem:[%s6536_s26 + $0x68] sm:$0xff] %vm3945_vm2, %v3792_v39  ;;  %4330 = vmatmul.msk.f32.gmra.mxu3 %vm2366_vm1, %v1254_v23  ;;  %v3349_v8 = vadd.f32 %v6459_v27, %v3283_v17 }
 0x38c   : > { %v3554_v4 = vpop.f32.mrf.mxu1 }
 0x38d   : > { %v3686_v13 = vmax.f32 %v3554_v4, 0.0  ;;  %v3413_v43 = vmax.f32 %v3349_v8, 0.0 }
 0x38e   : > { %v2717_v25 = vpop.f32.mrf.mxu3 }
 0x38f   : > { %v2815_v38 = vadd.f32 %v2717_v25, %v7117_v0  ;;  %3601 = vmatmul.f32.gmra.mxu1 %v3413_v43  ;;  %3842 = vmatmul.f32.gmra.mxu2 %v3686_v13  ;;  %v3189_v26 = vpop.f32.mrf.mxu0  ;;  %v7123_v13 = vld [vmem:[#allocation20_spill] sm:$0xff] }
 0x391   : > { %v3284_v12 = vadd.f32 %v3186_v18, %v2815_v38 }
 0x392   : > { %v3795_v46 = vpop.f32.mrf.mxu2 }
 0x393   : > { %3960 = vst.msk [vmem:[%s6536_s26 + $0x70] sm:$0xff] %vm3945_vm2, %v3795_v46  ;;  %v3350_v27 = vadd.f32 %v6674_v62, %v3284_v12 }
 0x394   : > { %v3557_v14 = vpop.f32.mrf.mxu1 }
 0x395   : > { %v3687_v37 = vmax.f32 %v3557_v14, 0.0  ;;  %v3414_v15 = vmax.f32 %v3350_v27, 0.0 }
 0x396   : > { %v2720_v48 = vpop.f32.mrf.mxu3 }
 0x397   : > { %v2816_v50 = vadd.f32 %v2720_v48, %v7118_v56  ;;  %3604 = vmatmul.f32.gmra.mxu1 %v3414_v15  ;;  %3845 = vmatmul.f32.gmra.mxu2 %v3687_v37  ;;  %v3192_v16 = vpop.f32.mrf.mxu0  ;;  %v7124_v37 = vld [vmem:[#allocation24_spill] sm:$0xff] }
 0x399   : > { %v3285_v63 = vadd.f32 %v3189_v26, %v2816_v50 }
 0x39a   : > { %v3798_v49 = vpop.f32.mrf.mxu2 }
 0x39b   : > { %3961 = vst.msk [vmem:[%s6536_s26 + $0x78] sm:$0xff] %vm3945_vm2, %v3798_v49  ;;  %v3351_v29 = vadd.f32 %v6674_v62, %v3285_v63 }
 0x39c   : > { %v3560_v57 = vpop.f32.mrf.mxu1 }
 0x39d   : > { %v3688_v52 = vmax.f32 %v3560_v57, 0.0  ;;  %v3415_v53 = vmax.f32 %v3351_v29, 0.0 }
 0x39e   : > { %v2723_v3 = vpop.f32.mrf.mxu3 }
 0x39f   : > { %v2817_v20 = vadd.f32 %v2723_v3, %v7119_v58  ;;  %3607 = vmatmul.f32.gmra.mxu1 %v3415_v53  ;;  %3848 = vmatmul.f32.gmra.mxu2 %v3688_v52  ;;  %v3195_v10 = vpop.f32.mrf.mxu0  ;;  %v7125_v52 = vld [vmem:[#allocation28_spill] sm:$0xff] }
 0x3a1   : > { %v3286_v5 = vadd.f32 %v3192_v16, %v2817_v20 }
 0x3a2   : > { %v3801_v32 = vpop.f32.mrf.mxu2 }
 0x3a3   : > { %3962 = vst.msk [vmem:[%s6536_s26 + $0x80] sm:$0xff] %vm3945_vm2, %v3801_v32  ;;  %v3352_v19 = vadd.f32 %v6674_v62, %v3286_v5 }
 0x3a4   : > { %v3563_v60 = vpop.f32.mrf.mxu1 }
 0x3a5   : > { %v3689_v1 = vmax.f32 %v3563_v60, 0.0  ;;  %v3416_v7 = vmax.f32 %v3352_v19, 0.0 }
 0x3a6   : > { %v2726_v2 = vpop.f32.mrf.mxu3 }
 0x3a7   : > { %v2818_v54 = vadd.f32 %v2726_v2, %v7120_v61  ;;  %3610 = vmatmul.f32.gmra.mxu1 %v3416_v7  ;;  %3851 = vmatmul.f32.gmra.mxu2 %v3689_v1  ;;  %v3198_v34 = vpop.f32.mrf.mxu0  ;;  %v7126_v1 = vld [vmem:[#allocation32_spill] sm:$0xff] }
 0x3a9   : > { %v3287_v28 = vadd.f32 %v3195_v10, %v2818_v54 }
 0x3aa   : > { %v3804_v11 = vpop.f32.mrf.mxu2 }
 0x3ab   : > { %3963 = vst.msk [vmem:[%s6536_s26 + $0x88] sm:$0xff] %vm3945_vm2, %v3804_v11  ;;  %v3353_v45 = vadd.f32 %v6674_v62, %v3287_v28 }
 0x3ac   : > { %v3566_v21 = vpop.f32.mrf.mxu1 }
 0x3ad   : > { %v3690_v30 = vmax.f32 %v3566_v21, 0.0  ;;  %v3417_v36 = vmax.f32 %v3353_v45, 0.0 }
 0x3ae   : > { %v2729_v41 = vpop.f32.mrf.mxu3 }
 0x3af   : > { %v2819_v59 = vadd.f32 %v2729_v41, %v7121_v47  ;;  %3613 = vmatmul.f32.gmra.mxu1 %v3417_v36  ;;  %3854 = vmatmul.f32.gmra.mxu2 %v3690_v30  ;;  %v3201_v40 = vpop.f32.mrf.mxu0  ;;  %v7127_v30 = vld [vmem:[#allocation36_spill] sm:$0xff] }
 0x3b1   : > { %v3288_v9 = vadd.f32 %v3198_v34, %v2819_v59 }
 0x3b2   : > { %v3807_v42 = vpop.f32.mrf.mxu2 }
 0x3b3   : > { %3964 = vst.msk [vmem:[%s6536_s26 + $0x90] sm:$0xff] %vm3945_vm2, %v3807_v42  ;;  %v3354_v33 = vadd.f32 %v6674_v62, %v3288_v9 }
 0x3b4   : > { %v3569_v51 = vpop.f32.mrf.mxu1 }
 0x3b5   : > { %v3691_v31 = vmax.f32 %v3569_v51, 0.0  ;;  %v3418_v35 = vmax.f32 %v3354_v33, 0.0 }
 0x3b6   : > { %v2732_v6 = vpop.f32.mrf.mxu3 }
 0x3b7   : > { %v2820_v44 = vadd.f32 %v2732_v6, %v7122_v24  ;;  %3616 = vmatmul.f32.gmra.mxu1 %v3418_v35  ;;  %3857 = vmatmul.f32.gmra.mxu2 %v3691_v31  ;;  %v3204_v18 = vpop.f32.mrf.mxu0  ;;  %v7128_v31 = vld [vmem:[#allocation40_spill] sm:$0xff] }
 0x3b9   : > { %v3289_v23 = vadd.f32 %v3201_v40, %v2820_v44 }
 0x3ba   : > { %v3810_v22 = vpop.f32.mrf.mxu2 }
 0x3bb   : > { %3965 = vst.msk [vmem:[%s6536_s26 + $0x98] sm:$0xff] %vm3945_vm2, %v3810_v22  ;;  %v3355_v55 = vadd.f32 %v6674_v62, %v3289_v23 }
 0x3bc   : > { %v3572_v17 = vpop.f32.mrf.mxu1 }
 0x3bd   : > { %v3692_v39 = vmax.f32 %v3572_v17, 0.0  ;;  %v3419_v8 = vmax.f32 %v3355_v55, 0.0 }
 0x3be   : > { %v2735_v4 = vpop.f32.mrf.mxu3 }
 0x3bf   : > { %v2821_v43 = vadd.f32 %v2735_v4, %v7123_v13  ;;  %3619 = vmatmul.f32.gmra.mxu1 %v3419_v8  ;;  %3860 = vmatmul.f32.gmra.mxu2 %v3692_v39  ;;  %v3207_v25 = vpop.f32.mrf.mxu0  ;;  %v7129_v39 = vld [vmem:[#allocation44_spill] sm:$0xff] }
 0x3c1   : > { %v3290_v0 = vadd.f32 %v3204_v18, %v2821_v43 }
 0x3c2   : > { %v3813_v38 = vpop.f32.mrf.mxu2 }
 0x3c3   : > { %3966 = vst.msk [vmem:[%s6536_s26 + $0xa0] sm:$0xff] %vm3945_vm2, %v3813_v38  ;;  %v3356_v26 = vadd.f32 %v6674_v62, %v3290_v0 }
 0x3c4   : > { %v3575_v12 = vpop.f32.mrf.mxu1 }
 0x3c5   : > { %v3693_v46 = vmax.f32 %v3575_v12, 0.0  ;;  %v3420_v27 = vmax.f32 %v3356_v26, 0.0 }
 0x3c6   : > { %v2738_v14 = vpop.f32.mrf.mxu3 }
 0x3c7   : > { %v2822_v15 = vadd.f32 %v2738_v14, %v7124_v37  ;;  %3622 = vmatmul.f32.gmra.mxu1 %v3420_v27  ;;  %3863 = vmatmul.f32.gmra.mxu2 %v3693_v46  ;;  %v3210_v48 = vpop.f32.mrf.mxu0  ;;  %v7130_v46 = vld [vmem:[#allocation48_spill] sm:$0xff] }
 0x3c9   : > { %v3291_v56 = vadd.f32 %v3207_v25, %v2822_v15 }
 0x3ca   : > { %v3816_v50 = vpop.f32.mrf.mxu2 }
 0x3cb   : > { %3967 = vst.msk [vmem:[%s6536_s26 + $0xa8] sm:$0xff] %vm3945_vm2, %v3816_v50  ;;  %v3357_v16 = vadd.f32 %v6674_v62, %v3291_v56 }
 0x3cc   : > { %v3578_v63 = vpop.f32.mrf.mxu1 }
 0x3cd   : > { %v3694_v49 = vmax.f32 %v3578_v63, 0.0  ;;  %v3421_v29 = vmax.f32 %v3357_v16, 0.0 }
 0x3ce   : > { %v2741_v57 = vpop.f32.mrf.mxu3 }
 0x3cf   : > { %v2823_v53 = vadd.f32 %v2741_v57, %v7125_v52  ;;  %3625 = vmatmul.f32.gmra.mxu1 %v3421_v29  ;;  %3866 = vmatmul.f32.gmra.mxu2 %v3694_v49  ;;  %v3213_v3 = vpop.f32.mrf.mxu0  ;;  %v7131_v49 = vld [vmem:[#allocation52_spill] sm:$0xff] }
 0x3d1   : > { %v3292_v58 = vadd.f32 %v3210_v48, %v2823_v53 }
 0x3d2   : > { %v3819_v20 = vpop.f32.mrf.mxu2 }
 0x3d3   : > { %3968 = vst.msk [vmem:[%s6536_s26 + $0xb0] sm:$0xff] %vm3945_vm2, %v3819_v20  ;;  %v3358_v10 = vadd.f32 %v6674_v62, %v3292_v58 }
 0x3d4   : > { %v3581_v5 = vpop.f32.mrf.mxu1 }
 0x3d5   : > { %v3695_v32 = vmax.f32 %v3581_v5, 0.0  ;;  %v3422_v19 = vmax.f32 %v3358_v10, 0.0 }
 0x3d6   : > { %v2744_v60 = vpop.f32.mrf.mxu3 }
 0x3d7   : > { %v2824_v7 = vadd.f32 %v2744_v60, %v7126_v1  ;;  %3628 = vmatmul.f32.gmra.mxu1 %v3422_v19  ;;  %3869 = vmatmul.f32.gmra.mxu2 %v3695_v32  ;;  %v3216_v2 = vpop.f32.mrf.mxu0  ;;  %v7132_v32 = vld [vmem:[#allocation55_spill] sm:$0xff] }
 0x3d9   : > { %v3293_v61 = vadd.f32 %v3213_v3, %v2824_v7 }
 0x3da   : > { %v3822_v54 = vpop.f32.mrf.mxu2 }
 0x3db   : > { %3969 = vst.msk [vmem:[%s6536_s26 + $0xb8] sm:$0xff] %vm3945_vm2, %v3822_v54  ;;  %v3359_v34 = vadd.f32 %v6674_v62, %v3293_v61 }
 0x3dc   : > { %v3584_v28 = vpop.f32.mrf.mxu1 }
 0x3dd   : > { %v3696_v11 = vmax.f32 %v3584_v28, 0.0  ;;  %v3423_v45 = vmax.f32 %v3359_v34, 0.0  ;;  %v7133_v28 = vld [vmem:[#allocation59_spill] sm:$0xff] }
 0x3de   : > { %v2747_v21 = vpop.f32.mrf.mxu3 }
 0x3df   : > { %v2825_v36 = vadd.f32 %v2747_v21, %v7127_v30  ;;  %3631 = vmatmul.f32.gmra.mxu1 %v3423_v45  ;;  %3872 = vmatmul.f32.gmra.mxu2 %v3696_v11  ;;  %v3219_v41 = vpop.f32.mrf.mxu0 }
 0x3e1   : > { %v3294_v47 = vadd.f32 %v3216_v2, %v2825_v36 }
 0x3e2   : > { %v3825_v59 = vpop.f32.mrf.mxu2 }
 0x3e3   : > { %3970 = vst.msk [vmem:[%s6536_s26 + $0xc0] sm:$0xff] %vm3945_vm2, %v3825_v59  ;;  %v3360_v40 = vadd.f32 %v6674_v62, %v3294_v47 }
 0x3e4   : > { %v3587_v9 = vpop.f32.mrf.mxu1 }
 0x3e5   : > { %v3697_v42 = vmax.f32 %v3587_v9, 0.0  ;;  %v3424_v33 = vmax.f32 %v3360_v40, 0.0 }
 0x3e6   : > { %v2750_v51 = vpop.f32.mrf.mxu3 }
 0x3e7   : > { %v2826_v35 = vadd.f32 %v2750_v51, %v7128_v31  ;;  %3634 = vmatmul.f32.gmra.mxu1 %v3424_v33  ;;  %3875 = vmatmul.f32.gmra.mxu2 %v3697_v42  ;;  %v3222_v6 = vpop.f32.mrf.mxu0 }
 0x3e9   : > { %v3295_v24 = vadd.f32 %v3219_v41, %v2826_v35 }
 0x3ea   : > { %v3828_v44 = vpop.f32.mrf.mxu2 }
 0x3eb   : > { %3971 = vst.msk [vmem:[%s6536_s26 + $0xc8] sm:$0xff] %vm3945_vm2, %v3828_v44  ;;  %v3361_v18 = vadd.f32 %v6674_v62, %v3295_v24 }
 0x3ec   : > { %v3590_v23 = vpop.f32.mrf.mxu1 }
 0x3ed   : > { %v3698_v22 = vmax.f32 %v3590_v23, 0.0  ;;  %v3425_v55 = vmax.f32 %v3361_v18, 0.0 }
 0x3ee   : > { %v2753_v17 = vpop.f32.mrf.mxu3 }
 0x3ef   : > { %v2827_v8 = vadd.f32 %v2753_v17, %v7129_v39  ;;  %3637 = vmatmul.f32.gmra.mxu1 %v3425_v55  ;;  %3878 = vmatmul.f32.gmra.mxu2 %v3698_v22  ;;  %v3225_v13 = vpop.f32.mrf.mxu0 }
 0x3f1   : > { %v3296_v4 = vadd.f32 %v3222_v6, %v2827_v8 }
 0x3f2   : > { %v3831_v43 = vpop.f32.mrf.mxu2 }
 0x3f3   : > { %3972 = vst.msk [vmem:[%s6536_s26 + $0xd0] sm:$0xff] %vm3945_vm2, %v3831_v43  ;;  %v3362_v25 = vadd.f32 %v6674_v62, %v3296_v4 }
 0x3f4   : > { %v3593_v0 = vpop.f32.mrf.mxu1 }
 0x3f5   : > { %v3699_v38 = vmax.f32 %v3593_v0, 0.0  ;;  %v3426_v26 = vmax.f32 %v3362_v25, 0.0 }
 0x3f6   : > { %v2756_v12 = vpop.f32.mrf.mxu3 }
 0x3f7   : > { %v2828_v27 = vadd.f32 %v2756_v12, %v7130_v46  ;;  %3640 = vmatmul.f32.gmra.mxu1 %v3426_v26  ;;  %3881 = vmatmul.f32.gmra.mxu2 %v3699_v38  ;;  %v3228_v48 = vpop.f32.mrf.mxu0 }
 0x3f9   : > { %v3297_v14 = vadd.f32 %v3225_v13, %v2828_v27 }
 0x3fa   : > { %v3834_v37 = vpop.f32.mrf.mxu2 }
 0x3fb   : > { %3973 = vst.msk [vmem:[%s6536_s26 + $0xd8] sm:$0xff] %vm3945_vm2, %v3834_v37  ;;  %v3363_v15 = vadd.f32 %v6674_v62, %v3297_v14 }
 0x3fc   : > { %v3596_v56 = vpop.f32.mrf.mxu1 }
 0x3fd   : > { %v3700_v50 = vmax.f32 %v3596_v56, 0.0  ;;  %v3427_v16 = vmax.f32 %v3363_v15, 0.0 }
 0x3fe   : > { %v2759_v63 = vpop.f32.mrf.mxu3 }
 0x3ff   : > { %v2829_v29 = vadd.f32 %v2759_v63, %v7131_v49  ;;  %3643 = vmatmul.f32.gmra.mxu1 %v3427_v16  ;;  %3884 = vmatmul.f32.gmra.mxu2 %v3700_v50  ;;  %v3231_v10 = vpop.f32.mrf.mxu0 }
 0x401   : > { %v3298_v57 = vadd.f32 %v3228_v48, %v2829_v29 }
 0x402   : > { %v3837_v52 = vpop.f32.mrf.mxu2 }
 0x403   : > { %3974 = vst.msk [vmem:[%s6536_s26 + $0xe0] sm:$0xff] %vm3945_vm2, %v3837_v52  ;;  %v3364_v53 = vadd.f32 %v6674_v62, %v3298_v57 }
 0x404   : > { %v3599_v3 = vpop.f32.mrf.mxu1 }
 0x405   : > { %v3701_v58 = vmax.f32 %v3599_v3, 0.0  ;;  %v3428_v20 = vmax.f32 %v3364_v53, 0.0 }
 0x406   : > { %v2762_v5 = vpop.f32.mrf.mxu3 }
 0x407   : > { %v2830_v19 = vadd.f32 %v2762_v5, %v7132_v32  ;;  %3646 = vmatmul.f32.gmra.mxu1 %v3428_v20  ;;  %3887 = vmatmul.f32.gmra.mxu2 %v3701_v58  ;;  %v3234_v45 = vpop.f32.mrf.mxu0 }
 0x409   : > { %v3299_v60 = vadd.f32 %v3231_v10, %v2830_v19 }
 0x40a   : > { %v3840_v1 = vpop.f32.mrf.mxu2 }
 0x40b   : > { %3975 = vst.msk [vmem:[%s6536_s26 + $0xe8] sm:$0xff] %vm3945_vm2, %v3840_v1  ;;  %v3365_v7 = vadd.f32 %v6674_v62, %v3299_v60 }
 0x40c   : > { %v3602_v2 = vpop.f32.mrf.mxu1 }
 0x40d   : > { %v3702_v61 = vmax.f32 %v3602_v2, 0.0  ;;  %v3429_v54 = vmax.f32 %v3365_v7, 0.0 }
 0x40e   : > { %v2765_v34 = vpop.f32.mrf.mxu3 }
 0x40f   : > { %v2831_v11 = vadd.f32 %v2765_v34, %v7133_v28  ;;  %3649 = vmatmul.f32.gmra.mxu1 %v3429_v54  ;;  %3890 = vmatmul.f32.gmra.mxu2 %v3702_v61 }
 0x411   : > { %v3300_v21 = vadd.f32 %v3234_v45, %v2831_v11 }
 0x412   : > { %v3843_v30 = vpop.f32.mrf.mxu2 }
 0x413   : > { %3976 = vst.msk [vmem:[%s6536_s26 + $0xf0] sm:$0xff] %vm3945_vm2, %v3843_v30  ;;  %v3366_v36 = vadd.f32 %v6674_v62, %v3300_v21 }
 0x414   : > { %v3605_v41 = vpop.f32.mrf.mxu1 }
 0x415   : > { %v3703_v47 = vmax.f32 %v3605_v41, 0.0  ;;  %v3430_v59 = vmax.f32 %v3366_v36, 0.0 }
 0x417   : > { %3652 = vmatmul.f32.gmra.mxu1 %v3430_v59  ;;  %3893 = vmatmul.f32.gmra.mxu2 %v3703_v47 }
 0x41a   : > { %v3846_v40 = vpop.f32.mrf.mxu2 }
 0x41b   : > { %3977 = vst.msk [vmem:[%s6536_s26 + $0xf8] sm:$0xff] %vm3945_vm2, %v3846_v40 }
 0x41c   : > { %v3608_v9 = vpop.f32.mrf.mxu1 }
 0x41d   : > { %v3704_v42 = vmax.f32 %v3608_v9, 0.0 }
 0x41f   : > { %3896 = vmatmul.f32.gmra.mxu2 %v3704_v42 }
 0x422   : > { %v3849_v33 = vpop.f32.mrf.mxu2 }
 0x423   : > { %3978 = vst.msk [vmem:[%s6536_s26 + $0x100] sm:$0xff] %vm3945_vm2, %v3849_v33 }
 0x424   : > { %v3611_v51 = vpop.f32.mrf.mxu1 }
 0x425   : > { %v3705_v31 = vmax.f32 %v3611_v51, 0.0 }
 0x427   : > { %3899 = vmatmul.f32.gmra.mxu2 %v3705_v31 }
 0x42a   : > { %v3852_v62 = vpop.f32.mrf.mxu2 }
 0x42b   : > { %3979 = vst.msk [vmem:[%s6536_s26 + $0x108] sm:$0xff] %vm3945_vm2, %v3852_v62 }
 0x42c   : > { %v3614_v35 = vpop.f32.mrf.mxu1 }
 0x42d   : > { %v3706_v6 = vmax.f32 %v3614_v35, 0.0 }
 0x42f   : > { %3902 = vmatmul.f32.gmra.mxu2 %v3706_v6 }
 0x432   : > { %v3855_v24 = vpop.f32.mrf.mxu2 }
 0x433   : > { %3980 = vst.msk [vmem:[%s6536_s26 + $0x110] sm:$0xff] %vm3945_vm2, %v3855_v24 }
 0x434   : > { %v3617_v44 = vpop.f32.mrf.mxu1 }
 0x435   : > { %v3707_v18 = vmax.f32 %v3617_v44, 0.0 }
 0x437   : > { %3905 = vmatmul.f32.gmra.mxu2 %v3707_v18 }
 0x43a   : > { %v3858_v23 = vpop.f32.mrf.mxu2 }
 0x43b   : > { %3981 = vst.msk [vmem:[%s6536_s26 + $0x118] sm:$0xff] %vm3945_vm2, %v3858_v23 }
 0x43c   : > { %v3620_v22 = vpop.f32.mrf.mxu1 }
 0x43d   : > { %v3708_v55 = vmax.f32 %v3620_v22, 0.0 }
 0x43f   : > { %3908 = vmatmul.f32.gmra.mxu2 %v3708_v55 }
 0x442   : > { %v3861_v17 = vpop.f32.mrf.mxu2 }
 0x443   : > { %3982 = vst.msk [vmem:[%s6536_s26 + $0x120] sm:$0xff] %vm3945_vm2, %v3861_v17 }
 0x444   : > { %v3623_v39 = vpop.f32.mrf.mxu1 }
 0x445   : > { %v3709_v8 = vmax.f32 %v3623_v39, 0.0 }
 0x447   : > { %3911 = vmatmul.f32.gmra.mxu2 %v3709_v8 }
 0x44a   : > { %v3864_v4 = vpop.f32.mrf.mxu2 }
 0x44b   : > { %3983 = vst.msk [vmem:[%s6536_s26 + $0x128] sm:$0xff] %vm3945_vm2, %v3864_v4 }
 0x44c   : > { %v3626_v13 = vpop.f32.mrf.mxu1 }
 0x44d   : > { %v3710_v43 = vmax.f32 %v3626_v13, 0.0 }
 0x44f   : > { %3914 = vmatmul.f32.gmra.mxu2 %v3710_v43 }
 0x452   : > { %v3867_v25 = vpop.f32.mrf.mxu2 }
 0x453   : > { %3984 = vst.msk [vmem:[%s6536_s26 + $0x130] sm:$0xff] %vm3945_vm2, %v3867_v25 }
 0x454   : > { %v3629_v0 = vpop.f32.mrf.mxu1 }
 0x455   : > { %v3711_v38 = vmax.f32 %v3629_v0, 0.0 }
 0x457   : > { %3917 = vmatmul.f32.gmra.mxu2 %v3711_v38 }
 0x45a   : > { %v3870_v26 = vpop.f32.mrf.mxu2 }
 0x45b   : > { %3985 = vst.msk [vmem:[%s6536_s26 + $0x138] sm:$0xff] %vm3945_vm2, %v3870_v26 }
 0x45c   : > { %v3632_v12 = vpop.f32.mrf.mxu1 }
 0x45d   : > { %v3712_v46 = vmax.f32 %v3632_v12, 0.0 }
 0x45f   : > { %3920 = vmatmul.f32.gmra.mxu2 %v3712_v46 }
 0x462   : > { %v3873_v27 = vpop.f32.mrf.mxu2 }
 0x463   : > { %3986 = vst.msk [vmem:[%s6536_s26 + $0x140] sm:$0xff] %vm3945_vm2, %v3873_v27 }
 0x464   : > { %v3635_v14 = vpop.f32.mrf.mxu1 }
 0x465   : > { %v3713_v37 = vmax.f32 %v3635_v14, 0.0 }
 0x467   : > { %3923 = vmatmul.f32.gmra.mxu2 %v3713_v37 }
 0x46a   : > { %v3876_v15 = vpop.f32.mrf.mxu2 }
 0x46b   : > { %3987 = vst.msk [vmem:[%s6536_s26 + $0x148] sm:$0xff] %vm3945_vm2, %v3876_v15 }
 0x46c   : > { %v3638_v48 = vpop.f32.mrf.mxu1 }
 0x46d   : > { %v3714_v56 = vmax.f32 %v3638_v48, 0.0 }
 0x46f   : > { %3926 = vmatmul.f32.gmra.mxu2 %v3714_v56 }
 0x472   : > { %v3879_v50 = vpop.f32.mrf.mxu2 }
 0x473   : > { %3988 = vst.msk [vmem:[%s6536_s26 + $0x150] sm:$0xff] %vm3945_vm2, %v3879_v50 }
 0x474   : > { %v3641_v16 = vpop.f32.mrf.mxu1 }
 0x475   : > { %v3715_v63 = vmax.f32 %v3641_v16, 0.0 }
 0x477   : > { %3929 = vmatmul.f32.gmra.mxu2 %v3715_v63 }
 0x47a   : > { %v3882_v49 = vpop.f32.mrf.mxu2 }
 0x47b   : > { %3989 = vst.msk [vmem:[%s6536_s26 + $0x158] sm:$0xff] %vm3945_vm2, %v3882_v49 }
 0x47c   : > { %v3644_v29 = vpop.f32.mrf.mxu1 }
 0x47d   : > { %v3716_v57 = vmax.f32 %v3644_v29, 0.0 }
 0x47f   : > { %3932 = vmatmul.f32.gmra.mxu2 %v3716_v57 }
 0x482   : > { %v3885_v52 = vpop.f32.mrf.mxu2 }
 0x483   : > { %3990 = vst.msk [vmem:[%s6536_s26 + $0x160] sm:$0xff] %vm3945_vm2, %v3885_v52 }
 0x484   : > { %v3647_v53 = vpop.f32.mrf.mxu1 }
 0x485   : > { %v3717_v3 = vmax.f32 %v3647_v53, 0.0 }
 0x487   : > { %3935 = vmatmul.f32.gmra.mxu2 %v3717_v3 }
 0x48a   : > { %v3888_v58 = vpop.f32.mrf.mxu2 }
 0x48b   : > { %3991 = vst.msk [vmem:[%s6536_s26 + $0x168] sm:$0xff] %vm3945_vm2, %v3888_v58 }
 0x48c   : > { %v3650_v20 = vpop.f32.mrf.mxu1 }
 0x48d   : > { %v3718_v10 = vmax.f32 %v3650_v20, 0.0 }
 0x48f   : > { %3938 = vmatmul.f32.gmra.mxu2 %v3718_v10 }
 0x492   : > { %v3891_v5 = vpop.f32.mrf.mxu2 }
 0x493   : > { %3992 = vst.msk [vmem:[%s6536_s26 + $0x170] sm:$0xff] %vm3945_vm2, %v3891_v5 }
 0x494   : > { %v3653_v32 = vpop.f32.mrf.mxu1 }
 0x495   : > { %v3719_v19 = vmax.f32 %v3653_v32, 0.0 }
 0x497   : > { %3941 = vmatmul.f32.gmra.mxu2 %v3719_v19 }
 0x49a   : > { %v3894_v60 = vpop.f32.mrf.mxu2 }
 0x49b   : > { %3993 = vst.msk [vmem:[%s6536_s26 + $0x178] sm:$0xff] %vm3945_vm2, %v3894_v60 }
 0x4a2   : > { %v3897_v1 = vpop.f32.mrf.mxu2 }
 0x4a3   : > { %3994 = vst.msk [vmem:[%s6536_s26 + $0x180] sm:$0xff] %vm3945_vm2, %v3897_v1 }
 0x4aa   : > { %v3900_v7 = vpop.f32.mrf.mxu2 }
 0x4ab   : > { %3995 = vst.msk [vmem:[%s6536_s26 + $0x188] sm:$0xff] %vm3945_vm2, %v3900_v7 }
 0x4b2   : > { %v3903_v2 = vpop.f32.mrf.mxu2 }
 0x4b3   : > { %3996 = vst.msk [vmem:[%s6536_s26 + $0x190] sm:$0xff] %vm3945_vm2, %v3903_v2 }
 0x4ba   : > { %v3906_v61 = vpop.f32.mrf.mxu2 }
 0x4bb   : > { %3997 = vst.msk [vmem:[%s6536_s26 + $0x198] sm:$0xff] %vm3945_vm2, %v3906_v61 }
 0x4c2   : > { %v3909_v54 = vpop.f32.mrf.mxu2 }
 0x4c3   : > { %3998 = vst.msk [vmem:[%s6536_s26 + $0x1a0] sm:$0xff] %vm3945_vm2, %v3909_v54 }
 0x4ca   : > { %v3912_v34 = vpop.f32.mrf.mxu2 }
 0x4cb   : > { %3999 = vst.msk [vmem:[%s6536_s26 + $0x1a8] sm:$0xff] %vm3945_vm2, %v3912_v34 }
 0x4d2   : > { %v3915_v28 = vpop.f32.mrf.mxu2 }
 0x4d3   : > { %4000 = vst.msk [vmem:[%s6536_s26 + $0x1b0] sm:$0xff] %vm3945_vm2, %v3915_v28 }
 0x4da   : > { %v3918_v11 = vpop.f32.mrf.mxu2 }
 0x4db   : > { %4001 = vst.msk [vmem:[%s6536_s26 + $0x1b8] sm:$0xff] %vm3945_vm2, %v3918_v11 }
 0x4e2   : > { %v3921_v45 = vpop.f32.mrf.mxu2 }
 0x4e3   : > { %4002 = vst.msk [vmem:[%s6536_s26 + $0x1c0] sm:$0xff] %vm3945_vm2, %v3921_v45 }
 0x4ea   : > { %v3924_v21 = vpop.f32.mrf.mxu2 }
 0x4eb   : > { %4003 = vst.msk [vmem:[%s6536_s26 + $0x1c8] sm:$0xff] %vm3945_vm2, %v3924_v21 }
 0x4f2   : > { %v3927_v30 = vpop.f32.mrf.mxu2 }
 0x4f3   : > { %4004 = vst.msk [vmem:[%s6536_s26 + $0x1d0] sm:$0xff] %vm3945_vm2, %v3927_v30 }
 0x4fa   : > { %v3930_v36 = vpop.f32.mrf.mxu2 }
 0x4fb   : > { %4005 = vst.msk [vmem:[%s6536_s26 + $0x1d8] sm:$0xff] %vm3945_vm2, %v3930_v36 }
 0x502   : > { %v3933_v41 = vpop.f32.mrf.mxu2 }
 0x503   : > { %4006 = vst.msk [vmem:[%s6536_s26 + $0x1e0] sm:$0xff] %vm3945_vm2, %v3933_v41 }
 0x50a   : > { %v3936_v47 = vpop.f32.mrf.mxu2 }
 0x50b   : > { %4007 = vst.msk [vmem:[%s6536_s26 + $0x1e8] sm:$0xff] %vm3945_vm2, %v3936_v47 }
 0x512   : > { %v3939_v59 = vpop.f32.mrf.mxu2 }
 0x513   : > { %4008 = vst.msk [vmem:[%s6536_s26 + $0x1f0] sm:$0xff] %vm3945_vm2, %v3939_v59 }
 0x51a   : > { %v3942_v40 = vpop.f32.mrf.mxu2 }
 0x51b   : > { %4009 = vst.msk [vmem:[%s6536_s26 + $0x1f8] sm:$0xff] %vm3945_vm2, %v3942_v40 }
 0x51c PF: > { %s16_s21 = sadd.s32 1, %s4686_s21  }
 0x51d   : > { %p13_p4 = scmp.ge.s32.totalorder %s16_s21, 6  }
 0x51f   :  { %15 = sbr.rel (!%p13_p4) target bundleno = 1 (0x1), region = 74 }

</bundles_post_ra>
